<compile_context>
chip_gen: v7x
topology: tpu7x:2x2x1
jax: 0.10.0
libtpu: 0.0.40
codegen_flags: <defaults>
</compile_context>

<pallas_src>
import jax
import jax.numpy as jnp
from jax import lax
from jax.experimental import pallas as pl


# ----------------------------- fused Pallas kernel --------------------------

def make_fused_gat_kernel(layer_cfgs):
    """layer_cfgs: tuple of (heads, out_ch, concat) per layer (all static)."""
    num_layers = len(layer_cfgs)

    def kernel(*refs):
        # refs = (x, mask_bias, [w, att_src, att_dst_T, bias] * L, out)
        x_ref, mask_ref = refs[0], refs[1]
        o_ref = refs[-1]
        lrefs = refs[2:-1]

        x = x_ref[...]              # [N, F_in]
        mask_bias = mask_ref[...]   # [N, N] additive mask: 0.0 on edges, -1e30 elsewhere

        for li, (heads, out_ch, concat) in enumerate(layer_cfgs):
            w_ref, asrc_ref, adstT_ref, b_ref = lrefs[4 * li: 4 * li + 4]

            # Feature projection, kept lane-dense: [N, H*C].
            xw = jnp.dot(x, w_ref[...], preferred_element_type=jnp.float32)

            head_outs = []
            for h in range(heads):  # static unroll: no serial grid-step overhead
                xh = xw[:, h * out_ch:(h + 1) * out_ch]                    # [N, C]

                # alpha_src[j] as a row [1, N]:  att_src[h] @ xh^T  (A @ B.T pattern)
                a_src = lax.dot_general(
                    asrc_ref[h:h + 1, :], xh,
                    dimension_numbers=(((1,), (1,)), ((), ())),
                    preferred_element_type=jnp.float32)                    # [1, N]
                # alpha_dst[i] as a column [N, 1]:  xh @ att_dst^T[:, h]
                a_dst = jnp.dot(xh, adstT_ref[:, h:h + 1],
                                preferred_element_type=jnp.float32)        # [N, 1]

                scores = a_dst + a_src                                     # e[i, j]   [N, N]
                scores = jnp.where(scores > 0, scores, 0.2 * scores)       # LeakyReLU(0.2)
                scores = scores + mask_bias                                # mask non-edges

                # Masked softmax over source nodes j (self loops guarantee >=1 edge/row).
                m = jnp.max(scores, axis=-1, keepdims=True)
                p = jnp.exp(scores - m)
                inv = pl.reciprocal(jnp.sum(p, axis=-1, keepdims=True), approx=True)
                attn = p * inv

                head_outs.append(
                    jnp.dot(attn, xh, preferred_element_type=jnp.float32))  # [N, C]

            if concat:
                out = head_outs[0] if heads == 1 else jnp.concatenate(head_outs, axis=-1)
            else:  # mean over heads
                acc = head_outs[0]
                for ho in head_outs[1:]:
                    acc = acc + ho
                out = acc * (1.0 / float(heads))

            out = out + b_ref[...]                                          # bias [1, dim]

            if li != num_layers - 1:
                # ELU; min() keeps exp() off large positives (that branch is masked anyway).
                out = jnp.where(out > 0.0, out, jnp.exp(jnp.minimum(out, 0.0)) - 1.0)

            x = out

        o_ref[...] = x

    return kernel


def gat_forward(layers, x, mask_bias):
    n = x.shape[0]
    cfgs = []
    args = [x, mask_bias]
    for layer in layers:
        heads, out_ch, concat = layer["heads"], layer["out_ch"], layer["concat"]
        cfgs.append((heads, out_ch, concat))
        args += [
            layer["w"],               # [F_in, H*C]
            layer["att_src"],         # [H, C]
            layer["att_dst"].T,       # [C, H]  (column-sliceable per head)
            layer["bias"][None, :],   # [1, dim]
        ]
    last = layers[-1]
    out_dim = last["heads"] * last["out_ch"] if last["concat"] else last["out_ch"]

    out = pl.pallas_call(
        make_fused_gat_kernel(tuple(cfgs)),
        out_shape=jax.ShapeDtypeStruct((n, out_dim), jnp.float32),
    )(*args)
    return {"x": out}


# ------------------------ pure-JAX reference (check) ------------------------

def _gat_conv_ref(x, adj, layer):
    heads, out_ch, concat = layer["heads"], layer["out_ch"], layer["concat"]
    n = x.shape[0]
    xw = x @ layer["w"]
    xh = xw.reshape(n, heads, out_ch).transpose(1, 0, 2)
    asrc = jnp.einsum("hnc,hc->hn", xh, layer["att_src"])
    adst = jnp.einsum("hnc,hc->hn", xh, layer["att_dst"])
    scores = adst[:, :, None] + asrc[:, None, :]
    scores = jnp.where(scores > 0, scores, 0.2 * scores)
    scores = jnp.where(adj[None] > 0, scores, -1e30)
    attn = jax.nn.softmax(scores, axis=-1)
    out = jnp.einsum("hij,hjc->hic", attn, xh)
    if concat:
        out = out.transpose(1, 0, 2).reshape(n, heads * out_ch)
    else:
        out = jnp.mean(out, axis=0)
    return out + layer["bias"]


def gat_forward_ref(cfg, layers, x, adj):
    for i in range(cfg["num_layers"]):
        x = _gat_conv_ref(x, adj, layers[i])
        if i != cfg["num_layers"] - 1:
            x = jnp.where(x > 0, x, jnp.exp(jnp.minimum(x, 0.0)) - 1.0)
    return {"x": x}


# --------------------------------- main -------------------------------------

def make_layer(key, in_ch, out_ch, heads, concat):
    k1, k2, k3 = jax.random.split(key, 3)
    w = jax.random.normal(k1, (in_ch, heads * out_ch), jnp.float32) / jnp.sqrt(float(in_ch))
    att_src = jax.random.normal(k2, (heads, out_ch), jnp.float32) * 0.1
    att_dst = jax.random.normal(k3, (heads, out_ch), jnp.float32) * 0.1
    bias = jnp.zeros((heads * out_ch if concat else out_ch,), jnp.float32)
    return dict(w=w, att_src=att_src, att_dst=att_dst, bias=bias,
                heads=heads, out_ch=out_ch, concat=concat)


if __name__ == "__main__":
    cfg = {"num_layers": 3, "in_channel": 16, "hidden_channel": 32,
           "out_channel": 8, "dropout_rate": 0.5}
    N, E = 16, 48

    key = jax.random.PRNGKey(0)
    kx, ke, kp = jax.random.split(key, 3)

    x = jax.random.normal(kx, (N, cfg["in_channel"]), jnp.float32)
    edge_index = jax.random.randint(ke, (2, E), 0, N)

    # dense adjacency (adj[dst, src] = 1) + self loops (GATConv add_self_loops=True)
    adj = jnp.zeros((N, N), jnp.float32).at[edge_index[1], edge_index[0]].set(1.0)
    adj = adj.at[jnp.arange(N), jnp.arange(N)].set(1.0)
    # additive mask computed ONCE on host: 0 on edges, -1e30 on non-edges
    mask_bias = jnp.where(adj > 0, 0.0, -1e30).astype(jnp.float32)

    # layer stack exactly as in the PyTorch module __init__
    lkeys = jax.random.split(kp, cfg["num_layers"])
    layers = [
        make_layer(lkeys[0], cfg["in_channel"], cfg["hidden_channel"] // 8, heads=8, concat=True),
        make_layer(lkeys[1], cfg["hidden_channel"], cfg["hidden_channel"] // 8, heads=8, concat=True),
        make_layer(lkeys[2], cfg["hidden_channel"], cfg["out_channel"], heads=1, concat=False),
    ]

    out = gat_forward(layers, x, mask_bias)
    out_x = jax.block_until_ready(out["x"])

    ref_x = gat_forward_ref(cfg, layers, x, adj)["x"]
    assert out_x.shape == (N, cfg["out_channel"])
    # tolerance covers the EUP approximate reciprocal used in the in-kernel softmax
    assert jnp.allclose(out_x, ref_x, atol=5e-3, rtol=5e-3), "Pallas output mismatch vs reference"

    print("KERNEL_OK")
</pallas_src>

<mosaic_0001>
module attributes {stable_mosaic.version = 11 : i64} {
  func.func @kernel(%arg0: memref<16x16xf32, #tpu.memory_space<vmem>>, %arg1: memref<16x16xf32, #tpu.memory_space<vmem>>, %arg2: memref<16x32xf32, #tpu.memory_space<vmem>>, %arg3: memref<8x4xf32, #tpu.memory_space<vmem>>, %arg4: memref<4x8xf32, #tpu.memory_space<vmem>>, %arg5: memref<1x32xf32, #tpu.memory_space<vmem>>, %arg6: memref<32x32xf32, #tpu.memory_space<vmem>>, %arg7: memref<8x4xf32, #tpu.memory_space<vmem>>, %arg8: memref<4x8xf32, #tpu.memory_space<vmem>>, %arg9: memref<1x32xf32, #tpu.memory_space<vmem>>, %arg10: memref<32x8xf32, #tpu.memory_space<vmem>>, %arg11: memref<1x8xf32, #tpu.memory_space<vmem>>, %arg12: memref<8x1xf32, #tpu.memory_space<vmem>>, %arg13: memref<1x8xf32, #tpu.memory_space<vmem>>, %arg14: memref<16x8xf32, #tpu.memory_space<vmem>>) attributes {dimension_semantics = [], scalar_prefetch = 0 : i64, scratch_operands = 0 : i64, tpu.core_type = #tpu.core_type<tc>} {
    %c0 = arith.constant 0 : index
    %c0_0 = arith.constant 0 : index
    %0 = vector.load %arg0[%c0, %c0_0] : memref<16x16xf32, #tpu.memory_space<vmem>>, vector<16x16xf32>
    %c0_1 = arith.constant 0 : index
    %c0_2 = arith.constant 0 : index
    %1 = vector.load %arg1[%c0_1, %c0_2] : memref<16x16xf32, #tpu.memory_space<vmem>>, vector<16x16xf32>
    %c0_3 = arith.constant 0 : index
    %c0_4 = arith.constant 0 : index
    %2 = vector.load %arg2[%c0_3, %c0_4] : memref<16x32xf32, #tpu.memory_space<vmem>>, vector<16x32xf32>
    %cst = arith.constant dense<0.000000e+00> : vector<16x32xf32>
    %3 = tpu.matmul %0, %2, %cst {dimension_numbers = #tpu.dot_dimension_numbers<[1], [0], [0], [1], [0, 0, 1, 1], [], []>} : vector<16x16xf32>, vector<16x32xf32>, vector<16x32xf32> -> vector<16x32xf32>
    %4 = vector.extract_strided_slice %3 {offsets = [0, 0], sizes = [16, 4], strides = [1, 1]} : vector<16x32xf32> to vector<16x4xf32>
    %c0_5 = arith.constant 0 : index
    %c0_6 = arith.constant 0 : index
    %5 = vector.load %arg3[%c0_5, %c0_6] : memref<8x4xf32, #tpu.memory_space<vmem>>, vector<1x4xf32>
    %cst_7 = arith.constant dense<0.000000e+00> : vector<1x16xf32>
    %6 = tpu.matmul %5, %4, %cst_7 {dimension_numbers = #tpu.dot_dimension_numbers<[1], [1], [0], [0], [0, 0, 1, 0], [], []>} : vector<1x4xf32>, vector<16x4xf32>, vector<1x16xf32> -> vector<1x16xf32>
    %c0_8 = arith.constant 0 : index
    %c0_9 = arith.constant 0 : index
    %7 = vector.load %arg4[%c0_8, %c0_9] : memref<4x8xf32, #tpu.memory_space<vmem>>, vector<4x1xf32>
    %cst_10 = arith.constant dense<0.000000e+00> : vector<16x1xf32>
    %8 = tpu.matmul %4, %7, %cst_10 {dimension_numbers = #tpu.dot_dimension_numbers<[1], [0], [0], [1], [0, 0, 1, 1], [], []>} : vector<16x4xf32>, vector<4x1xf32>, vector<16x1xf32> -> vector<16x1xf32>
    %9 = vector.broadcast %8 : vector<16x1xf32> to vector<16x16xf32>
    %10 = vector.broadcast %6 : vector<1x16xf32> to vector<16x16xf32>
    %11 = arith.addf %9, %10 : vector<16x16xf32>
    %cst_11 = arith.constant 0.000000e+00 : f32
    %12 = vector.broadcast %cst_11 : f32 to vector<16x16xf32>
    %13 = arith.cmpf ogt, %11, %12 : vector<16x16xf32>
    %cst_12 = arith.constant 2.000000e-01 : f32
    %14 = vector.broadcast %cst_12 : f32 to vector<16x16xf32>
    %15 = arith.mulf %14, %11 : vector<16x16xf32>
    %16 = arith.select %13, %11, %15 : vector<16x16xi1>, vector<16x16xf32>
    %17 = arith.addf %16, %1 : vector<16x16xf32>
    %cst_13 = arith.constant dense<0xFF800000> : vector<16xf32>
    %18 = vector.multi_reduction <maximumf>, %17, %cst_13 [1] : vector<16x16xf32> to vector<16xf32>
    %19 = vector.shape_cast %18 : vector<16xf32> to vector<16x1xf32>
    %20 = vector.broadcast %19 : vector<16x1xf32> to vector<16x16xf32>
    %21 = arith.subf %17, %20 : vector<16x16xf32>
    %22 = math.exp %21 : vector<16x16xf32>
    %cst_14 = arith.constant dense<0.000000e+00> : vector<16xf32>
    %23 = vector.multi_reduction <add>, %22, %cst_14 [1] : vector<16x16xf32> to vector<16xf32>
    %24 = vector.shape_cast %23 : vector<16xf32> to vector<16x1xf32>
    %25 = tpu.reciprocal %24 {approx = true} : vector<16x1xf32> -> vector<16x1xf32>
    %26 = vector.broadcast %25 : vector<16x1xf32> to vector<16x16xf32>
    %27 = arith.mulf %22, %26 : vector<16x16xf32>
    %cst_15 = arith.constant dense<0.000000e+00> : vector<16x4xf32>
    %28 = tpu.matmul %27, %4, %cst_15 {dimension_numbers = #tpu.dot_dimension_numbers<[1], [0], [0], [1], [0, 0, 1, 1], [], []>} : vector<16x16xf32>, vector<16x4xf32>, vector<16x4xf32> -> vector<16x4xf32>
    %29 = vector.extract_strided_slice %3 {offsets = [0, 4], sizes = [16, 4], strides = [1, 1]} : vector<16x32xf32> to vector<16x4xf32>
    %c1 = arith.constant 1 : index
    %c0_16 = arith.constant 0 : index
    %30 = vector.load %arg3[%c1, %c0_16] : memref<8x4xf32, #tpu.memory_space<vmem>>, vector<1x4xf32>
    %cst_17 = arith.constant dense<0.000000e+00> : vector<1x16xf32>
    %31 = tpu.matmul %30, %29, %cst_17 {dimension_numbers = #tpu.dot_dimension_numbers<[1], [1], [0], [0], [0, 0, 1, 0], [], []>} : vector<1x4xf32>, vector<16x4xf32>, vector<1x16xf32> -> vector<1x16xf32>
    %c0_18 = arith.constant 0 : index
    %c1_19 = arith.constant 1 : index
    %32 = vector.load %arg4[%c0_18, %c1_19] : memref<4x8xf32, #tpu.memory_space<vmem>>, vector<4x1xf32>
    %cst_20 = arith.constant dense<0.000000e+00> : vector<16x1xf32>
    %33 = tpu.matmul %29, %32, %cst_20 {dimension_numbers = #tpu.dot_dimension_numbers<[1], [0], [0], [1], [0, 0, 1, 1], [], []>} : vector<16x4xf32>, vector<4x1xf32>, vector<16x1xf32> -> vector<16x1xf32>
    %34 = vector.broadcast %33 : vector<16x1xf32> to vector<16x16xf32>
    %35 = vector.broadcast %31 : vector<1x16xf32> to vector<16x16xf32>
    %36 = arith.addf %34, %35 : vector<16x16xf32>
    %cst_21 = arith.constant 0.000000e+00 : f32
    %37 = vector.broadcast %cst_21 : f32 to vector<16x16xf32>
    %38 = arith.cmpf ogt, %36, %37 : vector<16x16xf32>
    %cst_22 = arith.constant 2.000000e-01 : f32
    %39 = vector.broadcast %cst_22 : f32 to vector<16x16xf32>
    %40 = arith.mulf %39, %36 : vector<16x16xf32>
    %41 = arith.select %38, %36, %40 : vector<16x16xi1>, vector<16x16xf32>
    %42 = arith.addf %41, %1 : vector<16x16xf32>
    %cst_23 = arith.constant dense<0xFF800000> : vector<16xf32>
    %43 = vector.multi_reduction <maximumf>, %42, %cst_23 [1] : vector<16x16xf32> to vector<16xf32>
    %44 = vector.shape_cast %43 : vector<16xf32> to vector<16x1xf32>
    %45 = vector.broadcast %44 : vector<16x1xf32> to vector<16x16xf32>
    %46 = arith.subf %42, %45 : vector<16x16xf32>
    %47 = math.exp %46 : vector<16x16xf32>
    %cst_24 = arith.constant dense<0.000000e+00> : vector<16xf32>
    %48 = vector.multi_reduction <add>, %47, %cst_24 [1] : vector<16x16xf32> to vector<16xf32>
    %49 = vector.shape_cast %48 : vector<16xf32> to vector<16x1xf32>
    %50 = tpu.reciprocal %49 {approx = true} : vector<16x1xf32> -> vector<16x1xf32>
    %51 = vector.broadcast %50 : vector<16x1xf32> to vector<16x16xf32>
    %52 = arith.mulf %47, %51 : vector<16x16xf32>
    %cst_25 = arith.constant dense<0.000000e+00> : vector<16x4xf32>
    %53 = tpu.matmul %52, %29, %cst_25 {dimension_numbers = #tpu.dot_dimension_numbers<[1], [0], [0], [1], [0, 0, 1, 1], [], []>} : vector<16x16xf32>, vector<16x4xf32>, vector<16x4xf32> -> vector<16x4xf32>
    %54 = vector.extract_strided_slice %3 {offsets = [0, 8], sizes = [16, 4], strides = [1, 1]} : vector<16x32xf32> to vector<16x4xf32>
    %c2 = arith.constant 2 : index
    %c0_26 = arith.constant 0 : index
    %55 = vector.load %arg3[%c2, %c0_26] : memref<8x4xf32, #tpu.memory_space<vmem>>, vector<1x4xf32>
    %cst_27 = arith.constant dense<0.000000e+00> : vector<1x16xf32>
    %56 = tpu.matmul %55, %54, %cst_27 {dimension_numbers = #tpu.dot_dimension_numbers<[1], [1], [0], [0], [0, 0, 1, 0], [], []>} : vector<1x4xf32>, vector<16x4xf32>, vector<1x16xf32> -> vector<1x16xf32>
    %c0_28 = arith.constant 0 : index
    %c2_29 = arith.constant 2 : index
    %57 = vector.load %arg4[%c0_28, %c2_29] : memref<4x8xf32, #tpu.memory_space<vmem>>, vector<4x1xf32>
    %cst_30 = arith.constant dense<0.000000e+00> : vector<16x1xf32>
    %58 = tpu.matmul %54, %57, %cst_30 {dimension_numbers = #tpu.dot_dimension_numbers<[1], [0], [0], [1], [0, 0, 1, 1], [], []>} : vector<16x4xf32>, vector<4x1xf32>, vector<16x1xf32> -> vector<16x1xf32>
    %59 = vector.broadcast %58 : vector<16x1xf32> to vector<16x16xf32>
    %60 = vector.broadcast %56 : vector<1x16xf32> to vector<16x16xf32>
    %61 = arith.addf %59, %60 : vector<16x16xf32>
    %cst_31 = arith.constant 0.000000e+00 : f32
    %62 = vector.broadcast %cst_31 : f32 to vector<16x16xf32>
    %63 = arith.cmpf ogt, %61, %62 : vector<16x16xf32>
    %cst_32 = arith.constant 2.000000e-01 : f32
    %64 = vector.broadcast %cst_32 : f32 to vector<16x16xf32>
    %65 = arith.mulf %64, %61 : vector<16x16xf32>
    %66 = arith.select %63, %61, %65 : vector<16x16xi1>, vector<16x16xf32>
    %67 = arith.addf %66, %1 : vector<16x16xf32>
    %cst_33 = arith.constant dense<0xFF800000> : vector<16xf32>
    %68 = vector.multi_reduction <maximumf>, %67, %cst_33 [1] : vector<16x16xf32> to vector<16xf32>
    %69 = vector.shape_cast %68 : vector<16xf32> to vector<16x1xf32>
    %70 = vector.broadcast %69 : vector<16x1xf32> to vector<16x16xf32>
    %71 = arith.subf %67, %70 : vector<16x16xf32>
    %72 = math.exp %71 : vector<16x16xf32>
    %cst_34 = arith.constant dense<0.000000e+00> : vector<16xf32>
    %73 = vector.multi_reduction <add>, %72, %cst_34 [1] : vector<16x16xf32> to vector<16xf32>
    %74 = vector.shape_cast %73 : vector<16xf32> to vector<16x1xf32>
    %75 = tpu.reciprocal %74 {approx = true} : vector<16x1xf32> -> vector<16x1xf32>
    %76 = vector.broadcast %75 : vector<16x1xf32> to vector<16x16xf32>
    %77 = arith.mulf %72, %76 : vector<16x16xf32>
    %cst_35 = arith.constant dense<0.000000e+00> : vector<16x4xf32>
    %78 = tpu.matmul %77, %54, %cst_35 {dimension_numbers = #tpu.dot_dimension_numbers<[1], [0], [0], [1], [0, 0, 1, 1], [], []>} : vector<16x16xf32>, vector<16x4xf32>, vector<16x4xf32> -> vector<16x4xf32>
    %79 = vector.extract_strided_slice %3 {offsets = [0, 12], sizes = [16, 4], strides = [1, 1]} : vector<16x32xf32> to vector<16x4xf32>
    %c3 = arith.constant 3 : index
    %c0_36 = arith.constant 0 : index
    %80 = vector.load %arg3[%c3, %c0_36] : memref<8x4xf32, #tpu.memory_space<vmem>>, vector<1x4xf32>
    %cst_37 = arith.constant dense<0.000000e+00> : vector<1x16xf32>
    %81 = tpu.matmul %80, %79, %cst_37 {dimension_numbers = #tpu.dot_dimension_numbers<[1], [1], [0], [0], [0, 0, 1, 0], [], []>} : vector<1x4xf32>, vector<16x4xf32>, vector<1x16xf32> -> vector<1x16xf32>
    %c0_38 = arith.constant 0 : index
    %c3_39 = arith.constant 3 : index
    %82 = vector.load %arg4[%c0_38, %c3_39] : memref<4x8xf32, #tpu.memory_space<vmem>>, vector<4x1xf32>
    %cst_40 = arith.constant dense<0.000000e+00> : vector<16x1xf32>
    %83 = tpu.matmul %79, %82, %cst_40 {dimension_numbers = #tpu.dot_dimension_numbers<[1], [0], [0], [1], [0, 0, 1, 1], [], []>} : vector<16x4xf32>, vector<4x1xf32>, vector<16x1xf32> -> vector<16x1xf32>
    %84 = vector.broadcast %83 : vector<16x1xf32> to vector<16x16xf32>
    %85 = vector.broadcast %81 : vector<1x16xf32> to vector<16x16xf32>
    %86 = arith.addf %84, %85 : vector<16x16xf32>
    %cst_41 = arith.constant 0.000000e+00 : f32
    %87 = vector.broadcast %cst_41 : f32 to vector<16x16xf32>
    %88 = arith.cmpf ogt, %86, %87 : vector<16x16xf32>
    %cst_42 = arith.constant 2.000000e-01 : f32
    %89 = vector.broadcast %cst_42 : f32 to vector<16x16xf32>
    %90 = arith.mulf %89, %86 : vector<16x16xf32>
    %91 = arith.select %88, %86, %90 : vector<16x16xi1>, vector<16x16xf32>
    %92 = arith.addf %91, %1 : vector<16x16xf32>
    %cst_43 = arith.constant dense<0xFF800000> : vector<16xf32>
    %93 = vector.multi_reduction <maximumf>, %92, %cst_43 [1] : vector<16x16xf32> to vector<16xf32>
    %94 = vector.shape_cast %93 : vector<16xf32> to vector<16x1xf32>
    %95 = vector.broadcast %94 : vector<16x1xf32> to vector<16x16xf32>
    %96 = arith.subf %92, %95 : vector<16x16xf32>
    %97 = math.exp %96 : vector<16x16xf32>
    %cst_44 = arith.constant dense<0.000000e+00> : vector<16xf32>
    %98 = vector.multi_reduction <add>, %97, %cst_44 [1] : vector<16x16xf32> to vector<16xf32>
    %99 = vector.shape_cast %98 : vector<16xf32> to vector<16x1xf32>
    %100 = tpu.reciprocal %99 {approx = true} : vector<16x1xf32> -> vector<16x1xf32>
    %101 = vector.broadcast %100 : vector<16x1xf32> to vector<16x16xf32>
    %102 = arith.mulf %97, %101 : vector<16x16xf32>
    %cst_45 = arith.constant dense<0.000000e+00> : vector<16x4xf32>
    %103 = tpu.matmul %102, %79, %cst_45 {dimension_numbers = #tpu.dot_dimension_numbers<[1], [0], [0], [1], [0, 0, 1, 1], [], []>} : vector<16x16xf32>, vector<16x4xf32>, vector<16x4xf32> -> vector<16x4xf32>
    %104 = vector.extract_strided_slice %3 {offsets = [0, 16], sizes = [16, 4], strides = [1, 1]} : vector<16x32xf32> to vector<16x4xf32>
    %c4 = arith.constant 4 : index
    %c0_46 = arith.constant 0 : index
    %105 = vector.load %arg3[%c4, %c0_46] : memref<8x4xf32, #tpu.memory_space<vmem>>, vector<1x4xf32>
    %cst_47 = arith.constant dense<0.000000e+00> : vector<1x16xf32>
    %106 = tpu.matmul %105, %104, %cst_47 {dimension_numbers = #tpu.dot_dimension_numbers<[1], [1], [0], [0], [0, 0, 1, 0], [], []>} : vector<1x4xf32>, vector<16x4xf32>, vector<1x16xf32> -> vector<1x16xf32>
    %c0_48 = arith.constant 0 : index
    %c4_49 = arith.constant 4 : index
    %107 = vector.load %arg4[%c0_48, %c4_49] : memref<4x8xf32, #tpu.memory_space<vmem>>, vector<4x1xf32>
    %cst_50 = arith.constant dense<0.000000e+00> : vector<16x1xf32>
    %108 = tpu.matmul %104, %107, %cst_50 {dimension_numbers = #tpu.dot_dimension_numbers<[1], [0], [0], [1], [0, 0, 1, 1], [], []>} : vector<16x4xf32>, vector<4x1xf32>, vector<16x1xf32> -> vector<16x1xf32>
    %109 = vector.broadcast %108 : vector<16x1xf32> to vector<16x16xf32>
    %110 = vector.broadcast %106 : vector<1x16xf32> to vector<16x16xf32>
    %111 = arith.addf %109, %110 : vector<16x16xf32>
    %cst_51 = arith.constant 0.000000e+00 : f32
    %112 = vector.broadcast %cst_51 : f32 to vector<16x16xf32>
    %113 = arith.cmpf ogt, %111, %112 : vector<16x16xf32>
    %cst_52 = arith.constant 2.000000e-01 : f32
    %114 = vector.broadcast %cst_52 : f32 to vector<16x16xf32>
    %115 = arith.mulf %114, %111 : vector<16x16xf32>
    %116 = arith.select %113, %111, %115 : vector<16x16xi1>, vector<16x16xf32>
    %117 = arith.addf %116, %1 : vector<16x16xf32>
    %cst_53 = arith.constant dense<0xFF800000> : vector<16xf32>
    %118 = vector.multi_reduction <maximumf>, %117, %cst_53 [1] : vector<16x16xf32> to vector<16xf32>
    %119 = vector.shape_cast %118 : vector<16xf32> to vector<16x1xf32>
    %120 = vector.broadcast %119 : vector<16x1xf32> to vector<16x16xf32>
    %121 = arith.subf %117, %120 : vector<16x16xf32>
    %122 = math.exp %121 : vector<16x16xf32>
    %cst_54 = arith.constant dense<0.000000e+00> : vector<16xf32>
    %123 = vector.multi_reduction <add>, %122, %cst_54 [1] : vector<16x16xf32> to vector<16xf32>
    %124 = vector.shape_cast %123 : vector<16xf32> to vector<16x1xf32>
    %125 = tpu.reciprocal %124 {approx = true} : vector<16x1xf32> -> vector<16x1xf32>
    %126 = vector.broadcast %125 : vector<16x1xf32> to vector<16x16xf32>
    %127 = arith.mulf %122, %126 : vector<16x16xf32>
    %cst_55 = arith.constant dense<0.000000e+00> : vector<16x4xf32>
    %128 = tpu.matmul %127, %104, %cst_55 {dimension_numbers = #tpu.dot_dimension_numbers<[1], [0], [0], [1], [0, 0, 1, 1], [], []>} : vector<16x16xf32>, vector<16x4xf32>, vector<16x4xf32> -> vector<16x4xf32>
    %129 = vector.extract_strided_slice %3 {offsets = [0, 20], sizes = [16, 4], strides = [1, 1]} : vector<16x32xf32> to vector<16x4xf32>
    %c5 = arith.constant 5 : index
    %c0_56 = arith.constant 0 : index
    %130 = vector.load %arg3[%c5, %c0_56] : memref<8x4xf32, #tpu.memory_space<vmem>>, vector<1x4xf32>
    %cst_57 = arith.constant dense<0.000000e+00> : vector<1x16xf32>
    %131 = tpu.matmul %130, %129, %cst_57 {dimension_numbers = #tpu.dot_dimension_numbers<[1], [1], [0], [0], [0, 0, 1, 0], [], []>} : vector<1x4xf32>, vector<16x4xf32>, vector<1x16xf32> -> vector<1x16xf32>
    %c0_58 = arith.constant 0 : index
    %c5_59 = arith.constant 5 : index
    %132 = vector.load %arg4[%c0_58, %c5_59] : memref<4x8xf32, #tpu.memory_space<vmem>>, vector<4x1xf32>
    %cst_60 = arith.constant dense<0.000000e+00> : vector<16x1xf32>
    %133 = tpu.matmul %129, %132, %cst_60 {dimension_numbers = #tpu.dot_dimension_numbers<[1], [0], [0], [1], [0, 0, 1, 1], [], []>} : vector<16x4xf32>, vector<4x1xf32>, vector<16x1xf32> -> vector<16x1xf32>
    %134 = vector.broadcast %133 : vector<16x1xf32> to vector<16x16xf32>
    %135 = vector.broadcast %131 : vector<1x16xf32> to vector<16x16xf32>
    %136 = arith.addf %134, %135 : vector<16x16xf32>
    %cst_61 = arith.constant 0.000000e+00 : f32
    %137 = vector.broadcast %cst_61 : f32 to vector<16x16xf32>
    %138 = arith.cmpf ogt, %136, %137 : vector<16x16xf32>
    %cst_62 = arith.constant 2.000000e-01 : f32
    %139 = vector.broadcast %cst_62 : f32 to vector<16x16xf32>
    %140 = arith.mulf %139, %136 : vector<16x16xf32>
    %141 = arith.select %138, %136, %140 : vector<16x16xi1>, vector<16x16xf32>
    %142 = arith.addf %141, %1 : vector<16x16xf32>
    %cst_63 = arith.constant dense<0xFF800000> : vector<16xf32>
    %143 = vector.multi_reduction <maximumf>, %142, %cst_63 [1] : vector<16x16xf32> to vector<16xf32>
    %144 = vector.shape_cast %143 : vector<16xf32> to vector<16x1xf32>
    %145 = vector.broadcast %144 : vector<16x1xf32> to vector<16x16xf32>
    %146 = arith.subf %142, %145 : vector<16x16xf32>
    %147 = math.exp %146 : vector<16x16xf32>
    %cst_64 = arith.constant dense<0.000000e+00> : vector<16xf32>
    %148 = vector.multi_reduction <add>, %147, %cst_64 [1] : vector<16x16xf32> to vector<16xf32>
    %149 = vector.shape_cast %148 : vector<16xf32> to vector<16x1xf32>
    %150 = tpu.reciprocal %149 {approx = true} : vector<16x1xf32> -> vector<16x1xf32>
    %151 = vector.broadcast %150 : vector<16x1xf32> to vector<16x16xf32>
    %152 = arith.mulf %147, %151 : vector<16x16xf32>
    %cst_65 = arith.constant dense<0.000000e+00> : vector<16x4xf32>
    %153 = tpu.matmul %152, %129, %cst_65 {dimension_numbers = #tpu.dot_dimension_numbers<[1], [0], [0], [1], [0, 0, 1, 1], [], []>} : vector<16x16xf32>, vector<16x4xf32>, vector<16x4xf32> -> vector<16x4xf32>
    %154 = vector.extract_strided_slice %3 {offsets = [0, 24], sizes = [16, 4], strides = [1, 1]} : vector<16x32xf32> to vector<16x4xf32>
    %c6 = arith.constant 6 : index
    %c0_66 = arith.constant 0 : index
    %155 = vector.load %arg3[%c6, %c0_66] : memref<8x4xf32, #tpu.memory_space<vmem>>, vector<1x4xf32>
    %cst_67 = arith.constant dense<0.000000e+00> : vector<1x16xf32>
    %156 = tpu.matmul %155, %154, %cst_67 {dimension_numbers = #tpu.dot_dimension_numbers<[1], [1], [0], [0], [0, 0, 1, 0], [], []>} : vector<1x4xf32>, vector<16x4xf32>, vector<1x16xf32> -> vector<1x16xf32>
    %c0_68 = arith.constant 0 : index
    %c6_69 = arith.constant 6 : index
    %157 = vector.load %arg4[%c0_68, %c6_69] : memref<4x8xf32, #tpu.memory_space<vmem>>, vector<4x1xf32>
    %cst_70 = arith.constant dense<0.000000e+00> : vector<16x1xf32>
    %158 = tpu.matmul %154, %157, %cst_70 {dimension_numbers = #tpu.dot_dimension_numbers<[1], [0], [0], [1], [0, 0, 1, 1], [], []>} : vector<16x4xf32>, vector<4x1xf32>, vector<16x1xf32> -> vector<16x1xf32>
    %159 = vector.broadcast %158 : vector<16x1xf32> to vector<16x16xf32>
    %160 = vector.broadcast %156 : vector<1x16xf32> to vector<16x16xf32>
    %161 = arith.addf %159, %160 : vector<16x16xf32>
    %cst_71 = arith.constant 0.000000e+00 : f32
    %162 = vector.broadcast %cst_71 : f32 to vector<16x16xf32>
    %163 = arith.cmpf ogt, %161, %162 : vector<16x16xf32>
    %cst_72 = arith.constant 2.000000e-01 : f32
    %164 = vector.broadcast %cst_72 : f32 to vector<16x16xf32>
    %165 = arith.mulf %164, %161 : vector<16x16xf32>
    %166 = arith.select %163, %161, %165 : vector<16x16xi1>, vector<16x16xf32>
    %167 = arith.addf %166, %1 : vector<16x16xf32>
    %cst_73 = arith.constant dense<0xFF800000> : vector<16xf32>
    %168 = vector.multi_reduction <maximumf>, %167, %cst_73 [1] : vector<16x16xf32> to vector<16xf32>
    %169 = vector.shape_cast %168 : vector<16xf32> to vector<16x1xf32>
    %170 = vector.broadcast %169 : vector<16x1xf32> to vector<16x16xf32>
    %171 = arith.subf %167, %170 : vector<16x16xf32>
    %172 = math.exp %171 : vector<16x16xf32>
    %cst_74 = arith.constant dense<0.000000e+00> : vector<16xf32>
    %173 = vector.multi_reduction <add>, %172, %cst_74 [1] : vector<16x16xf32> to vector<16xf32>
    %174 = vector.shape_cast %173 : vector<16xf32> to vector<16x1xf32>
    %175 = tpu.reciprocal %174 {approx = true} : vector<16x1xf32> -> vector<16x1xf32>
    %176 = vector.broadcast %175 : vector<16x1xf32> to vector<16x16xf32>
    %177 = arith.mulf %172, %176 : vector<16x16xf32>
    %cst_75 = arith.constant dense<0.000000e+00> : vector<16x4xf32>
    %178 = tpu.matmul %177, %154, %cst_75 {dimension_numbers = #tpu.dot_dimension_numbers<[1], [0], [0], [1], [0, 0, 1, 1], [], []>} : vector<16x16xf32>, vector<16x4xf32>, vector<16x4xf32> -> vector<16x4xf32>
    %179 = vector.extract_strided_slice %3 {offsets = [0, 28], sizes = [16, 4], strides = [1, 1]} : vector<16x32xf32> to vector<16x4xf32>
    %c7 = arith.constant 7 : index
    %c0_76 = arith.constant 0 : index
    %180 = vector.load %arg3[%c7, %c0_76] : memref<8x4xf32, #tpu.memory_space<vmem>>, vector<1x4xf32>
    %cst_77 = arith.constant dense<0.000000e+00> : vector<1x16xf32>
    %181 = tpu.matmul %180, %179, %cst_77 {dimension_numbers = #tpu.dot_dimension_numbers<[1], [1], [0], [0], [0, 0, 1, 0], [], []>} : vector<1x4xf32>, vector<16x4xf32>, vector<1x16xf32> -> vector<1x16xf32>
    %c0_78 = arith.constant 0 : index
    %c7_79 = arith.constant 7 : index
    %182 = vector.load %arg4[%c0_78, %c7_79] : memref<4x8xf32, #tpu.memory_space<vmem>>, vector<4x1xf32>
    %cst_80 = arith.constant dense<0.000000e+00> : vector<16x1xf32>
    %183 = tpu.matmul %179, %182, %cst_80 {dimension_numbers = #tpu.dot_dimension_numbers<[1], [0], [0], [1], [0, 0, 1, 1], [], []>} : vector<16x4xf32>, vector<4x1xf32>, vector<16x1xf32> -> vector<16x1xf32>
    %184 = vector.broadcast %183 : vector<16x1xf32> to vector<16x16xf32>
    %185 = vector.broadcast %181 : vector<1x16xf32> to vector<16x16xf32>
    %186 = arith.addf %184, %185 : vector<16x16xf32>
    %cst_81 = arith.constant 0.000000e+00 : f32
    %187 = vector.broadcast %cst_81 : f32 to vector<16x16xf32>
    %188 = arith.cmpf ogt, %186, %187 : vector<16x16xf32>
    %cst_82 = arith.constant 2.000000e-01 : f32
    %189 = vector.broadcast %cst_82 : f32 to vector<16x16xf32>
    %190 = arith.mulf %189, %186 : vector<16x16xf32>
    %191 = arith.select %188, %186, %190 : vector<16x16xi1>, vector<16x16xf32>
    %192 = arith.addf %191, %1 : vector<16x16xf32>
    %cst_83 = arith.constant dense<0xFF800000> : vector<16xf32>
    %193 = vector.multi_reduction <maximumf>, %192, %cst_83 [1] : vector<16x16xf32> to vector<16xf32>
    %194 = vector.shape_cast %193 : vector<16xf32> to vector<16x1xf32>
    %195 = vector.broadcast %194 : vector<16x1xf32> to vector<16x16xf32>
    %196 = arith.subf %192, %195 : vector<16x16xf32>
    %197 = math.exp %196 : vector<16x16xf32>
    %cst_84 = arith.constant dense<0.000000e+00> : vector<16xf32>
    %198 = vector.multi_reduction <add>, %197, %cst_84 [1] : vector<16x16xf32> to vector<16xf32>
    %199 = vector.shape_cast %198 : vector<16xf32> to vector<16x1xf32>
    %200 = tpu.reciprocal %199 {approx = true} : vector<16x1xf32> -> vector<16x1xf32>
    %201 = vector.broadcast %200 : vector<16x1xf32> to vector<16x16xf32>
    %202 = arith.mulf %197, %201 : vector<16x16xf32>
    %cst_85 = arith.constant dense<0.000000e+00> : vector<16x4xf32>
    %203 = tpu.matmul %202, %179, %cst_85 {dimension_numbers = #tpu.dot_dimension_numbers<[1], [0], [0], [1], [0, 0, 1, 1], [], []>} : vector<16x16xf32>, vector<16x4xf32>, vector<16x4xf32> -> vector<16x4xf32>
    %204 = tpu.concatenate %28, %53, %78, %103, %128, %153, %178, %203 in 1 : vector<16x4xf32>, vector<16x4xf32>, vector<16x4xf32>, vector<16x4xf32>, vector<16x4xf32>, vector<16x4xf32>, vector<16x4xf32>, vector<16x4xf32> -> vector<16x32xf32>
    %c0_86 = arith.constant 0 : index
    %c0_87 = arith.constant 0 : index
    %205 = vector.load %arg5[%c0_86, %c0_87] : memref<1x32xf32, #tpu.memory_space<vmem>>, vector<1x32xf32>
    %206 = vector.broadcast %205 : vector<1x32xf32> to vector<16x32xf32>
    %207 = arith.addf %204, %206 : vector<16x32xf32>
    %cst_88 = arith.constant 0.000000e+00 : f32
    %208 = vector.broadcast %cst_88 : f32 to vector<16x32xf32>
    %209 = arith.cmpf ogt, %207, %208 : vector<16x32xf32>
    %cst_89 = arith.constant 0.000000e+00 : f32
    %210 = vector.broadcast %cst_89 : f32 to vector<16x32xf32>
    %211 = arith.minimumf %207, %210 : vector<16x32xf32>
    %212 = math.exp %211 : vector<16x32xf32>
    %cst_90 = arith.constant 1.000000e+00 : f32
    %213 = vector.broadcast %cst_90 : f32 to vector<16x32xf32>
    %214 = arith.subf %212, %213 : vector<16x32xf32>
    %215 = arith.select %209, %207, %214 : vector<16x32xi1>, vector<16x32xf32>
    %c0_91 = arith.constant 0 : index
    %c0_92 = arith.constant 0 : index
    %216 = vector.load %arg6[%c0_91, %c0_92] : memref<32x32xf32, #tpu.memory_space<vmem>>, vector<32x32xf32>
    %cst_93 = arith.constant dense<0.000000e+00> : vector<16x32xf32>
    %217 = tpu.matmul %215, %216, %cst_93 {dimension_numbers = #tpu.dot_dimension_numbers<[1], [0], [0], [1], [0, 0, 1, 1], [], []>} : vector<16x32xf32>, vector<32x32xf32>, vector<16x32xf32> -> vector<16x32xf32>
    %218 = vector.extract_strided_slice %217 {offsets = [0, 0], sizes = [16, 4], strides = [1, 1]} : vector<16x32xf32> to vector<16x4xf32>
    %c0_94 = arith.constant 0 : index
    %c0_95 = arith.constant 0 : index
    %219 = vector.load %arg7[%c0_94, %c0_95] : memref<8x4xf32, #tpu.memory_space<vmem>>, vector<1x4xf32>
    %cst_96 = arith.constant dense<0.000000e+00> : vector<1x16xf32>
    %220 = tpu.matmul %219, %218, %cst_96 {dimension_numbers = #tpu.dot_dimension_numbers<[1], [1], [0], [0], [0, 0, 1, 0], [], []>} : vector<1x4xf32>, vector<16x4xf32>, vector<1x16xf32> -> vector<1x16xf32>
    %c0_97 = arith.constant 0 : index
    %c0_98 = arith.constant 0 : index
    %221 = vector.load %arg8[%c0_97, %c0_98] : memref<4x8xf32, #tpu.memory_space<vmem>>, vector<4x1xf32>
    %cst_99 = arith.constant dense<0.000000e+00> : vector<16x1xf32>
    %222 = tpu.matmul %218, %221, %cst_99 {dimension_numbers = #tpu.dot_dimension_numbers<[1], [0], [0], [1], [0, 0, 1, 1], [], []>} : vector<16x4xf32>, vector<4x1xf32>, vector<16x1xf32> -> vector<16x1xf32>
    %223 = vector.broadcast %222 : vector<16x1xf32> to vector<16x16xf32>
    %224 = vector.broadcast %220 : vector<1x16xf32> to vector<16x16xf32>
    %225 = arith.addf %223, %224 : vector<16x16xf32>
    %cst_100 = arith.constant 0.000000e+00 : f32
    %226 = vector.broadcast %cst_100 : f32 to vector<16x16xf32>
    %227 = arith.cmpf ogt, %225, %226 : vector<16x16xf32>
    %cst_101 = arith.constant 2.000000e-01 : f32
    %228 = vector.broadcast %cst_101 : f32 to vector<16x16xf32>
    %229 = arith.mulf %228, %225 : vector<16x16xf32>
    %230 = arith.select %227, %225, %229 : vector<16x16xi1>, vector<16x16xf32>
    %231 = arith.addf %230, %1 : vector<16x16xf32>
    %cst_102 = arith.constant dense<0xFF800000> : vector<16xf32>
    %232 = vector.multi_reduction <maximumf>, %231, %cst_102 [1] : vector<16x16xf32> to vector<16xf32>
    %233 = vector.shape_cast %232 : vector<16xf32> to vector<16x1xf32>
    %234 = vector.broadcast %233 : vector<16x1xf32> to vector<16x16xf32>
    %235 = arith.subf %231, %234 : vector<16x16xf32>
    %236 = math.exp %235 : vector<16x16xf32>
    %cst_103 = arith.constant dense<0.000000e+00> : vector<16xf32>
    %237 = vector.multi_reduction <add>, %236, %cst_103 [1] : vector<16x16xf32> to vector<16xf32>
    %238 = vector.shape_cast %237 : vector<16xf32> to vector<16x1xf32>
    %239 = tpu.reciprocal %238 {approx = true} : vector<16x1xf32> -> vector<16x1xf32>
    %240 = vector.broadcast %239 : vector<16x1xf32> to vector<16x16xf32>
    %241 = arith.mulf %236, %240 : vector<16x16xf32>
    %cst_104 = arith.constant dense<0.000000e+00> : vector<16x4xf32>
    %242 = tpu.matmul %241, %218, %cst_104 {dimension_numbers = #tpu.dot_dimension_numbers<[1], [0], [0], [1], [0, 0, 1, 1], [], []>} : vector<16x16xf32>, vector<16x4xf32>, vector<16x4xf32> -> vector<16x4xf32>
    %243 = vector.extract_strided_slice %217 {offsets = [0, 4], sizes = [16, 4], strides = [1, 1]} : vector<16x32xf32> to vector<16x4xf32>
    %c1_105 = arith.constant 1 : index
    %c0_106 = arith.constant 0 : index
    %244 = vector.load %arg7[%c1_105, %c0_106] : memref<8x4xf32, #tpu.memory_space<vmem>>, vector<1x4xf32>
    %cst_107 = arith.constant dense<0.000000e+00> : vector<1x16xf32>
    %245 = tpu.matmul %244, %243, %cst_107 {dimension_numbers = #tpu.dot_dimension_numbers<[1], [1], [0], [0], [0, 0, 1, 0], [], []>} : vector<1x4xf32>, vector<16x4xf32>, vector<1x16xf32> -> vector<1x16xf32>
    %c0_108 = arith.constant 0 : index
    %c1_109 = arith.constant 1 : index
    %246 = vector.load %arg8[%c0_108, %c1_109] : memref<4x8xf32, #tpu.memory_space<vmem>>, vector<4x1xf32>
    %cst_110 = arith.constant dense<0.000000e+00> : vector<16x1xf32>
    %247 = tpu.matmul %243, %246, %cst_110 {dimension_numbers = #tpu.dot_dimension_numbers<[1], [0], [0], [1], [0, 0, 1, 1], [], []>} : vector<16x4xf32>, vector<4x1xf32>, vector<16x1xf32> -> vector<16x1xf32>
    %248 = vector.broadcast %247 : vector<16x1xf32> to vector<16x16xf32>
    %249 = vector.broadcast %245 : vector<1x16xf32> to vector<16x16xf32>
    %250 = arith.addf %248, %249 : vector<16x16xf32>
    %cst_111 = arith.constant 0.000000e+00 : f32
    %251 = vector.broadcast %cst_111 : f32 to vector<16x16xf32>
    %252 = arith.cmpf ogt, %250, %251 : vector<16x16xf32>
    %cst_112 = arith.constant 2.000000e-01 : f32
    %253 = vector.broadcast %cst_112 : f32 to vector<16x16xf32>
    %254 = arith.mulf %253, %250 : vector<16x16xf32>
    %255 = arith.select %252, %250, %254 : vector<16x16xi1>, vector<16x16xf32>
    %256 = arith.addf %255, %1 : vector<16x16xf32>
    %cst_113 = arith.constant dense<0xFF800000> : vector<16xf32>
    %257 = vector.multi_reduction <maximumf>, %256, %cst_113 [1] : vector<16x16xf32> to vector<16xf32>
    %258 = vector.shape_cast %257 : vector<16xf32> to vector<16x1xf32>
    %259 = vector.broadcast %258 : vector<16x1xf32> to vector<16x16xf32>
    %260 = arith.subf %256, %259 : vector<16x16xf32>
    %261 = math.exp %260 : vector<16x16xf32>
    %cst_114 = arith.constant dense<0.000000e+00> : vector<16xf32>
    %262 = vector.multi_reduction <add>, %261, %cst_114 [1] : vector<16x16xf32> to vector<16xf32>
    %263 = vector.shape_cast %262 : vector<16xf32> to vector<16x1xf32>
    %264 = tpu.reciprocal %263 {approx = true} : vector<16x1xf32> -> vector<16x1xf32>
    %265 = vector.broadcast %264 : vector<16x1xf32> to vector<16x16xf32>
    %266 = arith.mulf %261, %265 : vector<16x16xf32>
    %cst_115 = arith.constant dense<0.000000e+00> : vector<16x4xf32>
    %267 = tpu.matmul %266, %243, %cst_115 {dimension_numbers = #tpu.dot_dimension_numbers<[1], [0], [0], [1], [0, 0, 1, 1], [], []>} : vector<16x16xf32>, vector<16x4xf32>, vector<16x4xf32> -> vector<16x4xf32>
    %268 = vector.extract_strided_slice %217 {offsets = [0, 8], sizes = [16, 4], strides = [1, 1]} : vector<16x32xf32> to vector<16x4xf32>
    %c2_116 = arith.constant 2 : index
    %c0_117 = arith.constant 0 : index
    %269 = vector.load %arg7[%c2_116, %c0_117] : memref<8x4xf32, #tpu.memory_space<vmem>>, vector<1x4xf32>
    %cst_118 = arith.constant dense<0.000000e+00> : vector<1x16xf32>
    %270 = tpu.matmul %269, %268, %cst_118 {dimension_numbers = #tpu.dot_dimension_numbers<[1], [1], [0], [0], [0, 0, 1, 0], [], []>} : vector<1x4xf32>, vector<16x4xf32>, vector<1x16xf32> -> vector<1x16xf32>
    %c0_119 = arith.constant 0 : index
    %c2_120 = arith.constant 2 : index
    %271 = vector.load %arg8[%c0_119, %c2_120] : memref<4x8xf32, #tpu.memory_space<vmem>>, vector<4x1xf32>
    %cst_121 = arith.constant dense<0.000000e+00> : vector<16x1xf32>
    %272 = tpu.matmul %268, %271, %cst_121 {dimension_numbers = #tpu.dot_dimension_numbers<[1], [0], [0], [1], [0, 0, 1, 1], [], []>} : vector<16x4xf32>, vector<4x1xf32>, vector<16x1xf32> -> vector<16x1xf32>
    %273 = vector.broadcast %272 : vector<16x1xf32> to vector<16x16xf32>
    %274 = vector.broadcast %270 : vector<1x16xf32> to vector<16x16xf32>
    %275 = arith.addf %273, %274 : vector<16x16xf32>
    %cst_122 = arith.constant 0.000000e+00 : f32
    %276 = vector.broadcast %cst_122 : f32 to vector<16x16xf32>
    %277 = arith.cmpf ogt, %275, %276 : vector<16x16xf32>
    %cst_123 = arith.constant 2.000000e-01 : f32
    %278 = vector.broadcast %cst_123 : f32 to vector<16x16xf32>
    %279 = arith.mulf %278, %275 : vector<16x16xf32>
    %280 = arith.select %277, %275, %279 : vector<16x16xi1>, vector<16x16xf32>
    %281 = arith.addf %280, %1 : vector<16x16xf32>
    %cst_124 = arith.constant dense<0xFF800000> : vector<16xf32>
    %282 = vector.multi_reduction <maximumf>, %281, %cst_124 [1] : vector<16x16xf32> to vector<16xf32>
    %283 = vector.shape_cast %282 : vector<16xf32> to vector<16x1xf32>
    %284 = vector.broadcast %283 : vector<16x1xf32> to vector<16x16xf32>
    %285 = arith.subf %281, %284 : vector<16x16xf32>
    %286 = math.exp %285 : vector<16x16xf32>
    %cst_125 = arith.constant dense<0.000000e+00> : vector<16xf32>
    %287 = vector.multi_reduction <add>, %286, %cst_125 [1] : vector<16x16xf32> to vector<16xf32>
    %288 = vector.shape_cast %287 : vector<16xf32> to vector<16x1xf32>
    %289 = tpu.reciprocal %288 {approx = true} : vector<16x1xf32> -> vector<16x1xf32>
    %290 = vector.broadcast %289 : vector<16x1xf32> to vector<16x16xf32>
    %291 = arith.mulf %286, %290 : vector<16x16xf32>
    %cst_126 = arith.constant dense<0.000000e+00> : vector<16x4xf32>
    %292 = tpu.matmul %291, %268, %cst_126 {dimension_numbers = #tpu.dot_dimension_numbers<[1], [0], [0], [1], [0, 0, 1, 1], [], []>} : vector<16x16xf32>, vector<16x4xf32>, vector<16x4xf32> -> vector<16x4xf32>
    %293 = vector.extract_strided_slice %217 {offsets = [0, 12], sizes = [16, 4], strides = [1, 1]} : vector<16x32xf32> to vector<16x4xf32>
    %c3_127 = arith.constant 3 : index
    %c0_128 = arith.constant 0 : index
    %294 = vector.load %arg7[%c3_127, %c0_128] : memref<8x4xf32, #tpu.memory_space<vmem>>, vector<1x4xf32>
    %cst_129 = arith.constant dense<0.000000e+00> : vector<1x16xf32>
    %295 = tpu.matmul %294, %293, %cst_129 {dimension_numbers = #tpu.dot_dimension_numbers<[1], [1], [0], [0], [0, 0, 1, 0], [], []>} : vector<1x4xf32>, vector<16x4xf32>, vector<1x16xf32> -> vector<1x16xf32>
    %c0_130 = arith.constant 0 : index
    %c3_131 = arith.constant 3 : index
    %296 = vector.load %arg8[%c0_130, %c3_131] : memref<4x8xf32, #tpu.memory_space<vmem>>, vector<4x1xf32>
    %cst_132 = arith.constant dense<0.000000e+00> : vector<16x1xf32>
    %297 = tpu.matmul %293, %296, %cst_132 {dimension_numbers = #tpu.dot_dimension_numbers<[1], [0], [0], [1], [0, 0, 1, 1], [], []>} : vector<16x4xf32>, vector<4x1xf32>, vector<16x1xf32> -> vector<16x1xf32>
    %298 = vector.broadcast %297 : vector<16x1xf32> to vector<16x16xf32>
    %299 = vector.broadcast %295 : vector<1x16xf32> to vector<16x16xf32>
    %300 = arith.addf %298, %299 : vector<16x16xf32>
    %cst_133 = arith.constant 0.000000e+00 : f32
    %301 = vector.broadcast %cst_133 : f32 to vector<16x16xf32>
    %302 = arith.cmpf ogt, %300, %301 : vector<16x16xf32>
    %cst_134 = arith.constant 2.000000e-01 : f32
    %303 = vector.broadcast %cst_134 : f32 to vector<16x16xf32>
    %304 = arith.mulf %303, %300 : vector<16x16xf32>
    %305 = arith.select %302, %300, %304 : vector<16x16xi1>, vector<16x16xf32>
    %306 = arith.addf %305, %1 : vector<16x16xf32>
    %cst_135 = arith.constant dense<0xFF800000> : vector<16xf32>
    %307 = vector.multi_reduction <maximumf>, %306, %cst_135 [1] : vector<16x16xf32> to vector<16xf32>
    %308 = vector.shape_cast %307 : vector<16xf32> to vector<16x1xf32>
    %309 = vector.broadcast %308 : vector<16x1xf32> to vector<16x16xf32>
    %310 = arith.subf %306, %309 : vector<16x16xf32>
    %311 = math.exp %310 : vector<16x16xf32>
    %cst_136 = arith.constant dense<0.000000e+00> : vector<16xf32>
    %312 = vector.multi_reduction <add>, %311, %cst_136 [1] : vector<16x16xf32> to vector<16xf32>
    %313 = vector.shape_cast %312 : vector<16xf32> to vector<16x1xf32>
    %314 = tpu.reciprocal %313 {approx = true} : vector<16x1xf32> -> vector<16x1xf32>
    %315 = vector.broadcast %314 : vector<16x1xf32> to vector<16x16xf32>
    %316 = arith.mulf %311, %315 : vector<16x16xf32>
    %cst_137 = arith.constant dense<0.000000e+00> : vector<16x4xf32>
    %317 = tpu.matmul %316, %293, %cst_137 {dimension_numbers = #tpu.dot_dimension_numbers<[1], [0], [0], [1], [0, 0, 1, 1], [], []>} : vector<16x16xf32>, vector<16x4xf32>, vector<16x4xf32> -> vector<16x4xf32>
    %318 = vector.extract_strided_slice %217 {offsets = [0, 16], sizes = [16, 4], strides = [1, 1]} : vector<16x32xf32> to vector<16x4xf32>
    %c4_138 = arith.constant 4 : index
    %c0_139 = arith.constant 0 : index
    %319 = vector.load %arg7[%c4_138, %c0_139] : memref<8x4xf32, #tpu.memory_space<vmem>>, vector<1x4xf32>
    %cst_140 = arith.constant dense<0.000000e+00> : vector<1x16xf32>
    %320 = tpu.matmul %319, %318, %cst_140 {dimension_numbers = #tpu.dot_dimension_numbers<[1], [1], [0], [0], [0, 0, 1, 0], [], []>} : vector<1x4xf32>, vector<16x4xf32>, vector<1x16xf32> -> vector<1x16xf32>
    %c0_141 = arith.constant 0 : index
    %c4_142 = arith.constant 4 : index
    %321 = vector.load %arg8[%c0_141, %c4_142] : memref<4x8xf32, #tpu.memory_space<vmem>>, vector<4x1xf32>
    %cst_143 = arith.constant dense<0.000000e+00> : vector<16x1xf32>
    %322 = tpu.matmul %318, %321, %cst_143 {dimension_numbers = #tpu.dot_dimension_numbers<[1], [0], [0], [1], [0, 0, 1, 1], [], []>} : vector<16x4xf32>, vector<4x1xf32>, vector<16x1xf32> -> vector<16x1xf32>
    %323 = vector.broadcast %322 : vector<16x1xf32> to vector<16x16xf32>
    %324 = vector.broadcast %320 : vector<1x16xf32> to vector<16x16xf32>
    %325 = arith.addf %323, %324 : vector<16x16xf32>
    %cst_144 = arith.constant 0.000000e+00 : f32
    %326 = vector.broadcast %cst_144 : f32 to vector<16x16xf32>
    %327 = arith.cmpf ogt, %325, %326 : vector<16x16xf32>
    %cst_145 = arith.constant 2.000000e-01 : f32
    %328 = vector.broadcast %cst_145 : f32 to vector<16x16xf32>
    %329 = arith.mulf %328, %325 : vector<16x16xf32>
    %330 = arith.select %327, %325, %329 : vector<16x16xi1>, vector<16x16xf32>
    %331 = arith.addf %330, %1 : vector<16x16xf32>
    %cst_146 = arith.constant dense<0xFF800000> : vector<16xf32>
    %332 = vector.multi_reduction <maximumf>, %331, %cst_146 [1] : vector<16x16xf32> to vector<16xf32>
    %333 = vector.shape_cast %332 : vector<16xf32> to vector<16x1xf32>
    %334 = vector.broadcast %333 : vector<16x1xf32> to vector<16x16xf32>
    %335 = arith.subf %331, %334 : vector<16x16xf32>
    %336 = math.exp %335 : vector<16x16xf32>
    %cst_147 = arith.constant dense<0.000000e+00> : vector<16xf32>
    %337 = vector.multi_reduction <add>, %336, %cst_147 [1] : vector<16x16xf32> to vector<16xf32>
    %338 = vector.shape_cast %337 : vector<16xf32> to vector<16x1xf32>
    %339 = tpu.reciprocal %338 {approx = true} : vector<16x1xf32> -> vector<16x1xf32>
    %340 = vector.broadcast %339 : vector<16x1xf32> to vector<16x16xf32>
    %341 = arith.mulf %336, %340 : vector<16x16xf32>
    %cst_148 = arith.constant dense<0.000000e+00> : vector<16x4xf32>
    %342 = tpu.matmul %341, %318, %cst_148 {dimension_numbers = #tpu.dot_dimension_numbers<[1], [0], [0], [1], [0, 0, 1, 1], [], []>} : vector<16x16xf32>, vector<16x4xf32>, vector<16x4xf32> -> vector<16x4xf32>
    %343 = vector.extract_strided_slice %217 {offsets = [0, 20], sizes = [16, 4], strides = [1, 1]} : vector<16x32xf32> to vector<16x4xf32>
    %c5_149 = arith.constant 5 : index
    %c0_150 = arith.constant 0 : index
    %344 = vector.load %arg7[%c5_149, %c0_150] : memref<8x4xf32, #tpu.memory_space<vmem>>, vector<1x4xf32>
    %cst_151 = arith.constant dense<0.000000e+00> : vector<1x16xf32>
    %345 = tpu.matmul %344, %343, %cst_151 {dimension_numbers = #tpu.dot_dimension_numbers<[1], [1], [0], [0], [0, 0, 1, 0], [], []>} : vector<1x4xf32>, vector<16x4xf32>, vector<1x16xf32> -> vector<1x16xf32>
    %c0_152 = arith.constant 0 : index
    %c5_153 = arith.constant 5 : index
    %346 = vector.load %arg8[%c0_152, %c5_153] : memref<4x8xf32, #tpu.memory_space<vmem>>, vector<4x1xf32>
    %cst_154 = arith.constant dense<0.000000e+00> : vector<16x1xf32>
    %347 = tpu.matmul %343, %346, %cst_154 {dimension_numbers = #tpu.dot_dimension_numbers<[1], [0], [0], [1], [0, 0, 1, 1], [], []>} : vector<16x4xf32>, vector<4x1xf32>, vector<16x1xf32> -> vector<16x1xf32>
    %348 = vector.broadcast %347 : vector<16x1xf32> to vector<16x16xf32>
    %349 = vector.broadcast %345 : vector<1x16xf32> to vector<16x16xf32>
    %350 = arith.addf %348, %349 : vector<16x16xf32>
    %cst_155 = arith.constant 0.000000e+00 : f32
    %351 = vector.broadcast %cst_155 : f32 to vector<16x16xf32>
    %352 = arith.cmpf ogt, %350, %351 : vector<16x16xf32>
    %cst_156 = arith.constant 2.000000e-01 : f32
    %353 = vector.broadcast %cst_156 : f32 to vector<16x16xf32>
    %354 = arith.mulf %353, %350 : vector<16x16xf32>
    %355 = arith.select %352, %350, %354 : vector<16x16xi1>, vector<16x16xf32>
    %356 = arith.addf %355, %1 : vector<16x16xf32>
    %cst_157 = arith.constant dense<0xFF800000> : vector<16xf32>
    %357 = vector.multi_reduction <maximumf>, %356, %cst_157 [1] : vector<16x16xf32> to vector<16xf32>
    %358 = vector.shape_cast %357 : vector<16xf32> to vector<16x1xf32>
    %359 = vector.broadcast %358 : vector<16x1xf32> to vector<16x16xf32>
    %360 = arith.subf %356, %359 : vector<16x16xf32>
    %361 = math.exp %360 : vector<16x16xf32>
    %cst_158 = arith.constant dense<0.000000e+00> : vector<16xf32>
    %362 = vector.multi_reduction <add>, %361, %cst_158 [1] : vector<16x16xf32> to vector<16xf32>
    %363 = vector.shape_cast %362 : vector<16xf32> to vector<16x1xf32>
    %364 = tpu.reciprocal %363 {approx = true} : vector<16x1xf32> -> vector<16x1xf32>
    %365 = vector.broadcast %364 : vector<16x1xf32> to vector<16x16xf32>
    %366 = arith.mulf %361, %365 : vector<16x16xf32>
    %cst_159 = arith.constant dense<0.000000e+00> : vector<16x4xf32>
    %367 = tpu.matmul %366, %343, %cst_159 {dimension_numbers = #tpu.dot_dimension_numbers<[1], [0], [0], [1], [0, 0, 1, 1], [], []>} : vector<16x16xf32>, vector<16x4xf32>, vector<16x4xf32> -> vector<16x4xf32>
    %368 = vector.extract_strided_slice %217 {offsets = [0, 24], sizes = [16, 4], strides = [1, 1]} : vector<16x32xf32> to vector<16x4xf32>
    %c6_160 = arith.constant 6 : index
    %c0_161 = arith.constant 0 : index
    %369 = vector.load %arg7[%c6_160, %c0_161] : memref<8x4xf32, #tpu.memory_space<vmem>>, vector<1x4xf32>
    %cst_162 = arith.constant dense<0.000000e+00> : vector<1x16xf32>
    %370 = tpu.matmul %369, %368, %cst_162 {dimension_numbers = #tpu.dot_dimension_numbers<[1], [1], [0], [0], [0, 0, 1, 0], [], []>} : vector<1x4xf32>, vector<16x4xf32>, vector<1x16xf32> -> vector<1x16xf32>
    %c0_163 = arith.constant 0 : index
    %c6_164 = arith.constant 6 : index
    %371 = vector.load %arg8[%c0_163, %c6_164] : memref<4x8xf32, #tpu.memory_space<vmem>>, vector<4x1xf32>
    %cst_165 = arith.constant dense<0.000000e+00> : vector<16x1xf32>
    %372 = tpu.matmul %368, %371, %cst_165 {dimension_numbers = #tpu.dot_dimension_numbers<[1], [0], [0], [1], [0, 0, 1, 1], [], []>} : vector<16x4xf32>, vector<4x1xf32>, vector<16x1xf32> -> vector<16x1xf32>
    %373 = vector.broadcast %372 : vector<16x1xf32> to vector<16x16xf32>
    %374 = vector.broadcast %370 : vector<1x16xf32> to vector<16x16xf32>
    %375 = arith.addf %373, %374 : vector<16x16xf32>
    %cst_166 = arith.constant 0.000000e+00 : f32
    %376 = vector.broadcast %cst_166 : f32 to vector<16x16xf32>
    %377 = arith.cmpf ogt, %375, %376 : vector<16x16xf32>
    %cst_167 = arith.constant 2.000000e-01 : f32
    %378 = vector.broadcast %cst_167 : f32 to vector<16x16xf32>
    %379 = arith.mulf %378, %375 : vector<16x16xf32>
    %380 = arith.select %377, %375, %379 : vector<16x16xi1>, vector<16x16xf32>
    %381 = arith.addf %380, %1 : vector<16x16xf32>
    %cst_168 = arith.constant dense<0xFF800000> : vector<16xf32>
    %382 = vector.multi_reduction <maximumf>, %381, %cst_168 [1] : vector<16x16xf32> to vector<16xf32>
    %383 = vector.shape_cast %382 : vector<16xf32> to vector<16x1xf32>
    %384 = vector.broadcast %383 : vector<16x1xf32> to vector<16x16xf32>
    %385 = arith.subf %381, %384 : vector<16x16xf32>
    %386 = math.exp %385 : vector<16x16xf32>
    %cst_169 = arith.constant dense<0.000000e+00> : vector<16xf32>
    %387 = vector.multi_reduction <add>, %386, %cst_169 [1] : vector<16x16xf32> to vector<16xf32>
    %388 = vector.shape_cast %387 : vector<16xf32> to vector<16x1xf32>
    %389 = tpu.reciprocal %388 {approx = true} : vector<16x1xf32> -> vector<16x1xf32>
    %390 = vector.broadcast %389 : vector<16x1xf32> to vector<16x16xf32>
    %391 = arith.mulf %386, %390 : vector<16x16xf32>
    %cst_170 = arith.constant dense<0.000000e+00> : vector<16x4xf32>
    %392 = tpu.matmul %391, %368, %cst_170 {dimension_numbers = #tpu.dot_dimension_numbers<[1], [0], [0], [1], [0, 0, 1, 1], [], []>} : vector<16x16xf32>, vector<16x4xf32>, vector<16x4xf32> -> vector<16x4xf32>
    %393 = vector.extract_strided_slice %217 {offsets = [0, 28], sizes = [16, 4], strides = [1, 1]} : vector<16x32xf32> to vector<16x4xf32>
    %c7_171 = arith.constant 7 : index
    %c0_172 = arith.constant 0 : index
    %394 = vector.load %arg7[%c7_171, %c0_172] : memref<8x4xf32, #tpu.memory_space<vmem>>, vector<1x4xf32>
    %cst_173 = arith.constant dense<0.000000e+00> : vector<1x16xf32>
    %395 = tpu.matmul %394, %393, %cst_173 {dimension_numbers = #tpu.dot_dimension_numbers<[1], [1], [0], [0], [0, 0, 1, 0], [], []>} : vector<1x4xf32>, vector<16x4xf32>, vector<1x16xf32> -> vector<1x16xf32>
    %c0_174 = arith.constant 0 : index
    %c7_175 = arith.constant 7 : index
    %396 = vector.load %arg8[%c0_174, %c7_175] : memref<4x8xf32, #tpu.memory_space<vmem>>, vector<4x1xf32>
    %cst_176 = arith.constant dense<0.000000e+00> : vector<16x1xf32>
    %397 = tpu.matmul %393, %396, %cst_176 {dimension_numbers = #tpu.dot_dimension_numbers<[1], [0], [0], [1], [0, 0, 1, 1], [], []>} : vector<16x4xf32>, vector<4x1xf32>, vector<16x1xf32> -> vector<16x1xf32>
    %398 = vector.broadcast %397 : vector<16x1xf32> to vector<16x16xf32>
    %399 = vector.broadcast %395 : vector<1x16xf32> to vector<16x16xf32>
    %400 = arith.addf %398, %399 : vector<16x16xf32>
    %cst_177 = arith.constant 0.000000e+00 : f32
    %401 = vector.broadcast %cst_177 : f32 to vector<16x16xf32>
    %402 = arith.cmpf ogt, %400, %401 : vector<16x16xf32>
    %cst_178 = arith.constant 2.000000e-01 : f32
    %403 = vector.broadcast %cst_178 : f32 to vector<16x16xf32>
    %404 = arith.mulf %403, %400 : vector<16x16xf32>
    %405 = arith.select %402, %400, %404 : vector<16x16xi1>, vector<16x16xf32>
    %406 = arith.addf %405, %1 : vector<16x16xf32>
    %cst_179 = arith.constant dense<0xFF800000> : vector<16xf32>
    %407 = vector.multi_reduction <maximumf>, %406, %cst_179 [1] : vector<16x16xf32> to vector<16xf32>
    %408 = vector.shape_cast %407 : vector<16xf32> to vector<16x1xf32>
    %409 = vector.broadcast %408 : vector<16x1xf32> to vector<16x16xf32>
    %410 = arith.subf %406, %409 : vector<16x16xf32>
    %411 = math.exp %410 : vector<16x16xf32>
    %cst_180 = arith.constant dense<0.000000e+00> : vector<16xf32>
    %412 = vector.multi_reduction <add>, %411, %cst_180 [1] : vector<16x16xf32> to vector<16xf32>
    %413 = vector.shape_cast %412 : vector<16xf32> to vector<16x1xf32>
    %414 = tpu.reciprocal %413 {approx = true} : vector<16x1xf32> -> vector<16x1xf32>
    %415 = vector.broadcast %414 : vector<16x1xf32> to vector<16x16xf32>
    %416 = arith.mulf %411, %415 : vector<16x16xf32>
    %cst_181 = arith.constant dense<0.000000e+00> : vector<16x4xf32>
    %417 = tpu.matmul %416, %393, %cst_181 {dimension_numbers = #tpu.dot_dimension_numbers<[1], [0], [0], [1], [0, 0, 1, 1], [], []>} : vector<16x16xf32>, vector<16x4xf32>, vector<16x4xf32> -> vector<16x4xf32>
    %418 = tpu.concatenate %242, %267, %292, %317, %342, %367, %392, %417 in 1 : vector<16x4xf32>, vector<16x4xf32>, vector<16x4xf32>, vector<16x4xf32>, vector<16x4xf32>, vector<16x4xf32>, vector<16x4xf32>, vector<16x4xf32> -> vector<16x32xf32>
    %c0_182 = arith.constant 0 : index
    %c0_183 = arith.constant 0 : index
    %419 = vector.load %arg9[%c0_182, %c0_183] : memref<1x32xf32, #tpu.memory_space<vmem>>, vector<1x32xf32>
    %420 = vector.broadcast %419 : vector<1x32xf32> to vector<16x32xf32>
    %421 = arith.addf %418, %420 : vector<16x32xf32>
    %cst_184 = arith.constant 0.000000e+00 : f32
    %422 = vector.broadcast %cst_184 : f32 to vector<16x32xf32>
    %423 = arith.cmpf ogt, %421, %422 : vector<16x32xf32>
    %cst_185 = arith.constant 0.000000e+00 : f32
    %424 = vector.broadcast %cst_185 : f32 to vector<16x32xf32>
    %425 = arith.minimumf %421, %424 : vector<16x32xf32>
    %426 = math.exp %425 : vector<16x32xf32>
    %cst_186 = arith.constant 1.000000e+00 : f32
    %427 = vector.broadcast %cst_186 : f32 to vector<16x32xf32>
    %428 = arith.subf %426, %427 : vector<16x32xf32>
    %429 = arith.select %423, %421, %428 : vector<16x32xi1>, vector<16x32xf32>
    %c0_187 = arith.constant 0 : index
    %c0_188 = arith.constant 0 : index
    %430 = vector.load %arg10[%c0_187, %c0_188] : memref<32x8xf32, #tpu.memory_space<vmem>>, vector<32x8xf32>
    %cst_189 = arith.constant dense<0.000000e+00> : vector<16x8xf32>
    %431 = tpu.matmul %429, %430, %cst_189 {dimension_numbers = #tpu.dot_dimension_numbers<[1], [0], [0], [1], [0, 0, 1, 1], [], []>} : vector<16x32xf32>, vector<32x8xf32>, vector<16x8xf32> -> vector<16x8xf32>
    %c0_190 = arith.constant 0 : index
    %c0_191 = arith.constant 0 : index
    %432 = vector.load %arg11[%c0_190, %c0_191] : memref<1x8xf32, #tpu.memory_space<vmem>>, vector<1x8xf32>
    %cst_192 = arith.constant dense<0.000000e+00> : vector<1x16xf32>
    %433 = tpu.matmul %432, %431, %cst_192 {dimension_numbers = #tpu.dot_dimension_numbers<[1], [1], [0], [0], [0, 0, 1, 0], [], []>} : vector<1x8xf32>, vector<16x8xf32>, vector<1x16xf32> -> vector<1x16xf32>
    %c0_193 = arith.constant 0 : index
    %c0_194 = arith.constant 0 : index
    %434 = vector.load %arg12[%c0_193, %c0_194] : memref<8x1xf32, #tpu.memory_space<vmem>>, vector<8x1xf32>
    %cst_195 = arith.constant dense<0.000000e+00> : vector<16x1xf32>
    %435 = tpu.matmul %431, %434, %cst_195 {dimension_numbers = #tpu.dot_dimension_numbers<[1], [0], [0], [1], [0, 0, 1, 1], [], []>} : vector<16x8xf32>, vector<8x1xf32>, vector<16x1xf32> -> vector<16x1xf32>
    %436 = vector.broadcast %435 : vector<16x1xf32> to vector<16x16xf32>
    %437 = vector.broadcast %433 : vector<1x16xf32> to vector<16x16xf32>
    %438 = arith.addf %436, %437 : vector<16x16xf32>
    %cst_196 = arith.constant 0.000000e+00 : f32
    %439 = vector.broadcast %cst_196 : f32 to vector<16x16xf32>
    %440 = arith.cmpf ogt, %438, %439 : vector<16x16xf32>
    %cst_197 = arith.constant 2.000000e-01 : f32
    %441 = vector.broadcast %cst_197 : f32 to vector<16x16xf32>
    %442 = arith.mulf %441, %438 : vector<16x16xf32>
    %443 = arith.select %440, %438, %442 : vector<16x16xi1>, vector<16x16xf32>
    %444 = arith.addf %443, %1 : vector<16x16xf32>
    %cst_198 = arith.constant dense<0xFF800000> : vector<16xf32>
    %445 = vector.multi_reduction <maximumf>, %444, %cst_198 [1] : vector<16x16xf32> to vector<16xf32>
    %446 = vector.shape_cast %445 : vector<16xf32> to vector<16x1xf32>
    %447 = vector.broadcast %446 : vector<16x1xf32> to vector<16x16xf32>
    %448 = arith.subf %444, %447 : vector<16x16xf32>
    %449 = math.exp %448 : vector<16x16xf32>
    %cst_199 = arith.constant dense<0.000000e+00> : vector<16xf32>
    %450 = vector.multi_reduction <add>, %449, %cst_199 [1] : vector<16x16xf32> to vector<16xf32>
    %451 = vector.shape_cast %450 : vector<16xf32> to vector<16x1xf32>
    %452 = tpu.reciprocal %451 {approx = true} : vector<16x1xf32> -> vector<16x1xf32>
    %453 = vector.broadcast %452 : vector<16x1xf32> to vector<16x16xf32>
    %454 = arith.mulf %449, %453 : vector<16x16xf32>
    %cst_200 = arith.constant dense<0.000000e+00> : vector<16x8xf32>
    %455 = tpu.matmul %454, %431, %cst_200 {dimension_numbers = #tpu.dot_dimension_numbers<[1], [0], [0], [1], [0, 0, 1, 1], [], []>} : vector<16x16xf32>, vector<16x8xf32>, vector<16x8xf32> -> vector<16x8xf32>
    %cst_201 = arith.constant 1.000000e+00 : f32
    %456 = vector.broadcast %cst_201 : f32 to vector<16x8xf32>
    %457 = arith.mulf %455, %456 : vector<16x8xf32>
    %c0_202 = arith.constant 0 : index
    %c0_203 = arith.constant 0 : index
    %458 = vector.load %arg13[%c0_202, %c0_203] : memref<1x8xf32, #tpu.memory_space<vmem>>, vector<1x8xf32>
    %459 = vector.broadcast %458 : vector<1x8xf32> to vector<16x8xf32>
    %460 = arith.addf %457, %459 : vector<16x8xf32>
    %c0_204 = arith.constant 0 : index
    %c0_205 = arith.constant 0 : index
    %461 = vector.load %arg14[%c0_204, %c0_205] : memref<16x8xf32, #tpu.memory_space<vmem>>, vector<16x8xf32>
    tpu.vector_store %arg14[%c0_204, %c0_205], %460 {strides = array<i32>} : memref<16x8xf32, #tpu.memory_space<vmem>>, vector<16x8xf32>,
    return
  }
}

</mosaic_0001>

<bundles_post_ra>
// kernel: tpu_custom_call.1
= control target key start
LH: loop header
LB: loop body
LE: loop exit
PB: predicated region body
PF: predicated region fallthrough
CT: control target
= control target key end

     0   :  { %19 = vsyncpa [#allocation3], 0  ;;  %s6477_s29 = smov [#allocation2]   ;;  %s7294_s0 = inlined_call_operand.vmem [shape: f32[16,16], index: 0, kind: input, shape index: {}]   ;;  %s7295_s1 = inlined_call_operand.vmem [shape: f32[16,16], index: 1, kind: input, shape index: {}]   ;;  %s7296_s2 = inlined_call_operand.vmem [shape: f32[16,32], index: 2, kind: input, shape index: {}]   ;;  %s7297_s3 = inlined_call_operand.vmem [shape: f32[8,4], index: 3, kind: input, shape index: {}]   ;;  %s7298_s4 = inlined_call_operand.hbm [shape: f32[4,8], index: 4, kind: input, shape index: {}]   ;;  %s7299_s5 = inlined_call_operand.vmem [shape: f32[1,32], index: 5, kind: input, shape index: {}]   ;;  %s7300_s6 = inlined_call_operand.vmem [shape: f32[32,32], index: 6, kind: input, shape index: {}]   ;;  %s7301_s7 = inlined_call_operand.vmem [shape: f32[8,4], index: 7, kind: input, shape index: {}]   ;;  %s7302_s8 = inlined_call_operand.vmem [shape: f32[4,8], index: 8, kind: input, shape index: {}]   ;;  %s7303_s9 = inlined_call_operand.vmem [shape: f32[1,32], index: 9, kind: input, shape index: {}]   ;;  %s7304_s10 = inlined_call_operand.vmem [shape: f32[32,8], index: 10, kind: input, shape index: {}]   ;;  %s7305_s11 = inlined_call_operand.vmem [shape: f32[1,8], index: 11, kind: input, shape index: {}]   ;;  %s7306_s12 = inlined_call_operand.vmem [shape: f32[8,1], index: 12, kind: input, shape index: {}]   ;;  %s7307_s13 = inlined_call_operand.vmem [shape: f32[1,8], index: 13, kind: input, shape index: {}]   ;;  %s7308_s14 = inlined_call_operand.vmem [shape: f32[16,8], index: 14, kind: output, shape index: {}]  }
   0x1   :  { %s34_s30 = sshll.u32 %s6477_s29, 4  ;;  %s6453_s17 = scalar_lea.hbm %s7298_s4, 64  ;;  %s35_s30 = int_to_ptr.vmem [resolvable:$true] %s34_s30 }
   0x2   :  { %p6454_p0 = scmp.ne.s32.totalorder %s7298_s4, %s6453_s17  ;;  %p6457_p1 = scmp.lt.u32.totalorder %s6453_s17, %s7298_s4 }
   0x4   :  { %p6459_p2 = pnand %p6457_p1, %p6454_p0 }
   0x6   :  { %6462 = shalt.err (!%p6459_p2)
}
   0x7   :  { %s6463_s22 = scalar_lea.vmem %s35_s30, 64  ;;  %p6468_p4 = scmp.lt.s32.totalorder %s35_s30, %s35_s30 }
   0x8   :  { %p6464_p3 = scmp.ne.s32.totalorder %s35_s30, %s6463_s22  ;;  %p6469_p5 = scmp.lt.s32.totalorder %s6463_s22, %s6463_s22 }
   0xa   :  { %p6470_p6 = por %p6469_p5, %p6468_p4 }
   0xc   :  { %p6471_p7 = pnand %p6470_p6, %p6464_p3 }
   0xe   :  { %6474 = shalt.err (!%p6471_p7)
}
   0xf   :  { %37 = dma.hbm_to_vmem [thread:$0]  %s7298_s4, 64, %s35_s30, [#allocation3]  }
  0x10   :  { %6475 = dma.done.wait [#allocation3], 64  }
  0x11   :  { %6476 = vsyncadd [#allocation3], 4294967232  ;;  %vm65_vm0 = vcmask 130048   ;;  %v63_v0 = vld [vmem:[%s7296_s2] sm:$0xff]  ;;  %v64_v1 = vld [vmem:[%s7296_s2 + $0x8] sm:$0xff]  ;;  %vm229_vm1 = vcmask 1043456   ;;  %v318_v18 = vlaneseq }
  0x12   :  { %v59_v2 = vld [vmem:[%s7294_s0] sm:$0xff]  ;;  %v6122_v3 = vpack.c.bf16 %v64_v1, %v63_v0  ;;  %v60_v5 = vld [vmem:[%s7294_s0 + $0x8] sm:$0xff]  ;;  %v6478_v6 = vmov 0.0|0.0   ;;  %vm6479_vm2 = vmmov 0   ;;  %v6480_v7 = vmov 0.0   ;;  %s6482_s20 = smov 127  }
  0x13   :  { %5774 = vmatprep.mubr.msk.f32.mxu0 %vm65_vm0, %v59_v2  ;;  %v6599_v4 = vld [vmem:[#allocation2] sm:$0xf]  ;;  %6126 = vmatprep.subr.bf16.mxu1 %v6478_v6  ;;  %vm148_vm3 = vcmask 31744   ;;  %v6481_v13 = vmov 0   ;;  %v319_v19 = vshrl.u32 %v318_v18, 7  ;;  %v6649_v31 = vld [vmem:[%s7295_s1 + $0x8] sm:$0xff] }
  0x14   :  { %6123 = vmatprep.subr.bf16.mxu0 %v6122_v3  ;;  %5781 = vmatprep.mubr.msk.f32.mxu1 %vm6479_vm2, %v6480_v7  ;;  %vm6618_vm4 = vmpackc.low %vm148_vm3, %vm148_vm3  ;;  %v147_v12 = vld [vmem:[%s7297_s3] sm:$0x1]  ;;  %s6483_s21 = smov 124   ;;  %v435_v56 = vld [vmem:[%s7297_s3 + $0x1] sm:$0x1]  ;;  %s6484_s24 = smov 126  }
  0x15   :  { %6125 = vmatpush3.bf16.msra.mxu0 %v6122_v3  ;;  %6303 = vset.pattern.permute.xlu0 %v6481_v13  ;;  %v6637_v20 = vsub.s32 0, %v319_v19  ;;  %v6643_v25 = vld [vmem:[%s7295_s1] sm:$0xff]  ;;  %s6485_s25 = smov 120   ;;  %s6486_s28 = smov 125  }
  0x16   :  { %5784 = vmatprep.subr.msk.mxu0 %vm229_vm1, %v6599_v4  ;;  %6304 = vset.pattern.permute.xlu1 %v6481_v13  ;;  %s6487_s29 = smov 116   ;;  %s6488_s30 = smov 112  }
  0x17   :  { %s6489_s16 = smov 123   ;;  %s6490_s17 = smov 108  }
  0x18   :  { %5775 = vmatmul.mubr.msk.f32.vlgmr.msra.gmra.mrb[0].mxu0 %vm65_vm0, %v60_v5  ;;  %s6491_s22 = smov 104   ;;  %s6492_s23 = smov 122  }
  0x19   :  { %5785 = vmatpush3.msk.msra.mxu0 %vm229_vm1, %v6599_v4  ;;  %s7321_s15 = smov 121   ;;  %s7322_s4 = smov 100  }
  0x1a   :  { %s7317_s18 = smov 8   ;;  %s7315_s19 = smov 12  }
  0x1b   :  { %s7309_s26 = smov 16   ;;  %s7313_s27 = smov 20  }
  0x1c   :  { %s7311_s0 = smov 24  }
  0xeb   :  { %v6612_v8 = vpop.f32.mrb[0].mxu0 }
  0xec   :  { %v6614_v9 = vpop.f32.mrb[1].mxu0 }
  0xed   :  { %5786 = vmatprep.mubr.msk.f32.mxu0 %vm148_vm3, %v6614_v9  ;;  %v6127_v11 = vpack.c.bf16 %v6612_v8, %v6614_v9 }
  0xee   :  { %5787 = vmatmul.mubr.msk.f32.vlgmr.msra.gmra.mrb[2].mxu0 %vm148_vm3, %v6612_v8 }
  0xef   :  { %6129 = vmatpush3.bf16.xpose.msk.msra.mxu1 %vm6618_vm4, %v6127_v11  ;;  %6131 = vmatprep.subr.bf16.mxu0 %v6127_v11 }
  0xf0   :  { %6133 = vmatpush3.bf16.msra.mxu0 %v6127_v11  ;;  %6134 = vmatprep.subr.bf16.mxu1 %v6478_v6 }
  0xf6   :  { %5782 = vmatmul.mubr.msk.f32.vlgmr.msra.gmra.mrb[0].mxu1 %vm148_vm3, %v147_v12 }
  0xf7   :  { %5800 = vmatprep.mubr.msk.f32.mxu1 %vm6479_vm2, %v6480_v7 }
 0x1c1   :  { %v5788_v14 = vpop.f32.mrb[2].mxu0 }
 0x1c2   :  { %v299_v15 = vpop.f32.mrb[3].mxu0 }
 0x1c3   :  { %310 = vperm.xlu0 %6303, %v299_v15  }
 0x1c7   :  { %315 = vperm.xlu0 %6303, %v5788_v14  }
 0x1c9   :  { %v224_v16 = vpop.f32.mrb[0].mxu1 }
 0x1ca   :  { %v5783_v17 = vpop.f32.mrb[1].mxu1  ;;  %v321_v21 = vrot.slane %v224_v16, %v6637_v20 }
 0x242   :  { %v311_v22 = vpop.permute.xlu0 %310 }
 0x243   :  { %v322_v23 = vadd.f32 %v321_v21, %v311_v22 }
 0x245   :  { %v326_v24 = vmul.f32 0.2, %v322_v23  ;;  %vm324_vm5 = vcmp.gt.f32.partialorder %v322_v23, 0.0 }
 0x246   :  { %v316_v26 = vpop.permute.xlu0 %315 }
 0x247   :  { %v323_v27 = vadd.f32 %v321_v21, %v316_v26  ;;  %v328_v28 = vsel %vm324_vm5, %v322_v23, %v326_v24 }
 0x248   :  { %v330_v29 = vadd.f32 %v328_v28, %v6643_v25 }
 0x249   :  { %v327_v30 = vmul.f32 0.2, %v323_v27  ;;  %vm325_vm6 = vcmp.gt.f32.partialorder %v323_v27, 0.0 }
 0x24a   :  { %v332_v32 = vsel %vm65_vm0, %v330_v29, -inf }
 0x24b   :  { %333 = vmax.xlane.f32.xlu1 %v332_v32  ;;  %v329_v33 = vsel %vm325_vm6, %v323_v27, %v327_v30 }
 0x24c   :  { %v331_v34 = vadd.f32 %v329_v33, %v6649_v31 }
 0x24e   :  { %v335_v35 = vsel %vm65_vm0, %v331_v34, -inf }
 0x24f   :  { %336 = vmax.xlane.f32.xlu1 %v335_v35 }
 0x2d8   :  { %v334_v36 = vpop.xlane.xlu1 %333 }
 0x2d9   :  { %v338_v37 = vsub.f32 %v330_v29, %v334_v36 }
 0x2db   :  { %v340_v38 = vmul.f32 1.442695, %v338_v37 }
 0x2dc   :  { %v337_v39 = vpop.xlane.xlu1 %336 }
 0x2dd   :  { %6305 = vpow2.f32 %v340_v38  ;;  %v339_v40 = vsub.f32 %v331_v34, %v337_v39  ;;  %v725_v39 = vld [vmem:[%s7297_s3 + $0x2] sm:$0x1] }
 0x2df   :  { %v342_v41 = vmul.f32 1.442695, %v339_v40 }
 0x2e1   :  { %6307 = vpow2.f32 %v342_v41 }
 0x2e7   :  { %v6306_v42 = vpop.eup %6305 }
 0x2e8   :  { %v344_v43 = vsel %vm65_vm0, %v6306_v42, 0.0 }
 0x2e9   :  { %345 = vadd.xlane.f32.xlu0 %v344_v43 }
 0x2eb   :  { %v6308_v44 = vpop.eup %6307 }
 0x2ec   :  { %v347_v45 = vsel %vm65_vm0, %v6308_v44, 0.0 }
 0x2ed   :  { %348 = vadd.xlane.f32.xlu1 %v347_v45 }
 0x2fe   :  { %517 = vrot.lane.b32.xlu1 %v6599_v4, %s6482_s20 }
 0x302   :  { %436 = vrot.lane.b32.xlu1 %v6614_v9, %s6483_s21 }
 0x306   :  { %438 = vrot.lane.b32.xlu1 %v6612_v8, %s6483_s21 }
 0x376   :  { %v346_v46 = vpop.xlane.xlu0 %345 }
 0x377   :  { %6309 = vrcp.f32 %v346_v46 }
 0x37a   :  { %v349_v47 = vpop.xlane.xlu1 %348 }
 0x37b   :  { %6311 = vrcp.f32 %v349_v47 }
 0x37e   :  { %v518_v48 = vpop.permute.xlu1 %517 }
 0x37f   :  { %5803 = vmatprep.subr.msk.mxu0 %vm229_vm1, %v518_v48 }
 0x381   :  { %v6310_v49 = vpop.eup %6309 }
 0x382   :  { %v437_v50 = vpop.permute.xlu1 %436  ;;  %v352_v51 = vmul.f32 %v6310_v49, %v6306_v42 }
 0x384   :  { %5793 = vmatprep.mubr.msk.f32.mxu0 %vm65_vm0, %v352_v51 }
 0x385   :  { %v6312_v52 = vpop.eup %6311 }
 0x386   :  { %v439_v53 = vpop.permute.xlu1 %438  ;;  %v353_v54 = vmul.f32 %v6312_v52, %v6308_v44 }
 0x387   :  { %v6135_v55 = vpack.c.bf16 %v439_v53, %v437_v50 }
 0x388   :  { %5794 = vmatmul.mubr.msk.f32.vlgmr.msra.gmra.mrb[4].mxu0 %vm65_vm0, %v353_v54 }
 0x389   :  { %5804 = vmatpush3.msk.msra.mxu0 %vm229_vm1, %v518_v48  ;;  %6137 = vmatpush3.bf16.xpose.msk.msra.mxu1 %vm6618_vm4, %v6135_v55 }
 0x38a   :  { %5805 = vmatprep.mubr.msk.f32.mxu0 %vm148_vm3, %v437_v50  ;;  %6139 = vmatprep.subr.bf16.mxu0 %v6135_v55 }
 0x38b   :  { %6142 = vmatprep.subr.bf16.mxu1 %v6478_v6 }
 0x38c   :  { %5806 = vmatmul.mubr.msk.f32.vlgmr.msra.gmra.mrb[6].mxu0 %vm148_vm3, %v439_v53 }
 0x38d   :  { %6141 = vmatpush3.bf16.msra.mxu0 %v6135_v55 }
 0x390   :  { %5801 = vmatmul.mubr.msk.f32.vlgmr.msra.gmra.mrb[2].mxu1 %vm148_vm3, %v435_v56 }
 0x391   :  { %5819 = vmatprep.mubr.msk.f32.mxu1 %vm6479_vm2, %v6480_v7 }
 0x45b   :  { %v6677_v57 = vpop.f32.mrb[4].mxu0 }
 0x45c   :  { %v6679_v58 = vpop.f32.mrb[5].mxu0 }
 0x45f   :  { %v5807_v59 = vpop.f32.mrb[6].mxu0 }
 0x460   :  { %603 = vperm.xlu0 %6303, %v5807_v59   ;;  %v587_v60 = vpop.f32.mrb[7].mxu0 }
 0x461   :  { %598 = vperm.xlu1 %6304, %v587_v60  }
 0x463   :  { %v513_v61 = vpop.f32.mrb[2].mxu1 }
 0x464   :  { %v5802_v62 = vpop.f32.mrb[3].mxu1  ;;  %v609_v63 = vrot.slane %v513_v61, %v6637_v20 }
 0x4df   :  { %v604_v0 = vpop.permute.xlu0 %603 }
 0x4e0   :  { %v611_v1 = vadd.f32 %v609_v63, %v604_v0  ;;  %v599_v2 = vpop.permute.xlu1 %598 }
 0x4e1   :  { %v610_v3 = vadd.f32 %v609_v63, %v599_v2 }
 0x4e2   :  { %v615_v5 = vmul.f32 0.2, %v611_v1  ;;  %vm613_vm7 = vcmp.gt.f32.partialorder %v611_v1, 0.0 }
 0x4e3   :  { %v614_v11 = vmul.f32 0.2, %v610_v3  ;;  %vm612_vm8 = vcmp.gt.f32.partialorder %v610_v3, 0.0 }
 0x4e4   :  { %v617_v12 = vsel %vm613_vm7, %v611_v1, %v615_v5 }
 0x4e5   :  { %v619_v13 = vadd.f32 %v617_v12, %v6649_v31  ;;  %v616_v14 = vsel %vm612_vm8, %v610_v3, %v614_v11 }
 0x4e6   :  { %v618_v15 = vadd.f32 %v616_v14, %v6643_v25 }
 0x4e7   :  { %v623_v16 = vsel %vm65_vm0, %v619_v13, -inf }
 0x4e8   :  { %624 = vmax.xlane.f32.xlu0 %v623_v16  ;;  %v620_v17 = vsel %vm65_vm0, %v618_v15, -inf }
 0x4e9   :  { %621 = vmax.xlane.f32.xlu1 %v620_v17 }
 0x4fa   :  { %807 = vrot.lane.b32.xlu1 %v6599_v4, %s6484_s24 }
 0x4fe   :  { %726 = vrot.lane.b32.xlu0 %v6614_v9, %s6485_s25 }
 0x575   :  { %v625_v18 = vpop.xlane.xlu0 %624 }
 0x576   :  { %v627_v19 = vsub.f32 %v619_v13, %v625_v18  ;;  %v622_v21 = vpop.xlane.xlu1 %621 }
 0x577   :  { %v626_v22 = vsub.f32 %v618_v15, %v622_v21 }
 0x578   :  { %v630_v23 = vmul.f32 1.442695, %v627_v19 }
 0x579   :  { %v628_v24 = vmul.f32 1.442695, %v626_v22  ;;  %v727_v34 = vpop.permute.xlu0 %726 }
 0x57a   :  { %6313 = vpow2.f32 %v630_v23  ;;  %v808_v26 = vpop.permute.xlu1 %807 }
 0x57b   :  { %5822 = vmatprep.subr.msk.mxu0 %vm229_vm1, %v808_v26  ;;  %6315 = vpow2.f32 %v628_v24  ;;  %v1015_v24 = vld [vmem:[%s7297_s3 + $0x3] sm:$0x1] }
 0x584   :  { %v6314_v27 = vpop.eup %6313 }
 0x585   :  { %v635_v28 = vsel %vm65_vm0, %v6314_v27, 0.0  ;;  %v6316_v29 = vpop.eup %6315 }
 0x586   :  { %636 = vadd.xlane.f32.xlu1 %v635_v28  ;;  %v632_v30 = vsel %vm65_vm0, %v6316_v29, 0.0 }
 0x58a   :  { %633 = vadd.xlane.f32.xlu1 %v632_v30 }
 0x59b   :  { %728 = vrot.lane.b32.xlu1 %v6612_v8, %s6485_s25 }
 0x613   :  { %v637_v32 = vpop.xlane.xlu1 %636 }
 0x614   :  { %6317 = vrcp.f32 %v637_v32 }
 0x617   :  { %v634_v33 = vpop.xlane.xlu1 %633 }
 0x618   :  { %6319 = vrcp.f32 %v634_v33 }
 0x61b   :  { %v729_v35 = vpop.permute.xlu1 %728 }
 0x61c   :  { %v6143_v36 = vpack.c.bf16 %v729_v35, %v727_v34 }
 0x61e   :  { %6145 = vmatpush3.bf16.xpose.msk.msra.mxu1 %vm6618_vm4, %v6143_v36  ;;  %v6318_v37 = vpop.eup %6317 }
 0x61f   :  { %6150 = vmatprep.subr.bf16.mxu1 %v6478_v6  ;;  %v641_v41 = vmul.f32 %v6318_v37, %v6314_v27 }
 0x622   :  { %v6320_v38 = vpop.eup %6319 }
 0x623   :  { %v640_v40 = vmul.f32 %v6320_v38, %v6316_v29 }
 0x625   :  { %5812 = vmatprep.mubr.msk.f32.mxu0 %vm65_vm0, %v640_v40  ;;  %5820 = vmatmul.mubr.msk.f32.vlgmr.msra.gmra.mrb[4].mxu1 %vm148_vm3, %v725_v39 }
 0x626   :  { %5813 = vmatmul.mubr.msk.f32.vlgmr.msra.gmra.mrb[8].mxu0 %vm65_vm0, %v641_v41  ;;  %5838 = vmatprep.mubr.msk.f32.mxu1 %vm6479_vm2, %v6480_v7 }
 0x627   :  { %5823 = vmatpush3.msk.msra.mxu0 %vm229_vm1, %v808_v26  ;;  %5824 = vmatprep.mubr.msk.f32.mxu0 %vm148_vm3, %v727_v34 }
 0x628   :  { %6147 = vmatprep.subr.bf16.mxu0 %v6143_v36 }
 0x62a   :  { %5825 = vmatmul.mubr.msk.f32.vlgmr.msra.gmra.mrb[10].mxu0 %vm148_vm3, %v729_v35 }
 0x62b   :  { %6149 = vmatpush3.bf16.msra.mxu0 %v6143_v36 }
 0x6f8   :  { %v803_v42 = vpop.f32.mrb[4].mxu1 }
 0x6f9   :  { %v6709_v43 = vpop.f32.mrb[8].mxu0  ;;  %v5821_v44 = vpop.f32.mrb[5].mxu1  ;;  %v899_v48 = vrot.slane %v803_v42, %v6637_v20 }
 0x6fa   :  { %v6711_v45 = vpop.f32.mrb[9].mxu0 }
 0x6fd   :  { %v5826_v46 = vpop.f32.mrb[10].mxu0 }
 0x6fe   :  { %v877_v47 = vpop.f32.mrb[11].mxu0 }
 0x6ff   :  { %888 = vperm.xlu1 %6304, %v877_v47  }
 0x703   :  { %893 = vperm.xlu1 %6304, %v5826_v46  }
 0x77e   :  { %v889_v49 = vpop.permute.xlu1 %888 }
 0x77f   :  { %v900_v50 = vadd.f32 %v899_v48, %v889_v49 }
 0x781   :  { %v904_v51 = vmul.f32 0.2, %v900_v50  ;;  %vm902_vm9 = vcmp.gt.f32.partialorder %v900_v50, 0.0 }
 0x782   :  { %v894_v52 = vpop.permute.xlu1 %893 }
 0x783   :  { %v901_v53 = vadd.f32 %v899_v48, %v894_v52  ;;  %v906_v54 = vsel %vm902_vm9, %v900_v50, %v904_v51 }
 0x784   :  { %v908_v55 = vadd.f32 %v906_v54, %v6643_v25 }
 0x785   :  { %v905_v56 = vmul.f32 0.2, %v901_v53  ;;  %vm903_vm10 = vcmp.gt.f32.partialorder %v901_v53, 0.0 }
 0x786   :  { %v910_v59 = vsel %vm65_vm0, %v908_v55, -inf }
 0x787   :  { %911 = vmax.xlane.f32.xlu0 %v910_v59  ;;  %v907_v60 = vsel %vm903_vm10, %v901_v53, %v905_v56  ;;  %vm2523_vm10 = vcmask 64512  }
 0x788   :  { %v909_v61 = vadd.f32 %v907_v60, %v6649_v31 }
 0x78a   :  { %v913_v62 = vsel %vm65_vm0, %v909_v61, -inf }
 0x78b   :  { %914 = vmax.xlane.f32.xlu1 %v913_v62 }
 0x79c   :  { %1097 = vrot.lane.b32.xlu1 %v6599_v4, %s6486_s28 }
 0x7a0   :  { %1018 = vrot.lane.b32.xlu1 %v6612_v8, %s6487_s29 }
 0x814   :  { %v912_v63 = vpop.xlane.xlu0 %911 }
 0x815   :  { %v916_v0 = vsub.f32 %v908_v55, %v912_v63 }
 0x817   :  { %v918_v3 = vmul.f32 1.442695, %v916_v0 }
 0x818   :  { %v915_v1 = vpop.xlane.xlu1 %914 }
 0x819   :  { %v917_v2 = vsub.f32 %v909_v61, %v915_v1 }
 0x81b   :  { %v920_v5 = vmul.f32 1.442695, %v917_v2 }
 0x81c   :  { %v1098_v11 = vpop.permute.xlu1 %1097 }
 0x81d   :  { %6321 = vpow2.f32 %v920_v5  ;;  %5841 = vmatprep.subr.msk.mxu0 %vm229_vm1, %v1098_v11 }
 0x81e   :  { %6323 = vpow2.f32 %v918_v3 }
 0x820   :  { %v1019_v18 = vpop.permute.xlu1 %1018 }
 0x827   :  { %v6322_v12 = vpop.eup %6321 }
 0x828   :  { %v925_v13 = vsel %vm65_vm0, %v6322_v12, 0.0  ;;  %v6324_v14 = vpop.eup %6323 }
 0x829   :  { %926 = vadd.xlane.f32.xlu0 %v925_v13  ;;  %v922_v15 = vsel %vm65_vm0, %v6324_v14, 0.0 }
 0x82d   :  { %923 = vadd.xlane.f32.xlu0 %v922_v15 }
 0x843   :  { %1016 = vrot.lane.b32.xlu0 %v6614_v9, %s6487_s29 }
 0x8b6   :  { %v927_v16 = vpop.xlane.xlu0 %926 }
 0x8b7   :  { %6325 = vrcp.f32 %v927_v16 }
 0x8ba   :  { %v924_v17 = vpop.xlane.xlu0 %923 }
 0x8bb   :  { %6327 = vrcp.f32 %v924_v17 }
 0x8be   :  { %v1017_v19 = vpop.permute.xlu0 %1016 }
 0x8bf   :  { %v6151_v21 = vpack.c.bf16 %v1019_v18, %v1017_v19 }
 0x8c1   :  { %6153 = vmatpush3.bf16.xpose.msk.msra.mxu1 %vm6618_vm4, %v6151_v21  ;;  %v6326_v22 = vpop.eup %6325 }
 0x8c2   :  { %6158 = vmatprep.subr.bf16.mxu1 %v6478_v6  ;;  %v931_v27 = vmul.f32 %v6326_v22, %v6322_v12 }
 0x8c5   :  { %v6328_v23 = vpop.eup %6327 }
 0x8c6   :  { %v930_v26 = vmul.f32 %v6328_v23, %v6324_v14  ;;  %v1305_v14 = vld [vmem:[%s7297_s3 + $0x4] sm:$0x1] }
 0x8c8   :  { %5831 = vmatprep.mubr.msk.f32.mxu0 %vm65_vm0, %v930_v26  ;;  %5839 = vmatmul.mubr.msk.f32.vlgmr.msra.gmra.mrb[6].mxu1 %vm148_vm3, %v1015_v24 }
 0x8c9   :  { %5832 = vmatmul.mubr.msk.f32.vlgmr.msra.gmra.mrb[12].mxu0 %vm65_vm0, %v931_v27  ;;  %5857 = vmatprep.mubr.msk.f32.mxu1 %vm6479_vm2, %v6480_v7 }
 0x8ca   :  { %5842 = vmatpush3.msk.msra.mxu0 %vm229_vm1, %v1098_v11  ;;  %5843 = vmatprep.mubr.msk.f32.mxu0 %vm148_vm3, %v1017_v19 }
 0x8cb   :  { %6155 = vmatprep.subr.bf16.mxu0 %v6151_v21 }
 0x8cd   :  { %5844 = vmatmul.mubr.msk.f32.vlgmr.msra.gmra.mrb[14].mxu0 %vm148_vm3, %v1019_v18 }
 0x8ce   :  { %6157 = vmatpush3.bf16.msra.mxu0 %v6151_v21 }
 0x99b   :  { %v1093_v28 = vpop.f32.mrb[6].mxu1 }
 0x99c   :  { %v6741_v29 = vpop.f32.mrb[12].mxu0  ;;  %v5840_v30 = vpop.f32.mrb[7].mxu1  ;;  %v1189_v35 = vrot.slane %v1093_v28, %v6637_v20 }
 0x99d   :  { %v6743_v32 = vpop.f32.mrb[13].mxu0 }
 0x9a0   :  { %v5845_v33 = vpop.f32.mrb[14].mxu0 }
 0x9a1   :  { %1183 = vperm.xlu0 %6303, %v5845_v33   ;;  %v1167_v34 = vpop.f32.mrb[15].mxu0 }
 0x9a2   :  { %1178 = vperm.xlu1 %6304, %v1167_v34  }
 0xa20   :  { %v1184_v36 = vpop.permute.xlu0 %1183 }
 0xa21   :  { %v1191_v37 = vadd.f32 %v1189_v35, %v1184_v36  ;;  %v1179_v38 = vpop.permute.xlu1 %1178 }
 0xa22   :  { %v1190_v39 = vadd.f32 %v1189_v35, %v1179_v38 }
 0xa23   :  { %v1195_v40 = vmul.f32 0.2, %v1191_v37  ;;  %vm1193_vm11 = vcmp.gt.f32.partialorder %v1191_v37, 0.0 }
 0xa24   :  { %v1194_v41 = vmul.f32 0.2, %v1190_v39  ;;  %vm1192_vm12 = vcmp.gt.f32.partialorder %v1190_v39, 0.0 }
 0xa25   :  { %v1197_v42 = vsel %vm1193_vm11, %v1191_v37, %v1195_v40  ;;  %vm2526_vm11 = vcmask 97280  }
 0xa26   :  { %v1199_v44 = vadd.f32 %v1197_v42, %v6649_v31  ;;  %v1196_v46 = vsel %vm1192_vm12, %v1190_v39, %v1194_v41  ;;  %vm2531_vm12 = vcmask 162816  }
 0xa27   :  { %v1198_v47 = vadd.f32 %v1196_v46, %v6643_v25 }
 0xa28   :  { %v1203_v48 = vsel %vm65_vm0, %v1199_v44, -inf }
 0xa29   :  { %1204 = vmax.xlane.f32.xlu0 %v1203_v48  ;;  %v1200_v49 = vsel %vm65_vm0, %v1198_v47, -inf }
 0xa2a   :  { %1201 = vmax.xlane.f32.xlu1 %v1200_v49 }
 0xab6   :  { %v1205_v50 = vpop.xlane.xlu0 %1204 }
 0xab7   :  { %v1207_v51 = vsub.f32 %v1199_v44, %v1205_v50  ;;  %v1202_v52 = vpop.xlane.xlu1 %1201 }
 0xab8   :  { %v1206_v53 = vsub.f32 %v1198_v47, %v1202_v52 }
 0xab9   :  { %v1210_v54 = vmul.f32 1.442695, %v1207_v51 }
 0xaba   :  { %v1208_v55 = vmul.f32 1.442695, %v1206_v53 }
 0xabb   :  { %6329 = vpow2.f32 %v1210_v54 }
 0xabc   :  { %6331 = vpow2.f32 %v1208_v55 }
 0xac5   :  { %v6330_v56 = vpop.eup %6329 }
 0xac6   :  { %v6332_v59 = vpop.eup %6331  ;;  %v1215_v60 = vsel %vm65_vm0, %v6330_v56, 0.0 }
 0xac7   :  { %1216 = vadd.xlane.f32.xlu1 %v1215_v60  ;;  %v1212_v61 = vsel %vm65_vm0, %v6332_v59, 0.0 }
 0xac8   :  { %1213 = vadd.xlane.f32.xlu0 %v1212_v61  ;;  %v1595_v61 = vld [vmem:[%s7297_s3 + $0x5] sm:$0x1] }
 0xad8   :  { %1306 = vrot.lane.b32.xlu1 %v6614_v9, %s6488_s30 }
 0xadc   :  { %1308 = vrot.lane.b32.xlu1 %v6612_v8, %s6488_s30 }
 0xade   :  { %1387 = vrot.lane.b32.xlu0 %v6599_v4, %s6483_s21 }
 0xb54   :  { %v1217_v62 = vpop.xlane.xlu1 %1216 }
 0xb55   :  { %6333 = vrcp.f32 %v1217_v62  ;;  %v1214_v63 = vpop.xlane.xlu0 %1213 }
 0xb56   :  { %6335 = vrcp.f32 %v1214_v63 }
 0xb58   :  { %v1307_v0 = vpop.permute.xlu1 %1306 }
 0xb59   :  { %v1388_v1 = vpop.permute.xlu0 %1387 }
 0xb5a   :  { %5860 = vmatprep.subr.msk.mxu0 %vm229_vm1, %v1388_v1 }
 0xb5c   :  { %v1309_v2 = vpop.permute.xlu1 %1308 }
 0xb5d   :  { %v6159_v3 = vpack.c.bf16 %v1309_v2, %v1307_v0 }
 0xb5f   :  { %v6334_v5 = vpop.eup %6333  ;;  %6161 = vmatpush3.bf16.xpose.msk.msra.mxu1 %vm6618_vm4, %v6159_v3 }
 0xb60   :  { %v6336_v11 = vpop.eup %6335  ;;  %6166 = vmatprep.subr.bf16.mxu1 %v6478_v6  ;;  %v1221_v13 = vmul.f32 %v6334_v5, %v6330_v56 }
 0xb61   :  { %v1220_v12 = vmul.f32 %v6336_v11, %v6332_v59 }
 0xb63   :  { %5850 = vmatprep.mubr.msk.f32.mxu0 %vm65_vm0, %v1220_v12 }
 0xb64   :  { %5851 = vmatmul.mubr.msk.f32.vlgmr.msra.gmra.mrb[16].mxu0 %vm65_vm0, %v1221_v13 }
 0xb65   :  { %5861 = vmatpush3.msk.msra.mxu0 %vm229_vm1, %v1388_v1  ;;  %5862 = vmatprep.mubr.msk.f32.mxu0 %vm148_vm3, %v1307_v0 }
 0xb66   :  { %6163 = vmatprep.subr.bf16.mxu0 %v6159_v3  ;;  %5858 = vmatmul.mubr.msk.f32.vlgmr.msra.gmra.mrb[8].mxu1 %vm148_vm3, %v1305_v14 }
 0xb67   :  { %5876 = vmatprep.mubr.msk.f32.mxu1 %vm6479_vm2, %v6480_v7 }
 0xb68   :  { %5863 = vmatmul.mubr.msk.f32.vlgmr.msra.gmra.mrb[18].mxu0 %vm148_vm3, %v1309_v2 }
 0xb69   :  { %6165 = vmatpush3.bf16.msra.mxu0 %v6159_v3 }
 0xc37   :  { %v6773_v15 = vpop.f32.mrb[16].mxu0 }
 0xc38   :  { %v6775_v16 = vpop.f32.mrb[17].mxu0 }
 0xc39   :  { %v1383_v17 = vpop.f32.mrb[8].mxu1 }
 0xc3a   :  { %v5859_v18 = vpop.f32.mrb[9].mxu1  ;;  %v1479_v22 = vrot.slane %v1383_v17, %v6637_v20 }
 0xc3b   :  { %v5864_v19 = vpop.f32.mrb[18].mxu0 }
 0xc3c   :  { %1473 = vperm.xlu1 %6304, %v5864_v19   ;;  %v1457_v21 = vpop.f32.mrb[19].mxu0 }
 0xc3d   :  { %1468 = vperm.xlu0 %6303, %v1457_v21  }
 0xcbb   :  { %v1474_v23 = vpop.permute.xlu1 %1473 }
 0xcbc   :  { %v1481_v24 = vadd.f32 %v1479_v22, %v1474_v23  ;;  %v1469_v26 = vpop.permute.xlu0 %1468 }
 0xcbd   :  { %v1480_v27 = vadd.f32 %v1479_v22, %v1469_v26 }
 0xcbe   :  { %v1485_v28 = vmul.f32 0.2, %v1481_v24  ;;  %vm1483_vm13 = vcmp.gt.f32.partialorder %v1481_v24, 0.0 }
 0xcbf   :  { %v1484_v30 = vmul.f32 0.2, %v1480_v27  ;;  %vm1482_vm14 = vcmp.gt.f32.partialorder %v1480_v27, 0.0 }
 0xcc0   :  { %v1487_v33 = vsel %vm1483_vm13, %v1481_v24, %v1485_v28  ;;  %vm2534_vm13 = vcmask 195584  }
 0xcc1   :  { %v1489_v34 = vadd.f32 %v1487_v33, %v6649_v31  ;;  %v1486_v35 = vsel %vm1482_vm14, %v1480_v27, %v1484_v30  ;;  %vm2537_vm14 = vcmask 228352  }
 0xcc2   :  { %v1488_v36 = vadd.f32 %v1486_v35, %v6643_v25 }
 0xcc3   :  { %v1493_v37 = vsel %vm65_vm0, %v1489_v34, -inf }
 0xcc4   :  { %1494 = vmax.xlane.f32.xlu1 %v1493_v37  ;;  %v1490_v38 = vsel %vm65_vm0, %v1488_v36, -inf }
 0xcc5   :  { %1491 = vmax.xlane.f32.xlu0 %v1490_v38 }
 0xcd5   :  { %1677 = vrot.lane.b32.xlu1 %v6599_v4, %s6489_s16 }
 0xcd9   :  { %1598 = vrot.lane.b32.xlu1 %v6612_v8, %s6490_s17 }
 0xd51   :  { %v1495_v39 = vpop.xlane.xlu1 %1494 }
 0xd52   :  { %v1497_v40 = vsub.f32 %v1489_v34, %v1495_v39  ;;  %v1492_v41 = vpop.xlane.xlu0 %1491 }
 0xd53   :  { %v1496_v42 = vsub.f32 %v1488_v36, %v1492_v41 }
 0xd54   :  { %v1500_v44 = vmul.f32 1.442695, %v1497_v40 }
 0xd55   :  { %v1498_v46 = vmul.f32 1.442695, %v1496_v42  ;;  %v1678_v47 = vpop.permute.xlu1 %1677 }
 0xd56   :  { %6337 = vpow2.f32 %v1500_v44  ;;  %5879 = vmatprep.subr.msk.mxu0 %vm229_vm1, %v1678_v47 }
 0xd57   :  { %6339 = vpow2.f32 %v1498_v46 }
 0xd59   :  { %v1599_v54 = vpop.permute.xlu1 %1598 }
 0xd60   :  { %v6338_v48 = vpop.eup %6337 }
 0xd61   :  { %v1505_v49 = vsel %vm65_vm0, %v6338_v48, 0.0  ;;  %v6340_v50 = vpop.eup %6339 }
 0xd62   :  { %1506 = vadd.xlane.f32.xlu0 %v1505_v49  ;;  %v1502_v51 = vsel %vm65_vm0, %v6340_v50, 0.0 }
 0xd66   :  { %1503 = vadd.xlane.f32.xlu0 %v1502_v51 }
 0xd7c   :  { %1596 = vrot.lane.b32.xlu0 %v6614_v9, %s6490_s17 }
 0xdef   :  { %v1507_v52 = vpop.xlane.xlu0 %1506 }
 0xdf0   :  { %6341 = vrcp.f32 %v1507_v52 }
 0xdf3   :  { %v1504_v53 = vpop.xlane.xlu0 %1503 }
 0xdf4   :  { %6343 = vrcp.f32 %v1504_v53 }
 0xdf7   :  { %v1597_v55 = vpop.permute.xlu0 %1596 }
 0xdf8   :  { %v6167_v56 = vpack.c.bf16 %v1599_v54, %v1597_v55 }
 0xdfa   :  { %6169 = vmatpush3.bf16.xpose.msk.msra.mxu1 %vm6618_vm4, %v6167_v56  ;;  %v6342_v59 = vpop.eup %6341 }
 0xdfb   :  { %6174 = vmatprep.subr.bf16.mxu1 %v6478_v6  ;;  %v1511_v63 = vmul.f32 %v6342_v59, %v6338_v48 }
 0xdfe   :  { %v6344_v60 = vpop.eup %6343 }
 0xdff   :  { %v1510_v62 = vmul.f32 %v6344_v60, %v6340_v50 }
 0xe01   :  { %5869 = vmatprep.mubr.msk.f32.mxu0 %vm65_vm0, %v1510_v62  ;;  %5877 = vmatmul.mubr.msk.f32.vlgmr.msra.gmra.mrb[10].mxu1 %vm148_vm3, %v1595_v61 }
 0xe02   :  { %5870 = vmatmul.mubr.msk.f32.vlgmr.msra.gmra.mrb[20].mxu0 %vm65_vm0, %v1511_v63  ;;  %5895 = vmatprep.mubr.msk.f32.mxu1 %vm6479_vm2, %v6480_v7 }
 0xe03   :  { %5880 = vmatpush3.msk.msra.mxu0 %vm229_vm1, %v1678_v47  ;;  %5881 = vmatprep.mubr.msk.f32.mxu0 %vm148_vm3, %v1597_v55 }
 0xe04   :  { %6171 = vmatprep.subr.bf16.mxu0 %v6167_v56 }
 0xe06   :  { %5882 = vmatmul.mubr.msk.f32.vlgmr.msra.gmra.mrb[22].mxu0 %vm148_vm3, %v1599_v54  ;;  %v1885_v54 = vld [vmem:[%s7297_s3 + $0x6] sm:$0x1] }
 0xe07   :  { %6173 = vmatpush3.bf16.msra.mxu0 %v6167_v56 }
 0xed4   :  { %v1673_v0 = vpop.f32.mrb[10].mxu1 }
 0xed5   :  { %v6805_v1 = vpop.f32.mrb[20].mxu0  ;;  %v5878_v2 = vpop.f32.mrb[11].mxu1  ;;  %v1769_v12 = vrot.slane %v1673_v0, %v6637_v20 }
 0xed6   :  { %v6807_v3 = vpop.f32.mrb[21].mxu0 }
 0xed9   :  { %v5883_v5 = vpop.f32.mrb[22].mxu0 }
 0xeda   :  { %1763 = vperm.xlu0 %6303, %v5883_v5   ;;  %v1747_v11 = vpop.f32.mrb[23].mxu0 }
 0xedb   :  { %1758 = vperm.xlu1 %6304, %v1747_v11  }
 0xf59   :  { %v1764_v13 = vpop.permute.xlu0 %1763 }
 0xf5a   :  { %v1771_v14 = vadd.f32 %v1769_v12, %v1764_v13  ;;  %v1759_v17 = vpop.permute.xlu1 %1758 }
 0xf5b   :  { %v1770_v18 = vadd.f32 %v1769_v12, %v1759_v17 }
 0xf5c   :  { %v1775_v19 = vmul.f32 0.2, %v1771_v14  ;;  %vm1773_vm15 = vcmp.gt.f32.partialorder %v1771_v14, 0.0 }
 0xf5d   :  { %v1774_v21 = vmul.f32 0.2, %v1770_v18  ;;  %vm1772_vm5 = vcmp.gt.f32.partialorder %v1770_v18, 0.0 }
 0xf5e   :  { %v1777_v22 = vsel %vm1773_vm15, %v1771_v14, %v1775_v19  ;;  %vm2565_vm15 = vcmask 261120  }
 0xf5f   :  { %v1779_v23 = vadd.f32 %v1777_v22, %v6649_v31  ;;  %v1776_v24 = vsel %vm1772_vm5, %v1770_v18, %v1774_v21 }
 0xf60   :  { %v1778_v26 = vadd.f32 %v1776_v24, %v6643_v25 }
 0xf61   :  { %v1783_v27 = vsel %vm65_vm0, %v1779_v23, -inf }
 0xf62   :  { %1784 = vmax.xlane.f32.xlu0 %v1783_v27  ;;  %v1780_v28 = vsel %vm65_vm0, %v1778_v26, -inf }
 0xf63   :  { %1781 = vmax.xlane.f32.xlu1 %v1780_v28 }
 0xfef   :  { %v1785_v30 = vpop.xlane.xlu0 %1784 }
 0xff0   :  { %v1787_v33 = vsub.f32 %v1779_v23, %v1785_v30  ;;  %v1782_v34 = vpop.xlane.xlu1 %1781 }
 0xff1   :  { %v1786_v35 = vsub.f32 %v1778_v26, %v1782_v34 }
 0xff2   :  { %v1790_v36 = vmul.f32 1.442695, %v1787_v33 }
 0xff3   :  { %v1788_v37 = vmul.f32 1.442695, %v1786_v35 }
 0xff4   :  { %6345 = vpow2.f32 %v1790_v36 }
 0xff5   :  { %6347 = vpow2.f32 %v1788_v37 }
 0xffe   :  { %v6346_v38 = vpop.eup %6345 }
 0xfff   :  { %v6348_v39 = vpop.eup %6347  ;;  %v1795_v40 = vsel %vm65_vm0, %v6346_v38, 0.0 }
0x1000   :  { %1796 = vadd.xlane.f32.xlu1 %v1795_v40  ;;  %v1792_v41 = vsel %vm65_vm0, %v6348_v39, 0.0 }
0x1001   :  { %1793 = vadd.xlane.f32.xlu0 %v1792_v41 }
0x1011   :  { %1886 = vrot.lane.b32.xlu1 %v6614_v9, %s6491_s22 }
0x1015   :  { %1888 = vrot.lane.b32.xlu1 %v6612_v8, %s6491_s22 }
0x1017   :  { %1967 = vrot.lane.b32.xlu0 %v6599_v4, %s6492_s23 }
0x108d   :  { %v1797_v42 = vpop.xlane.xlu1 %1796 }
0x108e   :  { %6349 = vrcp.f32 %v1797_v42  ;;  %v1794_v44 = vpop.xlane.xlu0 %1793 }
0x108f   :  { %6351 = vrcp.f32 %v1794_v44  ;;  %v2175_v44 = vld [vmem:[%s7297_s3 + $0x7] sm:$0x1]  ;;  %s7319_s3 = smov 4  }
0x1091   :  { %v1887_v46 = vpop.permute.xlu1 %1886 }
0x1092   :  { %v1968_v47 = vpop.permute.xlu0 %1967 }
0x1093   :  { %5898 = vmatprep.subr.msk.mxu0 %vm229_vm1, %v1968_v47 }
0x1095   :  { %v1889_v48 = vpop.permute.xlu1 %1888 }
0x1096   :  { %v6175_v49 = vpack.c.bf16 %v1889_v48, %v1887_v46 }
0x1098   :  { %v6350_v50 = vpop.eup %6349  ;;  %6177 = vmatpush3.bf16.xpose.msk.msra.mxu1 %vm6618_vm4, %v6175_v49 }
0x1099   :  { %v6352_v51 = vpop.eup %6351  ;;  %6182 = vmatprep.subr.bf16.mxu1 %v6478_v6  ;;  %v1801_v53 = vmul.f32 %v6350_v50, %v6346_v38 }
0x109a   :  { %v1800_v52 = vmul.f32 %v6352_v51, %v6348_v39 }
0x109c   :  { %5888 = vmatprep.mubr.msk.f32.mxu0 %vm65_vm0, %v1800_v52 }
0x109d   :  { %5889 = vmatmul.mubr.msk.f32.vlgmr.msra.gmra.mrb[24].mxu0 %vm65_vm0, %v1801_v53 }
0x109e   :  { %5899 = vmatpush3.msk.msra.mxu0 %vm229_vm1, %v1968_v47  ;;  %5900 = vmatprep.mubr.msk.f32.mxu0 %vm148_vm3, %v1887_v46 }
0x109f   :  { %6179 = vmatprep.subr.bf16.mxu0 %v6175_v49  ;;  %5896 = vmatmul.mubr.msk.f32.vlgmr.msra.gmra.mrb[12].mxu1 %vm148_vm3, %v1885_v54 }
0x10a0   :  { %5914 = vmatprep.mubr.msk.f32.mxu1 %vm6479_vm2, %v6480_v7 }
0x10a1   :  { %5901 = vmatmul.mubr.msk.f32.vlgmr.msra.gmra.mrb[26].mxu0 %vm148_vm3, %v1889_v48 }
0x10a2   :  { %6181 = vmatpush3.bf16.msra.mxu0 %v6175_v49 }
0x1170   :  { %v6837_v55 = vpop.f32.mrb[24].mxu0 }
0x1171   :  { %v6839_v56 = vpop.f32.mrb[25].mxu0 }
0x1172   :  { %v1963_v59 = vpop.f32.mrb[12].mxu1 }
0x1173   :  { %v5897_v60 = vpop.f32.mrb[13].mxu1  ;;  %v2059_v63 = vrot.slane %v1963_v59, %v6637_v20 }
0x1174   :  { %v5902_v61 = vpop.f32.mrb[26].mxu0 }
0x1175   :  { %2053 = vperm.xlu1 %6304, %v5902_v61   ;;  %v2037_v62 = vpop.f32.mrb[27].mxu0 }
0x1176   :  { %2048 = vperm.xlu0 %6303, %v2037_v62  }
0x11f4   :  { %v2054_v0 = vpop.permute.xlu1 %2053 }
0x11f5   :  { %v2061_v2 = vadd.f32 %v2059_v63, %v2054_v0  ;;  %v2049_v5 = vpop.permute.xlu0 %2048 }
0x11f6   :  { %v2060_v11 = vadd.f32 %v2059_v63, %v2049_v5 }
0x11f7   :  { %v2065_v12 = vmul.f32 0.2, %v2061_v2  ;;  %vm2063_vm6 = vcmp.gt.f32.partialorder %v2061_v2, 0.0 }
0x11f8   :  { %v2064_v13 = vmul.f32 0.2, %v2060_v11  ;;  %vm2062_vm7 = vcmp.gt.f32.partialorder %v2060_v11, 0.0 }
0x11f9   :  { %v2067_v14 = vsel %vm2063_vm6, %v2061_v2, %v2065_v12 }
0x11fa   :  { %v2069_v17 = vadd.f32 %v2067_v14, %v6649_v31  ;;  %v2066_v18 = vsel %vm2062_vm7, %v2060_v11, %v2064_v13 }
0x11fb   :  { %v2068_v19 = vadd.f32 %v2066_v18, %v6643_v25 }
0x11fc   :  { %v2073_v21 = vsel %vm65_vm0, %v2069_v17, -inf }
0x11fd   :  { %2074 = vmax.xlane.f32.xlu1 %v2073_v21  ;;  %v2070_v22 = vsel %vm65_vm0, %v2068_v19, -inf }
0x11fe   :  { %2071 = vmax.xlane.f32.xlu0 %v2070_v22 }
0x120e   :  { %2257 = vrot.lane.b32.xlu1 %v6599_v4, %s7321_s15  ;;  %s7330_s15 = smov 12  }
0x1212   :  { %2178 = vrot.lane.b32.xlu1 %v6612_v8, %s7322_s4 }
0x128a   :  { %v2075_v23 = vpop.xlane.xlu1 %2074 }
0x128b   :  { %v2077_v24 = vsub.f32 %v2069_v17, %v2075_v23  ;;  %v2072_v26 = vpop.xlane.xlu0 %2071 }
0x128c   :  { %v2076_v27 = vsub.f32 %v2068_v19, %v2072_v26  ;;  %v2564_v26 = vld [vmem:[%s7300_s6 + $0x18] sm:$0xff] }
0x128d   :  { %v2080_v28 = vmul.f32 1.442695, %v2077_v24 }
0x128e   :  { %v2078_v30 = vmul.f32 1.442695, %v2076_v27  ;;  %v2258_v33 = vpop.permute.xlu1 %2257 }
0x128f   :  { %6353 = vpow2.f32 %v2080_v28  ;;  %5917 = vmatprep.subr.msk.mxu0 %vm229_vm1, %v2258_v33 }
0x1290   :  { %6355 = vpow2.f32 %v2078_v30 }
0x1292   :  { %v2179_v38 = vpop.permute.xlu1 %2178 }
0x1299   :  { %v6354_v34 = vpop.eup %6353 }
0x129a   :  { %v2085_v35 = vsel %vm65_vm0, %v6354_v34, 0.0  ;;  %v6356_v36 = vpop.eup %6355 }
0x129b   :  { %2086 = vadd.xlane.f32.xlu0 %v2085_v35  ;;  %v2082_v4 = vsel %vm65_vm0, %v6356_v36, 0.0 }
0x129f   :  { %2083 = vadd.xlane.f32.xlu0 %v2082_v4 }
0x12b5   :  { %2176 = vrot.lane.b32.xlu0 %v6614_v9, %s7322_s4  ;;  %s6501_s4 = smov 28  }
0x1328   :  { %v2087_v8 = vpop.xlane.xlu0 %2086 }
0x1329   :  { %6357 = vrcp.f32 %v2087_v8 }
0x132c   :  { %v2084_v37 = vpop.xlane.xlu0 %2083 }
0x132d   :  { %6359 = vrcp.f32 %v2084_v37 }
0x1330   :  { %v2177_v39 = vpop.permute.xlu0 %2176 }
0x1331   :  { %v6183_v40 = vpack.c.bf16 %v2179_v38, %v2177_v39 }
0x1333   :  { %6185 = vmatpush3.bf16.xpose.msk.msra.mxu1 %vm6618_vm4, %v6183_v40  ;;  %v6358_v41 = vpop.eup %6357 }
0x1334   :  { %v2091_v47 = vmul.f32 %v6358_v41, %v6354_v34 }
0x1337   :  { %v6360_v42 = vpop.eup %6359 }
0x1338   :  { %v2090_v46 = vmul.f32 %v6360_v42, %v6356_v36 }
0x133a   :  { %5907 = vmatprep.mubr.msk.f32.mxu0 %vm65_vm0, %v2090_v46  ;;  %5915 = vmatmul.mubr.msk.f32.vlgmr.msra.gmra.mrb[14].mxu1 %vm148_vm3, %v2175_v44 }
0x133b   :  { %5908 = vmatmul.mubr.msk.f32.vlgmr.msra.gmra.mrb[28].mxu0 %vm65_vm0, %v2091_v47 }
0x133c   :  { %5918 = vmatpush3.msk.msra.mxu0 %vm229_vm1, %v2258_v33  ;;  %5919 = vmatprep.mubr.msk.f32.mxu0 %vm148_vm3, %v2177_v39  ;;  %v6917_v33 = vld [vmem:[%s7302_s8] sm:$0xf] }
0x133d   :  { %6187 = vmatprep.subr.bf16.mxu0 %v6183_v40 }
0x133f   :  { %5920 = vmatmul.mubr.msk.f32.vlgmr.msra.gmra.mrb[30].mxu0 %vm148_vm3, %v2179_v38 }
0x1340   :  { %6189 = vmatpush3.bf16.msra.mxu0 %v6183_v40 }
0x1341   :  { %6198 = vmatprep.subr.bf16.mxu0 %v6478_v6 }
0x140d   :  { %v2253_v9 = vpop.f32.mrb[14].mxu1 }
0x140e   :  { %v5909_v48 = vpop.f32.mrb[28].mxu0  ;;  %v5916_v49 = vpop.f32.mrb[15].mxu1  ;;  %v2349_v53 = vrot.slane %v2253_v9, %v6637_v20 }
0x140f   :  { %v2166_v50 = vpop.f32.mrb[29].mxu0 }
0x1412   :  { %v5921_v51 = vpop.f32.mrb[30].mxu0 }
0x1413   :  { %2343 = vperm.xlu0 %6303, %v5921_v51   ;;  %v2327_v52 = vpop.f32.mrb[31].mxu0 }
0x1414   :  { %2338 = vperm.xlu1 %6304, %v2327_v52  }
0x1492   :  { %v2344_v54 = vpop.permute.xlu0 %2343 }
0x1493   :  { %v2351_v59 = vadd.f32 %v2349_v53, %v2344_v54  ;;  %v2339_v60 = vpop.permute.xlu1 %2338 }
0x1494   :  { %v2350_v61 = vadd.f32 %v2349_v53, %v2339_v60 }
0x1495   :  { %v2355_v62 = vmul.f32 0.2, %v2351_v59  ;;  %vm2353_vm8 = vcmp.gt.f32.partialorder %v2351_v59, 0.0 }
0x1496   :  { %v2354_v63 = vmul.f32 0.2, %v2350_v61  ;;  %vm2352_vm9 = vcmp.gt.f32.partialorder %v2350_v61, 0.0 }
0x1497   :  { %v2357_v0 = vsel %vm2353_vm8, %v2351_v59, %v2355_v62 }
0x1498   :  { %v2359_v2 = vadd.f32 %v2357_v0, %v6649_v31  ;;  %v2356_v5 = vsel %vm2352_vm9, %v2350_v61, %v2354_v63 }
0x1499   :  { %v2358_v11 = vadd.f32 %v2356_v5, %v6643_v25 }
0x149a   :  { %v2363_v12 = vsel %vm65_vm0, %v2359_v2, -inf }
0x149b   :  { %2364 = vmax.xlane.f32.xlu0 %v2363_v12  ;;  %v2360_v13 = vsel %vm65_vm0, %v2358_v11, -inf }
0x149c   :  { %2361 = vmax.xlane.f32.xlu1 %v2360_v13 }
0x1528   :  { %v2365_v14 = vpop.xlane.xlu0 %2364 }
0x1529   :  { %v2367_v17 = vsub.f32 %v2359_v2, %v2365_v14  ;;  %v2362_v18 = vpop.xlane.xlu1 %2361 }
0x152a   :  { %v2366_v19 = vsub.f32 %v2358_v11, %v2362_v18 }
0x152b   :  { %v2370_v21 = vmul.f32 1.442695, %v2367_v17 }
0x152c   :  { %v2368_v22 = vmul.f32 1.442695, %v2366_v19 }
0x152d   :  { %6361 = vpow2.f32 %v2370_v21 }
0x152e   :  { %6363 = vpow2.f32 %v2368_v22 }
0x1537   :  { %v6362_v23 = vpop.eup %6361 }
0x1538   :  { %v6364_v24 = vpop.eup %6363  ;;  %v2375_v31 = vsel %vm65_vm0, %v6362_v23, 0.0 }
0x1539   :  { %2376 = vadd.xlane.f32.xlu1 %v2375_v31  ;;  %v2372_v25 = vsel %vm65_vm0, %v6364_v24, 0.0 }
0x153a   :  { %2373 = vadd.xlane.f32.xlu0 %v2372_v25  ;;  %v2647_v25 = vld [vmem:[%s7301_s7] sm:$0x1] }
0x154a   :  { %2469 = vrot.lane.b32.xlu1 %v6709_v43, %s7319_s3 }
0x154e   :  { %2475 = vrot.lane.b32.xlu1 %v6743_v32, %s7317_s18 }
0x1550   :  { %2467 = vrot.lane.b32.xlu0 %v6711_v45, %s7319_s3  ;;  %s7331_s3 = smov 16  }
0x1552   :  { %2483 = vrot.lane.b32.xlu1 %v6775_v16, %s7315_s19 }
0x1554   :  { %2477 = vrot.lane.b32.xlu0 %v6741_v29, %s7317_s18  ;;  %s7327_s18 = smov 121  }
0x1556   :  { %2491 = vrot.lane.b32.xlu1 %v6807_v3, %s7309_s26  ;;  %v2562_v3 = vld [vmem:[%s7300_s6 + $0x8] sm:$0xff] }
0x1558   :  { %2485 = vrot.lane.b32.xlu0 %v6773_v15, %s7315_s19  ;;  %s7332_s19 = smov 20  }
0x155a   :  { %2499 = vrot.lane.b32.xlu1 %v6839_v56, %s7313_s27 }
0x155c   :  { %2493 = vrot.lane.b32.xlu0 %v6805_v1, %s7309_s26  ;;  %v2561_v1 = vld [vmem:[%s7300_s6] sm:$0xff] }
0x155d   :  { %v6190_v56 = vpack.c.bf16 %v2562_v3, %v2561_v1 }
0x155e   :  { %2507 = vrot.lane.b32.xlu1 %v2166_v50, %s7311_s0 }
0x155f   :  { %6191 = vmatprep.subr.bf16.mxu1 %v6190_v56 }
0x1560   :  { %2501 = vrot.lane.b32.xlu0 %v6837_v55, %s7313_s27  ;;  %v2563_v55 = vld [vmem:[%s7300_s6 + $0x10] sm:$0xff]  ;;  %6193 = vmatpush3.bf16.msra.mxu1 %v6190_v56  ;;  %s7333_s27 = smov 24  }
0x1561   :  { %v6194_v27 = vpack.c.bf16 %v2564_v26, %v2563_v55 }
0x1563   :  { %6195 = vmatprep.subr.bf16.mxu1 %v6194_v27 }
0x1564   :  { %2509 = vrot.lane.b32.xlu0 %v5909_v48, %s7311_s0  ;;  %6197 = vmatpush3.bf16.msra.mxu1 %v6194_v27 }
0x1565   :  { %5947 = vmatprep.subr.msk.mxu1 %vm229_vm1, %v6917_v33 }
0x15c6   :  { %v2377_v43 = vpop.xlane.xlu1 %2376 }
0x15c7   :  { %6365 = vrcp.f32 %v2377_v43  ;;  %v2374_v45 = vpop.xlane.xlu0 %2373 }
0x15c8   :  { %6367 = vrcp.f32 %v2374_v45 }
0x15ca   :  { %v2470_v35 = vpop.permute.xlu1 %2469 }
0x15cb   :  { %v2468_v34 = vpop.permute.xlu0 %2467  ;;  %v2522_v42 = vsel %vm148_vm3, %v6677_v57, %v2470_v35  ;;  %v6973_v35 = vld [vmem:[%s7295_s1] sm:$0xff] }
0x15cc   :  { %v2521_v44 = vsel %vm148_vm3, %v6679_v58, %v2468_v34  ;;  %v5502_v58 = vld [vmem:[%s7299_s5] ss:$0 sm:$0xff]  ;;  %s7329_s5 = smov 8  }
0x15ce   :  { %v2476_v4 = vpop.permute.xlu1 %2475 }
0x15cf   :  { %v2478_v36 = vpop.permute.xlu0 %2477  ;;  %v2524_v9 = vsel %vm2523_vm10, %v2521_v44, %v2476_v4 }
0x15d0   :  { %v2525_v46 = vsel %vm2523_vm10, %v2522_v42, %v2478_v36 }
0x15d1   :  { %v6366_v29 = vpop.eup %6365 }
0x15d2   :  { %v6368_v32 = vpop.eup %6367  ;;  %v2381_v16 = vmul.f32 %v6366_v29, %v6362_v23  ;;  %v2484_v37 = vpop.permute.xlu1 %2483 }
0x15d3   :  { %v2380_v15 = vmul.f32 %v6368_v32, %v6364_v24  ;;  %v2486_v8 = vpop.permute.xlu0 %2485  ;;  %v2527_v50 = vsel %vm2526_vm11, %v2524_v9, %v2484_v37 }
0x15d4   :  { %v2528_v48 = vsel %vm2526_vm11, %v2525_v46, %v2486_v8 }
0x15d5   :  { %5926 = vmatprep.mubr.msk.f32.mxu0 %vm65_vm0, %v2380_v15 }
0x15d6   :  { %5927 = vmatmul.mubr.msk.f32.vlgmr.msra.gmra.mrb[32].mxu0 %vm65_vm0, %v2381_v16  ;;  %v2492_v39 = vpop.permute.xlu1 %2491 }
0x15d7   :  { %5944 = vmatprep.mubr.msk.f32.mxu0 %vm6479_vm2, %v6480_v7  ;;  %v2494_v38 = vpop.permute.xlu0 %2493  ;;  %v2529_v57 = vsel %vm65_vm0, %v2527_v50, %v2492_v39 }
0x15d8   :  { %v2530_v51 = vsel %vm65_vm0, %v2528_v48, %v2494_v38 }
0x15da   :  { %v2500_v41 = vpop.permute.xlu1 %2499 }
0x15db   :  { %v2502_v40 = vpop.permute.xlu0 %2501  ;;  %v2532_v53 = vsel %vm2531_vm12, %v2529_v57, %v2500_v41 }
0x15dc   :  { %v2533_v52 = vsel %vm2531_vm12, %v2530_v51, %v2502_v40 }
0x15de   :  { %v2508_v49 = vpop.permute.xlu1 %2507 }
0x15df   :  { %v2510_v47 = vpop.permute.xlu0 %2509  ;;  %v2535_v60 = vsel %vm2534_vm13, %v2532_v53, %v2508_v49 }
0x15e0   :  { %v2536_v54 = vsel %vm2534_vm13, %v2533_v52, %v2510_v47 }
0x16a9   :  { %v5928_v28 = vpop.f32.mrb[32].mxu0 }
0x16aa   :  { %2517 = vrot.lane.b32.xlu0 %v5928_v28, %s6501_s4  ;;  %v2456_v30 = vpop.f32.mrb[33].mxu0  ;;  %v6967_v28 = vld [vmem:[%s7295_s1 + $0x8] sm:$0xff] }
0x16ab   :  { %2515 = vrot.lane.b32.xlu1 %v2456_v30, %s6501_s4 }
0x171c   :  { %v2518_v59 = vpop.permute.xlu0 %2517 }
0x171d   :  { %v2539_v61 = vsel %vm2537_vm14, %v2536_v54, %v2518_v59  ;;  %v2516_v62 = vpop.permute.xlu1 %2515 }
0x171e   :  { %v2548_v63 = vadd.f32 %v5502_v58, %v2539_v61  ;;  %v2538_v0 = vsel %vm2537_vm14, %v2535_v60, %v2516_v62  ;;  %v2933_v60 = vld [vmem:[%s7301_s7 + $0x1] sm:$0x1] }
0x171f   :  { %v2547_v2 = vadd.f32 %v5502_v58, %v2538_v0 }
0x1720   :  { %v2552_v5 = vmin.f32 %v2548_v63, 0.0  ;;  %vm2550_vm6 = vcmp.gt.f32.partialorder %v2548_v63, 0.0 }
0x1721   :  { %v2551_v11 = vmin.f32 %v2547_v2, 0.0  ;;  %vm2549_vm5 = vcmp.gt.f32.partialorder %v2547_v2, 0.0 }
0x1722   :  { %v2555_v12 = vmul.f32 1.442695, %v2552_v5 }
0x1723   :  { %v2553_v13 = vmul.f32 1.442695, %v2551_v11 }
0x1724   :  { %6369 = vpow2.f32 %v2555_v12 }
0x1725   :  { %6371 = vpow2.f32 %v2553_v13 }
0x172e   :  { %v6370_v14 = vpop.eup %6369 }
0x172f   :  { %v6372_v17 = vpop.eup %6371  ;;  %v5504_v18 = vadd.f32 -1.0, %v6370_v14 }
0x1730   :  { %v5503_v19 = vadd.f32 -1.0, %v6372_v17 }
0x1731   :  { %v2560_v22 = vsel %vm2550_vm6, %v2548_v63, %v5504_v18 }
0x1732   :  { %v2559_v21 = vsel %vm2549_vm5, %v2547_v2, %v5503_v19 }
0x1733   :  { %5937 = vmatprep.mubr.msk.f32.mxu1 %vm2565_vm15, %v2559_v21 }
0x1734   :  { %5938 = vmatmul.mubr.msk.f32.vlgmr.msra.gmra.mrb[16].mxu1 %vm2565_vm15, %v2560_v22 }
0x1735   :  { %5948 = vmatpush3.msk.msra.mxu1 %vm229_vm1, %v6917_v33 }
0x1736   :  { %6206 = vmatprep.subr.bf16.mxu1 %v6478_v6 }
0x1807   :  { %v6945_v23 = vpop.f32.mrb[16].mxu1 }
0x1808   :  { %v6947_v24 = vpop.f32.mrb[17].mxu1 }
0x1809   :  { %5949 = vmatprep.mubr.msk.f32.mxu1 %vm148_vm3, %v6947_v24  ;;  %v6199_v31 = vpack.c.bf16 %v6945_v23, %v6947_v24 }
0x180a   :  { %5950 = vmatmul.mubr.msk.f32.vlgmr.msra.gmra.mrb[18].mxu1 %vm148_vm3, %v6945_v23 }
0x180b   :  { %6201 = vmatpush3.bf16.xpose.msk.msra.mxu0 %vm6618_vm4, %v6199_v31  ;;  %5963 = vmatprep.mubr.msk.f32.mxu1 %vm6479_vm2, %v6480_v7 }
0x180c   :  { %6203 = vmatprep.subr.bf16.mxu0 %v6199_v31 }
0x1812   :  { %5945 = vmatmul.mubr.msk.f32.vlgmr.msra.gmra.mrb[34].mxu0 %vm148_vm3, %v2647_v25 }
0x1813   :  { %6205 = vmatpush3.bf16.msra.mxu0 %v6199_v31 }
0x18dd   :  { %v5951_v43 = vpop.f32.mrb[18].mxu1 }
0x18de   :  { %2813 = vperm.xlu0 %6303, %v5951_v43   ;;  %v2797_v45 = vpop.f32.mrb[19].mxu1 }
0x18df   :  { %2808 = vperm.xlu1 %6304, %v2797_v45  }
0x18e5   :  { %v2723_v29 = vpop.f32.mrb[34].mxu0 }
0x18e6   :  { %v5946_v32 = vpop.f32.mrb[35].mxu0  ;;  %v2819_v15 = vrot.slane %v2723_v29, %v6637_v20 }
0x195d   :  { %v2814_v16 = vpop.permute.xlu0 %2813 }
0x195e   :  { %v2821_v1 = vadd.f32 %v2819_v15, %v2814_v16  ;;  %v2809_v3 = vpop.permute.xlu1 %2808 }
0x195f   :  { %v2820_v55 = vadd.f32 %v2819_v15, %v2809_v3 }
0x1960   :  { %vm2823_vm7 = vcmp.gt.f32.partialorder %v2821_v1, 0.0  ;;  %v2825_v56 = vmul.f32 0.2, %v2821_v1 }
0x1961   :  { %vm2822_vm8 = vcmp.gt.f32.partialorder %v2820_v55, 0.0  ;;  %v2824_v26 = vmul.f32 0.2, %v2820_v55 }
0x1962   :  { %v2827_v27 = vsel %vm2823_vm7, %v2821_v1, %v2825_v56 }
0x1963   :  { %v2829_v30 = vadd.f32 %v6967_v28, %v2827_v27  ;;  %v2826_v34 = vsel %vm2822_vm8, %v2820_v55, %v2824_v26 }
0x1964   :  { %v2828_v36 = vadd.f32 %v6973_v35, %v2826_v34 }
0x1965   :  { %v2833_v4 = vsel %vm65_vm0, %v2829_v30, -inf }
0x1966   :  { %2834 = vmax.xlane.f32.xlu0 %v2833_v4  ;;  %v2830_v8 = vsel %vm65_vm0, %v2828_v36, -inf }
0x1967   :  { %2831 = vmax.xlane.f32.xlu1 %v2830_v8 }
0x19f3   :  { %v2835_v37 = vpop.xlane.xlu0 %2834 }
0x19f4   :  { %v2837_v38 = vsub.f32 %v2829_v30, %v2835_v37  ;;  %v2832_v39 = vpop.xlane.xlu1 %2831 }
0x19f5   :  { %v2836_v40 = vsub.f32 %v2828_v36, %v2832_v39 }
0x19f6   :  { %v2840_v41 = vmul.f32 1.442695, %v2837_v38 }
0x19f7   :  { %v2838_v42 = vmul.f32 1.442695, %v2836_v40  ;;  %v3223_v40 = vld [vmem:[%s7301_s7 + $0x2] sm:$0x1] }
0x19f8   :  { %6373 = vpow2.f32 %v2840_v41 }
0x19f9   :  { %6375 = vpow2.f32 %v2838_v42 }
0x1a02   :  { %v6374_v44 = vpop.eup %6373 }
0x1a03   :  { %v6376_v46 = vpop.eup %6375  ;;  %v2845_v47 = vsel %vm65_vm0, %v6374_v44, 0.0 }
0x1a04   :  { %2846 = vadd.xlane.f32.xlu1 %v2845_v47  ;;  %v2842_v9 = vsel %vm65_vm0, %v6376_v46, 0.0 }
0x1a05   :  { %2843 = vadd.xlane.f32.xlu0 %v2842_v9 }
0x1a15   :  { %2934 = vrot.lane.b32.xlu1 %v6947_v24, %s6483_s21 }
0x1a19   :  { %2936 = vrot.lane.b32.xlu1 %v6945_v23, %s6483_s21 }
0x1a1b   :  { %3015 = vrot.lane.b32.xlu0 %v6917_v33, %s6482_s20 }
0x1a91   :  { %v2847_v48 = vpop.xlane.xlu1 %2846 }
0x1a92   :  { %6377 = vrcp.f32 %v2847_v48  ;;  %v2844_v49 = vpop.xlane.xlu0 %2843 }
0x1a93   :  { %6379 = vrcp.f32 %v2844_v49 }
0x1a95   :  { %v2935_v50 = vpop.permute.xlu1 %2934 }
0x1a96   :  { %v3016_v51 = vpop.permute.xlu0 %3015 }
0x1a97   :  { %5966 = vmatprep.subr.msk.mxu0 %vm229_vm1, %v3016_v51 }
0x1a99   :  { %v2937_v57 = vpop.permute.xlu1 %2936 }
0x1a9a   :  { %v6207_v52 = vpack.c.bf16 %v2937_v57, %v2935_v50 }
0x1a9c   :  { %v6378_v58 = vpop.eup %6377  ;;  %6209 = vmatpush3.bf16.xpose.msk.msra.mxu1 %vm6618_vm4, %v6207_v52 }
0x1a9d   :  { %v6380_v53 = vpop.eup %6379  ;;  %6214 = vmatprep.subr.bf16.mxu1 %v6478_v6  ;;  %v2851_v59 = vmul.f32 %v6378_v58, %v6374_v44 }
0x1a9e   :  { %v2850_v54 = vmul.f32 %v6380_v53, %v6376_v46 }
0x1aa0   :  { %5956 = vmatprep.mubr.msk.f32.mxu0 %vm65_vm0, %v2850_v54 }
0x1aa1   :  { %5957 = vmatmul.mubr.msk.f32.vlgmr.msra.gmra.mrb[36].mxu0 %vm65_vm0, %v2851_v59 }
0x1aa2   :  { %5967 = vmatpush3.msk.msra.mxu0 %vm229_vm1, %v3016_v51  ;;  %5968 = vmatprep.mubr.msk.f32.mxu0 %vm148_vm3, %v2935_v50 }
0x1aa3   :  { %6211 = vmatprep.subr.bf16.mxu0 %v6207_v52  ;;  %5964 = vmatmul.mubr.msk.f32.vlgmr.msra.gmra.mrb[20].mxu1 %vm148_vm3, %v2933_v60 }
0x1aa4   :  { %5982 = vmatprep.mubr.msk.f32.mxu1 %vm6479_vm2, %v6480_v7 }
0x1aa5   :  { %5969 = vmatmul.mubr.msk.f32.vlgmr.msra.gmra.mrb[38].mxu0 %vm148_vm3, %v2937_v57 }
0x1aa6   :  { %6213 = vmatpush3.bf16.msra.mxu0 %v6207_v52 }
0x1b74   :  { %v7001_v61 = vpop.f32.mrb[36].mxu0 }
0x1b75   :  { %v7003_v62 = vpop.f32.mrb[37].mxu0 }
0x1b76   :  { %v3011_v63 = vpop.f32.mrb[20].mxu1 }
0x1b77   :  { %v5965_v0 = vpop.f32.mrb[21].mxu1  ;;  %v3107_v11 = vrot.slane %v3011_v63, %v6637_v20 }
0x1b78   :  { %v5970_v2 = vpop.f32.mrb[38].mxu0 }
0x1b79   :  { %3101 = vperm.xlu1 %6304, %v5970_v2   ;;  %v3085_v5 = vpop.f32.mrb[39].mxu0 }
0x1b7a   :  { %3096 = vperm.xlu0 %6303, %v3085_v5  }
0x1bf8   :  { %v3102_v12 = vpop.permute.xlu1 %3101 }
0x1bf9   :  { %v3109_v13 = vadd.f32 %v3107_v11, %v3102_v12  ;;  %v3097_v14 = vpop.permute.xlu0 %3096 }
0x1bfa   :  { %v3108_v17 = vadd.f32 %v3107_v11, %v3097_v14 }
0x1bfb   :  { %vm3111_vm9 = vcmp.gt.f32.partialorder %v3109_v13, 0.0  ;;  %v3113_v18 = vmul.f32 0.2, %v3109_v13 }
0x1bfc   :  { %vm3110_vm5 = vcmp.gt.f32.partialorder %v3108_v17, 0.0  ;;  %v3112_v19 = vmul.f32 0.2, %v3108_v17 }
0x1bfd   :  { %v3115_v21 = vsel %vm3111_vm9, %v3109_v13, %v3113_v18 }
0x1bfe   :  { %v3117_v22 = vadd.f32 %v6967_v28, %v3115_v21  ;;  %v3114_v31 = vsel %vm3110_vm5, %v3108_v17, %v3112_v19 }
0x1bff   :  { %v3116_v25 = vadd.f32 %v6973_v35, %v3114_v31 }
0x1c00   :  { %v3121_v43 = vsel %vm65_vm0, %v3117_v22, -inf }
0x1c01   :  { %3122 = vmax.xlane.f32.xlu1 %v3121_v43  ;;  %v3118_v45 = vsel %vm65_vm0, %v3116_v25, -inf }
0x1c02   :  { %3119 = vmax.xlane.f32.xlu0 %v3118_v45 }
0x1c12   :  { %3305 = vrot.lane.b32.xlu1 %v6917_v33, %s6484_s24 }
0x1c16   :  { %3226 = vrot.lane.b32.xlu1 %v6945_v23, %s6485_s25 }
0x1c8e   :  { %v3123_v29 = vpop.xlane.xlu1 %3122 }
0x1c8f   :  { %v3125_v32 = vsub.f32 %v3117_v22, %v3123_v29  ;;  %v3120_v15 = vpop.xlane.xlu0 %3119 }
0x1c90   :  { %v3124_v16 = vsub.f32 %v3116_v25, %v3120_v15 }
0x1c91   :  { %v3128_v1 = vmul.f32 1.442695, %v3125_v32 }
0x1c92   :  { %v3126_v3 = vmul.f32 1.442695, %v3124_v16  ;;  %v3306_v55 = vpop.permute.xlu1 %3305 }
0x1c93   :  { %6381 = vpow2.f32 %v3128_v1  ;;  %5985 = vmatprep.subr.msk.mxu0 %vm229_vm1, %v3306_v55 }
0x1c94   :  { %6383 = vpow2.f32 %v3126_v3 }
0x1c96   :  { %v3227_v4 = vpop.permute.xlu1 %3226 }
0x1c9d   :  { %v6382_v56 = vpop.eup %6381 }
0x1c9e   :  { %v3133_v26 = vsel %vm65_vm0, %v6382_v56, 0.0  ;;  %v6384_v27 = vpop.eup %6383 }
0x1c9f   :  { %3134 = vadd.xlane.f32.xlu0 %v3133_v26  ;;  %v3130_v30 = vsel %vm65_vm0, %v6384_v27, 0.0 }
0x1ca3   :  { %3131 = vadd.xlane.f32.xlu0 %v3130_v30 }
0x1cb9   :  { %3224 = vrot.lane.b32.xlu0 %v6947_v24, %s6485_s25 }
0x1d2c   :  { %v3135_v34 = vpop.xlane.xlu0 %3134 }
0x1d2d   :  { %6385 = vrcp.f32 %v3135_v34 }
0x1d30   :  { %v3132_v36 = vpop.xlane.xlu0 %3131 }
0x1d31   :  { %6387 = vrcp.f32 %v3132_v36 }
0x1d34   :  { %v3225_v8 = vpop.permute.xlu0 %3224 }
0x1d35   :  { %v6215_v37 = vpack.c.bf16 %v3227_v4, %v3225_v8 }
0x1d37   :  { %6217 = vmatpush3.bf16.xpose.msk.msra.mxu1 %vm6618_vm4, %v6215_v37  ;;  %v6386_v38 = vpop.eup %6385 }
0x1d38   :  { %6222 = vmatprep.subr.bf16.mxu1 %v6478_v6  ;;  %v3139_v42 = vmul.f32 %v6386_v38, %v6382_v56  ;;  %v3513_v56 = vld [vmem:[%s7301_s7 + $0x3] sm:$0x1] }
0x1d3b   :  { %v6388_v39 = vpop.eup %6387 }
0x1d3c   :  { %v3138_v41 = vmul.f32 %v6388_v39, %v6384_v27 }
0x1d3e   :  { %5975 = vmatprep.mubr.msk.f32.mxu0 %vm65_vm0, %v3138_v41  ;;  %5983 = vmatmul.mubr.msk.f32.vlgmr.msra.gmra.mrb[22].mxu1 %vm148_vm3, %v3223_v40 }
0x1d3f   :  { %5976 = vmatmul.mubr.msk.f32.vlgmr.msra.gmra.mrb[40].mxu0 %vm65_vm0, %v3139_v42  ;;  %6001 = vmatprep.mubr.msk.f32.mxu1 %vm6479_vm2, %v6480_v7 }
0x1d40   :  { %5986 = vmatpush3.msk.msra.mxu0 %vm229_vm1, %v3306_v55  ;;  %5987 = vmatprep.mubr.msk.f32.mxu0 %vm148_vm3, %v3225_v8 }
0x1d41   :  { %6219 = vmatprep.subr.bf16.mxu0 %v6215_v37 }
0x1d43   :  { %5988 = vmatmul.mubr.msk.f32.vlgmr.msra.gmra.mrb[42].mxu0 %vm148_vm3, %v3227_v4 }
0x1d44   :  { %6221 = vmatpush3.bf16.msra.mxu0 %v6215_v37 }
0x1e11   :  { %v3301_v44 = vpop.f32.mrb[22].mxu1 }
0x1e12   :  { %v7033_v46 = vpop.f32.mrb[40].mxu0  ;;  %v5984_v47 = vpop.f32.mrb[23].mxu1  ;;  %v3397_v50 = vrot.slane %v3301_v44, %v6637_v20 }
0x1e13   :  { %v7035_v9 = vpop.f32.mrb[41].mxu0 }
0x1e16   :  { %v5989_v48 = vpop.f32.mrb[42].mxu0 }
0x1e17   :  { %3391 = vperm.xlu0 %6303, %v5989_v48   ;;  %v3375_v49 = vpop.f32.mrb[43].mxu0 }
0x1e18   :  { %3386 = vperm.xlu1 %6304, %v3375_v49  }
0x1e96   :  { %v3392_v51 = vpop.permute.xlu0 %3391 }
0x1e97   :  { %v3399_v57 = vadd.f32 %v3397_v50, %v3392_v51  ;;  %v3387_v52 = vpop.permute.xlu1 %3386 }
0x1e98   :  { %v3398_v58 = vadd.f32 %v3397_v50, %v3387_v52 }
0x1e99   :  { %vm3401_vm6 = vcmp.gt.f32.partialorder %v3399_v57, 0.0  ;;  %v3403_v53 = vmul.f32 0.2, %v3399_v57 }
0x1e9a   :  { %vm3400_vm7 = vcmp.gt.f32.partialorder %v3398_v58, 0.0  ;;  %v3402_v54 = vmul.f32 0.2, %v3398_v58 }
0x1e9b   :  { %v3405_v59 = vsel %vm3401_vm6, %v3399_v57, %v3403_v53 }
0x1e9c   :  { %v3407_v60 = vadd.f32 %v6967_v28, %v3405_v59  ;;  %v3404_v63 = vsel %vm3400_vm7, %v3398_v58, %v3402_v54 }
0x1e9d   :  { %v3406_v0 = vadd.f32 %v6973_v35, %v3404_v63 }
0x1e9e   :  { %v3411_v2 = vsel %vm65_vm0, %v3407_v60, -inf }
0x1e9f   :  { %3412 = vmax.xlane.f32.xlu0 %v3411_v2  ;;  %v3408_v5 = vsel %vm65_vm0, %v3406_v0, -inf }
0x1ea0   :  { %3409 = vmax.xlane.f32.xlu1 %v3408_v5 }
0x1f2c   :  { %v3413_v11 = vpop.xlane.xlu0 %3412 }
0x1f2d   :  { %v3415_v12 = vsub.f32 %v3407_v60, %v3413_v11  ;;  %v3410_v13 = vpop.xlane.xlu1 %3409 }
0x1f2e   :  { %v3414_v14 = vsub.f32 %v3406_v0, %v3410_v13 }
0x1f2f   :  { %v3418_v17 = vmul.f32 1.442695, %v3415_v12 }
0x1f30   :  { %v3416_v18 = vmul.f32 1.442695, %v3414_v14 }
0x1f31   :  { %6389 = vpow2.f32 %v3418_v17 }
0x1f32   :  { %6391 = vpow2.f32 %v3416_v18 }
0x1f3b   :  { %v6390_v19 = vpop.eup %6389 }
0x1f3c   :  { %v6392_v21 = vpop.eup %6391  ;;  %v3423_v22 = vsel %vm65_vm0, %v6390_v19, 0.0 }
0x1f3d   :  { %3424 = vadd.xlane.f32.xlu1 %v3423_v22  ;;  %v3420_v31 = vsel %vm65_vm0, %v6392_v21, 0.0 }
0x1f3e   :  { %3421 = vadd.xlane.f32.xlu0 %v3420_v31 }
0x1f4e   :  { %3514 = vrot.lane.b32.xlu1 %v6947_v24, %s6487_s29 }
0x1f52   :  { %3516 = vrot.lane.b32.xlu1 %v6945_v23, %s6487_s29 }
0x1f54   :  { %3595 = vrot.lane.b32.xlu0 %v6917_v33, %s6486_s28 }
0x1fca   :  { %v3425_v25 = vpop.xlane.xlu1 %3424 }
0x1fcb   :  { %6393 = vrcp.f32 %v3425_v25  ;;  %v3422_v43 = vpop.xlane.xlu0 %3421 }
0x1fcc   :  { %6395 = vrcp.f32 %v3422_v43 }
0x1fce   :  { %v3515_v45 = vpop.permute.xlu1 %3514 }
0x1fcf   :  { %v3596_v29 = vpop.permute.xlu0 %3595 }
0x1fd0   :  { %6004 = vmatprep.subr.msk.mxu0 %vm229_vm1, %v3596_v29 }
0x1fd2   :  { %v3517_v32 = vpop.permute.xlu1 %3516 }
0x1fd3   :  { %v6223_v15 = vpack.c.bf16 %v3517_v32, %v3515_v45 }
0x1fd5   :  { %v6394_v16 = vpop.eup %6393  ;;  %6225 = vmatpush3.bf16.xpose.msk.msra.mxu1 %vm6618_vm4, %v6223_v15 }
0x1fd6   :  { %v6396_v1 = vpop.eup %6395  ;;  %6230 = vmatprep.subr.bf16.mxu1 %v6478_v6  ;;  %v3429_v55 = vmul.f32 %v6394_v16, %v6390_v19 }
0x1fd7   :  { %v3428_v3 = vmul.f32 %v6396_v1, %v6392_v21  ;;  %v3803_v21 = vld [vmem:[%s7301_s7 + $0x4] sm:$0x1] }
0x1fd9   :  { %5994 = vmatprep.mubr.msk.f32.mxu0 %vm65_vm0, %v3428_v3 }
0x1fda   :  { %5995 = vmatmul.mubr.msk.f32.vlgmr.msra.gmra.mrb[44].mxu0 %vm65_vm0, %v3429_v55 }
0x1fdb   :  { %6005 = vmatpush3.msk.msra.mxu0 %vm229_vm1, %v3596_v29  ;;  %6006 = vmatprep.mubr.msk.f32.mxu0 %vm148_vm3, %v3515_v45 }
0x1fdc   :  { %6227 = vmatprep.subr.bf16.mxu0 %v6223_v15  ;;  %6002 = vmatmul.mubr.msk.f32.vlgmr.msra.gmra.mrb[24].mxu1 %vm148_vm3, %v3513_v56 }
0x1fdd   :  { %6020 = vmatprep.mubr.msk.f32.mxu1 %vm6479_vm2, %v6480_v7 }
0x1fde   :  { %6007 = vmatmul.mubr.msk.f32.vlgmr.msra.gmra.mrb[46].mxu0 %vm148_vm3, %v3517_v32 }
0x1fdf   :  { %6229 = vmatpush3.bf16.msra.mxu0 %v6223_v15 }
0x20ad   :  { %v7065_v26 = vpop.f32.mrb[44].mxu0 }
0x20ae   :  { %v7067_v27 = vpop.f32.mrb[45].mxu0 }
0x20af   :  { %v3591_v30 = vpop.f32.mrb[24].mxu1 }
0x20b0   :  { %v6003_v34 = vpop.f32.mrb[25].mxu1  ;;  %v3687_v8 = vrot.slane %v3591_v30, %v6637_v20 }
0x20b1   :  { %v6008_v36 = vpop.f32.mrb[46].mxu0 }
0x20b2   :  { %3681 = vperm.xlu1 %6304, %v6008_v36   ;;  %v3665_v4 = vpop.f32.mrb[47].mxu0 }
0x20b3   :  { %3676 = vperm.xlu0 %6303, %v3665_v4  }
0x2131   :  { %v3682_v37 = vpop.permute.xlu1 %3681 }
0x2132   :  { %v3689_v38 = vadd.f32 %v3687_v8, %v3682_v37  ;;  %v3677_v39 = vpop.permute.xlu0 %3676 }
0x2133   :  { %v3688_v40 = vadd.f32 %v3687_v8, %v3677_v39 }
0x2134   :  { %vm3691_vm8 = vcmp.gt.f32.partialorder %v3689_v38, 0.0  ;;  %v3693_v41 = vmul.f32 0.2, %v3689_v38 }
0x2135   :  { %vm3690_vm9 = vcmp.gt.f32.partialorder %v3688_v40, 0.0  ;;  %v3692_v42 = vmul.f32 0.2, %v3688_v40 }
0x2136   :  { %v3695_v44 = vsel %vm3691_vm8, %v3689_v38, %v3693_v41 }
0x2137   :  { %v3697_v47 = vadd.f32 %v6967_v28, %v3695_v44  ;;  %v3694_v48 = vsel %vm3690_vm9, %v3688_v40, %v3692_v42 }
0x2138   :  { %v3696_v49 = vadd.f32 %v6973_v35, %v3694_v48 }
0x2139   :  { %v3701_v50 = vsel %vm65_vm0, %v3697_v47, -inf }
0x213a   :  { %3702 = vmax.xlane.f32.xlu1 %v3701_v50  ;;  %v3698_v51 = vsel %vm65_vm0, %v3696_v49, -inf }
0x213b   :  { %3699 = vmax.xlane.f32.xlu0 %v3698_v51 }
0x214b   :  { %3885 = vrot.lane.b32.xlu1 %v6917_v33, %s6483_s21 }
0x214f   :  { %3806 = vrot.lane.b32.xlu1 %v6945_v23, %s6488_s30 }
0x21c7   :  { %v3703_v57 = vpop.xlane.xlu1 %3702 }
0x21c8   :  { %v3705_v52 = vsub.f32 %v3697_v47, %v3703_v57  ;;  %v3700_v58 = vpop.xlane.xlu0 %3699 }
0x21c9   :  { %v3704_v53 = vsub.f32 %v3696_v49, %v3700_v58 }
0x21ca   :  { %v3708_v54 = vmul.f32 1.442695, %v3705_v52 }
0x21cb   :  { %v3706_v59 = vmul.f32 1.442695, %v3704_v53  ;;  %v3886_v60 = vpop.permute.xlu1 %3885 }
0x21cc   :  { %6397 = vpow2.f32 %v3708_v54  ;;  %6023 = vmatprep.subr.msk.mxu0 %vm229_vm1, %v3886_v60 }
0x21cd   :  { %6399 = vpow2.f32 %v3706_v59 }
0x21cf   :  { %v3807_v13 = vpop.permute.xlu1 %3806 }
0x21d6   :  { %v6398_v63 = vpop.eup %6397 }
0x21d7   :  { %v3713_v0 = vsel %vm65_vm0, %v6398_v63, 0.0  ;;  %v6400_v2 = vpop.eup %6399 }
0x21d8   :  { %3714 = vadd.xlane.f32.xlu0 %v3713_v0  ;;  %v3710_v5 = vsel %vm65_vm0, %v6400_v2, 0.0 }
0x21dc   :  { %3711 = vadd.xlane.f32.xlu0 %v3710_v5 }
0x21f2   :  { %3804 = vrot.lane.b32.xlu0 %v6947_v24, %s6488_s30 }
0x2265   :  { %v3715_v11 = vpop.xlane.xlu0 %3714 }
0x2266   :  { %6401 = vrcp.f32 %v3715_v11  ;;  %v4093_v11 = vld [vmem:[%s7301_s7 + $0x5] sm:$0x1] }
0x2269   :  { %v3712_v12 = vpop.xlane.xlu0 %3711 }
0x226a   :  { %6403 = vrcp.f32 %v3712_v12 }
0x226d   :  { %v3805_v14 = vpop.permute.xlu0 %3804 }
0x226e   :  { %v6231_v17 = vpack.c.bf16 %v3807_v13, %v3805_v14 }
0x2270   :  { %6233 = vmatpush3.bf16.xpose.msk.msra.mxu1 %vm6618_vm4, %v6231_v17  ;;  %v6402_v18 = vpop.eup %6401 }
0x2271   :  { %6238 = vmatprep.subr.bf16.mxu1 %v6478_v6  ;;  %v3719_v31 = vmul.f32 %v6402_v18, %v6398_v63 }
0x2274   :  { %v6404_v19 = vpop.eup %6403 }
0x2275   :  { %v3718_v22 = vmul.f32 %v6404_v19, %v6400_v2 }
0x2277   :  { %6013 = vmatprep.mubr.msk.f32.mxu0 %vm65_vm0, %v3718_v22  ;;  %6021 = vmatmul.mubr.msk.f32.vlgmr.msra.gmra.mrb[26].mxu1 %vm148_vm3, %v3803_v21 }
0x2278   :  { %6014 = vmatmul.mubr.msk.f32.vlgmr.msra.gmra.mrb[48].mxu0 %vm65_vm0, %v3719_v31  ;;  %6039 = vmatprep.mubr.msk.f32.mxu1 %vm6479_vm2, %v6480_v7 }
0x2279   :  { %6024 = vmatpush3.msk.msra.mxu0 %vm229_vm1, %v3886_v60  ;;  %6025 = vmatprep.mubr.msk.f32.mxu0 %vm148_vm3, %v3805_v14 }
0x227a   :  { %6235 = vmatprep.subr.bf16.mxu0 %v6231_v17 }
0x227c   :  { %6026 = vmatmul.mubr.msk.f32.vlgmr.msra.gmra.mrb[50].mxu0 %vm148_vm3, %v3807_v13 }
0x227d   :  { %6237 = vmatpush3.bf16.msra.mxu0 %v6231_v17 }
0x234a   :  { %v3881_v25 = vpop.f32.mrb[26].mxu1 }
0x234b   :  { %v7097_v43 = vpop.f32.mrb[48].mxu0  ;;  %v6022_v45 = vpop.f32.mrb[27].mxu1  ;;  %v3977_v16 = vrot.slane %v3881_v25, %v6637_v20 }
0x234c   :  { %v7099_v29 = vpop.f32.mrb[49].mxu0 }
0x234f   :  { %v6027_v32 = vpop.f32.mrb[50].mxu0 }
0x2350   :  { %3971 = vperm.xlu0 %6303, %v6027_v32   ;;  %v3955_v15 = vpop.f32.mrb[51].mxu0 }
0x2351   :  { %3966 = vperm.xlu1 %6304, %v3955_v15  }
0x23cf   :  { %v3972_v1 = vpop.permute.xlu0 %3971 }
0x23d0   :  { %v3979_v3 = vadd.f32 %v3977_v16, %v3972_v1  ;;  %v3967_v55 = vpop.permute.xlu1 %3966 }
0x23d1   :  { %v3978_v56 = vadd.f32 %v3977_v16, %v3967_v55 }
0x23d2   :  { %vm3981_vm5 = vcmp.gt.f32.partialorder %v3979_v3, 0.0  ;;  %v3983_v30 = vmul.f32 0.2, %v3979_v3 }
0x23d3   :  { %vm3980_vm6 = vcmp.gt.f32.partialorder %v3978_v56, 0.0  ;;  %v3982_v34 = vmul.f32 0.2, %v3978_v56 }
0x23d4   :  { %v3985_v36 = vsel %vm3981_vm5, %v3979_v3, %v3983_v30 }
0x23d5   :  { %v3987_v4 = vadd.f32 %v6967_v28, %v3985_v36  ;;  %v3984_v8 = vsel %vm3980_vm6, %v3978_v56, %v3982_v34 }
0x23d6   :  { %v3986_v37 = vadd.f32 %v6973_v35, %v3984_v8 }
0x23d7   :  { %v3991_v38 = vsel %vm65_vm0, %v3987_v4, -inf }
0x23d8   :  { %3992 = vmax.xlane.f32.xlu0 %v3991_v38  ;;  %v3988_v39 = vsel %vm65_vm0, %v3986_v37, -inf }
0x23d9   :  { %3989 = vmax.xlane.f32.xlu1 %v3988_v39 }
0x2465   :  { %v3993_v40 = vpop.xlane.xlu0 %3992 }
0x2466   :  { %v3995_v41 = vsub.f32 %v3987_v4, %v3993_v40  ;;  %v3990_v42 = vpop.xlane.xlu1 %3989 }
0x2467   :  { %v3994_v44 = vsub.f32 %v3986_v37, %v3990_v42 }
0x2468   :  { %v3998_v47 = vmul.f32 1.442695, %v3995_v41 }
0x2469   :  { %v3996_v48 = vmul.f32 1.442695, %v3994_v44 }
0x246a   :  { %6405 = vpow2.f32 %v3998_v47 }
0x246b   :  { %6407 = vpow2.f32 %v3996_v48 }
0x2474   :  { %v6406_v49 = vpop.eup %6405 }
0x2475   :  { %v6408_v50 = vpop.eup %6407  ;;  %v4003_v51 = vsel %vm65_vm0, %v6406_v49, 0.0 }
0x2476   :  { %4004 = vadd.xlane.f32.xlu1 %v4003_v51  ;;  %v4000_v57 = vsel %vm65_vm0, %v6408_v50, 0.0 }
0x2477   :  { %4001 = vadd.xlane.f32.xlu0 %v4000_v57 }
0x2487   :  { %4094 = vrot.lane.b32.xlu1 %v6947_v24, %s6490_s17 }
0x248b   :  { %4096 = vrot.lane.b32.xlu1 %v6945_v23, %s6490_s17 }
0x248d   :  { %4175 = vrot.lane.b32.xlu0 %v6917_v33, %s6489_s16 }
0x2503   :  { %v4005_v52 = vpop.xlane.xlu1 %4004 }
0x2504   :  { %6409 = vrcp.f32 %v4005_v52  ;;  %v4002_v58 = vpop.xlane.xlu0 %4001 }
0x2505   :  { %6411 = vrcp.f32 %v4002_v58  ;;  %v4383_v58 = vld [vmem:[%s7301_s7 + $0x6] sm:$0x1] }
0x2507   :  { %v4095_v53 = vpop.permute.xlu1 %4094 }
0x2508   :  { %v4176_v54 = vpop.permute.xlu0 %4175 }
0x2509   :  { %6042 = vmatprep.subr.msk.mxu0 %vm229_vm1, %v4176_v54 }
0x250b   :  { %v4097_v59 = vpop.permute.xlu1 %4096 }
0x250c   :  { %v6239_v60 = vpack.c.bf16 %v4097_v59, %v4095_v53 }
0x250e   :  { %v6410_v63 = vpop.eup %6409  ;;  %6241 = vmatpush3.bf16.xpose.msk.msra.mxu1 %vm6618_vm4, %v6239_v60 }
0x250f   :  { %v6412_v0 = vpop.eup %6411  ;;  %6246 = vmatprep.subr.bf16.mxu1 %v6478_v6  ;;  %v4009_v5 = vmul.f32 %v6410_v63, %v6406_v49 }
0x2510   :  { %v4008_v2 = vmul.f32 %v6412_v0, %v6408_v50 }
0x2512   :  { %6032 = vmatprep.mubr.msk.f32.mxu0 %vm65_vm0, %v4008_v2 }
0x2513   :  { %6033 = vmatmul.mubr.msk.f32.vlgmr.msra.gmra.mrb[52].mxu0 %vm65_vm0, %v4009_v5 }
0x2514   :  { %6043 = vmatpush3.msk.msra.mxu0 %vm229_vm1, %v4176_v54  ;;  %6044 = vmatprep.mubr.msk.f32.mxu0 %vm148_vm3, %v4095_v53 }
0x2515   :  { %6243 = vmatprep.subr.bf16.mxu0 %v6239_v60  ;;  %6040 = vmatmul.mubr.msk.f32.vlgmr.msra.gmra.mrb[28].mxu1 %vm148_vm3, %v4093_v11 }
0x2516   :  { %6058 = vmatprep.mubr.msk.f32.mxu1 %vm6479_vm2, %v6480_v7 }
0x2517   :  { %6045 = vmatmul.mubr.msk.f32.vlgmr.msra.gmra.mrb[54].mxu0 %vm148_vm3, %v4097_v59 }
0x2518   :  { %6245 = vmatpush3.bf16.msra.mxu0 %v6239_v60 }
0x25e6   :  { %v7129_v12 = vpop.f32.mrb[52].mxu0 }
0x25e7   :  { %v7131_v13 = vpop.f32.mrb[53].mxu0 }
0x25e8   :  { %v4171_v14 = vpop.f32.mrb[28].mxu1 }
0x25e9   :  { %v6041_v17 = vpop.f32.mrb[29].mxu1  ;;  %v4267_v21 = vrot.slane %v4171_v14, %v6637_v20 }
0x25ea   :  { %v6046_v18 = vpop.f32.mrb[54].mxu0 }
0x25eb   :  { %4261 = vperm.xlu1 %6304, %v6046_v18   ;;  %v4245_v19 = vpop.f32.mrb[55].mxu0 }
0x25ec   :  { %4256 = vperm.xlu0 %6303, %v4245_v19  }
0x266a   :  { %v4262_v22 = vpop.permute.xlu1 %4261 }
0x266b   :  { %v4269_v31 = vadd.f32 %v4267_v21, %v4262_v22  ;;  %v4257_v25 = vpop.permute.xlu0 %4256 }
0x266c   :  { %v4268_v45 = vadd.f32 %v4267_v21, %v4257_v25 }
0x266d   :  { %vm4271_vm7 = vcmp.gt.f32.partialorder %v4269_v31, 0.0  ;;  %v4273_v32 = vmul.f32 0.2, %v4269_v31 }
0x266e   :  { %vm4270_vm8 = vcmp.gt.f32.partialorder %v4268_v45, 0.0  ;;  %v4272_v15 = vmul.f32 0.2, %v4268_v45 }
0x266f   :  { %v4275_v16 = vsel %vm4271_vm7, %v4269_v31, %v4273_v32 }
0x2670   :  { %v4277_v1 = vadd.f32 %v6967_v28, %v4275_v16  ;;  %v4274_v3 = vsel %vm4270_vm8, %v4268_v45, %v4272_v15 }
0x2671   :  { %v4276_v55 = vadd.f32 %v6973_v35, %v4274_v3 }
0x2672   :  { %v4281_v56 = vsel %vm65_vm0, %v4277_v1, -inf }
0x2673   :  { %4282 = vmax.xlane.f32.xlu1 %v4281_v56  ;;  %v4278_v30 = vsel %vm65_vm0, %v4276_v55, -inf }
0x2674   :  { %4279 = vmax.xlane.f32.xlu0 %v4278_v30 }
0x2684   :  { %4465 = vrot.lane.b32.xlu1 %v6917_v33, %s6492_s23 }
0x2688   :  { %4386 = vrot.lane.b32.xlu1 %v6945_v23, %s6491_s22 }
0x2700   :  { %v4283_v34 = vpop.xlane.xlu1 %4282 }
0x2701   :  { %v4285_v36 = vsub.f32 %v4277_v1, %v4283_v34  ;;  %v4280_v4 = vpop.xlane.xlu0 %4279 }
0x2702   :  { %v4284_v8 = vsub.f32 %v4276_v55, %v4280_v4 }
0x2703   :  { %v4288_v37 = vmul.f32 1.442695, %v4285_v36 }
0x2704   :  { %v4286_v38 = vmul.f32 1.442695, %v4284_v8  ;;  %v4466_v39 = vpop.permute.xlu1 %4465 }
0x2705   :  { %6413 = vpow2.f32 %v4288_v37  ;;  %6061 = vmatprep.subr.msk.mxu0 %vm229_vm1, %v4466_v39 }
0x2706   :  { %6415 = vpow2.f32 %v4286_v38 }
0x2708   :  { %v4387_v49 = vpop.permute.xlu1 %4386 }
0x270f   :  { %v6414_v40 = vpop.eup %6413 }
0x2710   :  { %v4293_v41 = vsel %vm65_vm0, %v6414_v40, 0.0  ;;  %v6416_v42 = vpop.eup %6415 }
0x2711   :  { %4294 = vadd.xlane.f32.xlu0 %v4293_v41  ;;  %v4290_v44 = vsel %vm65_vm0, %v6416_v42, 0.0 }
0x2715   :  { %4291 = vadd.xlane.f32.xlu0 %v4290_v44 }
0x272b   :  { %4384 = vrot.lane.b32.xlu0 %v6947_v24, %s6491_s22  ;;  %s7326_s22 = smov 100  }
0x279e   :  { %v4295_v47 = vpop.xlane.xlu0 %4294 }
0x279f   :  { %6417 = vrcp.f32 %v4295_v47 }
0x27a2   :  { %v4292_v48 = vpop.xlane.xlu0 %4291 }
0x27a3   :  { %6419 = vrcp.f32 %v4292_v48 }
0x27a6   :  { %v4385_v50 = vpop.permute.xlu0 %4384 }
0x27a7   :  { %v6247_v51 = vpack.c.bf16 %v4387_v49, %v4385_v50 }
0x27a9   :  { %6249 = vmatpush3.bf16.xpose.msk.msra.mxu1 %vm6618_vm4, %v6247_v51  ;;  %v6418_v57 = vpop.eup %6417 }
0x27aa   :  { %6254 = vmatprep.subr.bf16.mxu1 %v6478_v6  ;;  %v4299_v54 = vmul.f32 %v6418_v57, %v6414_v40 }
0x27ad   :  { %v6420_v52 = vpop.eup %6419 }
0x27ae   :  { %v4298_v53 = vmul.f32 %v6420_v52, %v6416_v42 }
0x27b0   :  { %6051 = vmatprep.mubr.msk.f32.mxu0 %vm65_vm0, %v4298_v53  ;;  %6059 = vmatmul.mubr.msk.f32.vlgmr.msra.gmra.mrb[30].mxu1 %vm148_vm3, %v4383_v58 }
0x27b1   :  { %6052 = vmatmul.mubr.msk.f32.vlgmr.msra.gmra.mrb[56].mxu0 %vm65_vm0, %v4299_v54  ;;  %6077 = vmatprep.mubr.msk.f32.mxu1 %vm6479_vm2, %v6480_v7 }
0x27b2   :  { %6062 = vmatpush3.msk.msra.mxu0 %vm229_vm1, %v4466_v39  ;;  %6063 = vmatprep.mubr.msk.f32.mxu0 %vm148_vm3, %v4385_v50 }
0x27b3   :  { %6251 = vmatprep.subr.bf16.mxu0 %v6247_v51 }
0x27b5   :  { %6064 = vmatmul.mubr.msk.f32.vlgmr.msra.gmra.mrb[58].mxu0 %vm148_vm3, %v4387_v49 }
0x27b6   :  { %6253 = vmatpush3.bf16.msra.mxu0 %v6247_v51 }
0x2883   :  { %v4461_v59 = vpop.f32.mrb[30].mxu1 }
0x2884   :  { %v7161_v60 = vpop.f32.mrb[56].mxu0  ;;  %v6060_v63 = vpop.f32.mrb[31].mxu1  ;;  %v4557_v11 = vrot.slane %v4461_v59, %v6637_v20 }
0x2885   :  { %v7163_v0 = vpop.f32.mrb[57].mxu0 }
0x2888   :  { %v6065_v2 = vpop.f32.mrb[58].mxu0 }
0x2889   :  { %4551 = vperm.xlu0 %6303, %v6065_v2   ;;  %v4535_v5 = vpop.f32.mrb[59].mxu0 }
0x288a   :  { %4546 = vperm.xlu1 %6304, %v4535_v5  }
0x2908   :  { %v4552_v14 = vpop.permute.xlu0 %4551 }
0x2909   :  { %v4559_v17 = vadd.f32 %v4557_v11, %v4552_v14  ;;  %v4547_v18 = vpop.permute.xlu1 %4546 }
0x290a   :  { %v4558_v19 = vadd.f32 %v4557_v11, %v4547_v18 }
0x290b   :  { %vm4561_vm9 = vcmp.gt.f32.partialorder %v4559_v17, 0.0  ;;  %v4563_v21 = vmul.f32 0.2, %v4559_v17 }
0x290c   :  { %vm4560_vm5 = vcmp.gt.f32.partialorder %v4558_v19, 0.0  ;;  %v4562_v22 = vmul.f32 0.2, %v4558_v19 }
0x290d   :  { %v4565_v31 = vsel %vm4561_vm9, %v4559_v17, %v4563_v21 }
0x290e   :  { %v4567_v25 = vadd.f32 %v6967_v28, %v4565_v31  ;;  %v4564_v45 = vsel %vm4560_vm5, %v4558_v19, %v4562_v22 }
0x290f   :  { %v4566_v32 = vadd.f32 %v6973_v35, %v4564_v45 }
0x2910   :  { %v4571_v15 = vsel %vm65_vm0, %v4567_v25, -inf }
0x2911   :  { %4572 = vmax.xlane.f32.xlu0 %v4571_v15  ;;  %v4568_v16 = vsel %vm65_vm0, %v4566_v32, -inf }
0x2912   :  { %4569 = vmax.xlane.f32.xlu1 %v4568_v16 }
0x299e   :  { %v4573_v1 = vpop.xlane.xlu0 %4572 }
0x299f   :  { %v4575_v3 = vsub.f32 %v4567_v25, %v4573_v1  ;;  %v4570_v55 = vpop.xlane.xlu1 %4569  ;;  %v5057_v1 = vld [vmem:[%s7304_s10 + $0x18] sm:$0xff] }
0x29a0   :  { %v4574_v56 = vsub.f32 %v4566_v32, %v4570_v55 }
0x29a1   :  { %v4578_v30 = vmul.f32 1.442695, %v4575_v3 }
0x29a2   :  { %v4576_v34 = vmul.f32 1.442695, %v4574_v56  ;;  %v5219_v56 = vld [vmem:[%s7306_s12] sm:$0xff] }
0x29a3   :  { %6421 = vpow2.f32 %v4578_v30 }
0x29a4   :  { %6423 = vpow2.f32 %v4576_v34 }
0x29ad   :  { %v6422_v36 = vpop.eup %6421 }
0x29ae   :  { %v6424_v4 = vpop.eup %6423  ;;  %v4583_v8 = vsel %vm65_vm0, %v6422_v36, 0.0 }
0x29af   :  { %4584 = vadd.xlane.f32.xlu1 %v4583_v8  ;;  %v4580_v37 = vsel %vm65_vm0, %v6424_v4, 0.0 }
0x29b0   :  { %4581 = vadd.xlane.f32.xlu0 %v4580_v37 }
0x29c0   :  { %4674 = vrot.lane.b32.xlu1 %v6947_v24, %s7326_s22 }
0x29c4   :  { %4676 = vrot.lane.b32.xlu1 %v6945_v23, %s7326_s22 }
0x29c6   :  { %4755 = vrot.lane.b32.xlu0 %v6917_v33, %s7327_s18  ;;  %v4673_v33 = vld [vmem:[%s7301_s7 + $0x7] sm:$0x1]  ;;  %s7328_s7 = smov 4  }
0x2a3c   :  { %v4585_v38 = vpop.xlane.xlu1 %4584 }
0x2a3d   :  { %6425 = vrcp.f32 %v4585_v38  ;;  %v4582_v39 = vpop.xlane.xlu0 %4581 }
0x2a3e   :  { %6427 = vrcp.f32 %v4582_v39 }
0x2a40   :  { %v4675_v40 = vpop.permute.xlu1 %4674 }
0x2a41   :  { %v4756_v41 = vpop.permute.xlu0 %4755 }
0x2a42   :  { %6080 = vmatprep.subr.msk.mxu0 %vm229_vm1, %v4756_v41 }
0x2a44   :  { %v4677_v42 = vpop.permute.xlu1 %4676 }
0x2a45   :  { %v6255_v44 = vpack.c.bf16 %v4677_v42, %v4675_v40 }
0x2a47   :  { %v6426_v47 = vpop.eup %6425  ;;  %6257 = vmatpush3.bf16.xpose.msk.msra.mxu1 %vm6618_vm4, %v6255_v44 }
0x2a48   :  { %v6428_v24 = vpop.eup %6427  ;;  %v4589_v23 = vmul.f32 %v6426_v47, %v6422_v36 }
0x2a49   :  { %v4588_v48 = vmul.f32 %v6428_v24, %v6424_v4 }
0x2a4b   :  { %6070 = vmatprep.mubr.msk.f32.mxu0 %vm65_vm0, %v4588_v48 }
0x2a4c   :  { %6071 = vmatmul.mubr.msk.f32.vlgmr.msra.gmra.mrb[60].mxu0 %vm65_vm0, %v4589_v23 }
0x2a4d   :  { %6081 = vmatpush3.msk.msra.mxu0 %vm229_vm1, %v4756_v41  ;;  %6082 = vmatprep.mubr.msk.f32.mxu0 %vm148_vm3, %v4675_v40 }
0x2a4e   :  { %6259 = vmatprep.subr.bf16.mxu0 %v6255_v44  ;;  %6078 = vmatmul.mubr.msk.f32.vlgmr.msra.gmra.mrb[32].mxu1 %vm148_vm3, %v4673_v33 }
0x2a50   :  { %6083 = vmatmul.mubr.msk.f32.vlgmr.msra.gmra.mrb[62].mxu0 %vm148_vm3, %v4677_v42 }
0x2a51   :  { %6261 = vmatpush3.bf16.msra.mxu0 %v6255_v44 }
0x2a52   :  { %6270 = vmatprep.subr.bf16.mxu0 %v6478_v6 }
0x2b1f   :  { %v6072_v10 = vpop.f32.mrb[60].mxu0 }
0x2b20   :  { %v4664_v49 = vpop.f32.mrb[61].mxu0 }
0x2b21   :  { %v4751_v50 = vpop.f32.mrb[32].mxu1 }
0x2b22   :  { %v6079_v51 = vpop.f32.mrb[33].mxu1  ;;  %v4847_v58 = vrot.slane %v4751_v50, %v6637_v20 }
0x2b23   :  { %v6084_v57 = vpop.f32.mrb[62].mxu0  ;;  %v5571_v51 = vld [vmem:[%s7303_s9] ss:$0 sm:$0xff] }
0x2b24   :  { %4841 = vperm.xlu1 %6304, %v6084_v57   ;;  %v4825_v52 = vpop.f32.mrb[63].mxu0 }
0x2b25   :  { %4836 = vperm.xlu0 %6303, %v4825_v52  }
0x2ba3   :  { %v4842_v53 = vpop.permute.xlu1 %4841 }
0x2ba4   :  { %v4849_v54 = vadd.f32 %v4847_v58, %v4842_v53  ;;  %v4837_v59 = vpop.permute.xlu0 %4836 }
0x2ba5   :  { %v4848_v63 = vadd.f32 %v4847_v58, %v4837_v59 }
0x2ba6   :  { %vm4851_vm1 = vcmp.gt.f32.partialorder %v4849_v54, 0.0  ;;  %v4853_v2 = vmul.f32 0.2, %v4849_v54 }
0x2ba7   :  { %vm4850_vm4 = vcmp.gt.f32.partialorder %v4848_v63, 0.0  ;;  %v4852_v5 = vmul.f32 0.2, %v4848_v63 }
0x2ba8   :  { %v4855_v11 = vsel %vm4851_vm1, %v4849_v54, %v4853_v2 }
0x2ba9   :  { %v4857_v6 = vadd.f32 %v6967_v28, %v4855_v11  ;;  %v4854_v14 = vsel %vm4850_vm4, %v4848_v63, %v4852_v5 }
0x2baa   :  { %v4856_v17 = vadd.f32 %v6973_v35, %v4854_v14 }
0x2bab   :  { %v4861_v18 = vsel %vm65_vm0, %v4857_v6, -inf }
0x2bac   :  { %4862 = vmax.xlane.f32.xlu1 %v4861_v18  ;;  %v4858_v19 = vsel %vm65_vm0, %v4856_v17, -inf }
0x2bad   :  { %4859 = vmax.xlane.f32.xlu0 %v4858_v19 }
0x2bbd   :  { %4965 = vrot.lane.b32.xlu1 %v7035_v9, %s7328_s7 }
0x2bc1   :  { %4973 = vrot.lane.b32.xlu1 %v7067_v27, %s7329_s5 }
0x2bc5   :  { %4975 = vrot.lane.b32.xlu1 %v7065_v26, %s7329_s5 }
0x2bc9   :  { %4983 = vrot.lane.b32.xlu1 %v7097_v43, %s7330_s15 }
0x2bcd   :  { %4991 = vrot.lane.b32.xlu1 %v7129_v12, %s7331_s3 }
0x2bd1   :  { %4999 = vrot.lane.b32.xlu1 %v7161_v60, %s7332_s19 }
0x2bd5   :  { %5007 = vrot.lane.b32.xlu1 %v6072_v10, %s7333_s27 }
0x2c39   :  { %v4863_v28 = vpop.xlane.xlu1 %4862 }
0x2c3a   :  { %v4865_v35 = vsub.f32 %v4857_v6, %v4863_v28  ;;  %v4860_v9 = vpop.xlane.xlu0 %4859 }
0x2c3b   :  { %v4864_v21 = vsub.f32 %v4856_v17, %v4860_v9 }
0x2c3c   :  { %v4868_v22 = vmul.f32 1.442695, %v4865_v35 }
0x2c3d   :  { %v4866_v27 = vmul.f32 1.442695, %v4864_v21  ;;  %v4966_v30 = vpop.permute.xlu1 %4965 }
0x2c3e   :  { %v5019_v48 = vsel %vm148_vm3, %v7003_v62, %v4966_v30 }
0x2c3f   :  { %6429 = vpow2.f32 %v4866_v27 }
0x2c40   :  { %6431 = vpow2.f32 %v4868_v22 }
0x2c41   :  { %v4974_v34 = vpop.permute.xlu1 %4973 }
0x2c42   :  { %v5021_v33 = vsel %vm2523_vm10, %v5019_v48, %v4974_v34 }
0x2c45   :  { %v4976_v36 = vpop.permute.xlu1 %4975 }
0x2c49   :  { %v6430_v26 = vpop.eup %6429  ;;  %v4984_v8 = vpop.permute.xlu1 %4983 }
0x2c4a   :  { %v4870_v31 = vsel %vm65_vm0, %v6430_v26, 0.0  ;;  %v6432_v43 = vpop.eup %6431 }
0x2c4b   :  { %4871 = vadd.xlane.f32.xlu0 %v4870_v31  ;;  %v4873_v12 = vsel %vm65_vm0, %v6432_v43, 0.0 }
0x2c4d   :  { %v4992_v38 = vpop.permute.xlu1 %4991 }
0x2c4f   :  { %4874 = vadd.xlane.f32.xlu0 %v4873_v12 }
0x2c51   :  { %v5000_v42 = vpop.permute.xlu1 %4999 }
0x2c55   :  { %v5008_v23 = vpop.permute.xlu1 %5007 }
0x2c65   :  { %4967 = vrot.lane.b32.xlu0 %v7033_v46, %s7328_s7 }
0x2c69   :  { %4981 = vrot.lane.b32.xlu0 %v7099_v29, %s7330_s15  ;;  %v5054_v29 = vld [vmem:[%s7304_s10] sm:$0xff] }
0x2c6d   :  { %4989 = vrot.lane.b32.xlu0 %v7131_v13, %s7331_s3  ;;  %v5055_v13 = vld [vmem:[%s7304_s10 + $0x8] sm:$0xff] }
0x2c6e   :  { %v6262_v16 = vpack.c.bf16 %v5055_v13, %v5054_v29 }
0x2c70   :  { %6263 = vmatprep.subr.bf16.mxu1 %v6262_v16 }
0x2c71   :  { %4997 = vrot.lane.b32.xlu0 %v7163_v0, %s7332_s19  ;;  %v5056_v0 = vld [vmem:[%s7304_s10 + $0x10] sm:$0xff]  ;;  %6265 = vmatpush3.bf16.msra.mxu1 %v6262_v16  ;;  %v6451_v16 = vld [vmem:[%s7295_s1 + $0x8] sm:$0xff] }
0x2c72   :  { %v6266_v3 = vpack.c.bf16 %v5057_v1, %v5056_v0 }
0x2c74   :  { %6267 = vmatprep.subr.bf16.mxu1 %v6266_v3 }
0x2c75   :  { %5005 = vrot.lane.b32.xlu0 %v4664_v49, %s7333_s27  ;;  %6269 = vmatpush3.bf16.msra.mxu1 %v6266_v3 }
0x2c76   :  { %6110 = vmatprep.subr.mxu1 %v5219_v56 }
0x2cd8   :  { %v4872_v60 = vpop.xlane.xlu0 %4871 }
0x2cd9   :  { %6433 = vrcp.f32 %v4872_v60 }
0x2cdc   :  { %v4875_v25 = vpop.xlane.xlu0 %4874 }
0x2cdd   :  { %6435 = vrcp.f32 %v4875_v25 }
0x2ce0   :  { %v4968_v4 = vpop.permute.xlu0 %4967 }
0x2ce1   :  { %v5020_v39 = vsel %vm148_vm3, %v7001_v61, %v4968_v4 }
0x2ce2   :  { %v5022_v41 = vsel %vm2523_vm10, %v5020_v39, %v4976_v36 }
0x2ce3   :  { %v6434_v45 = vpop.eup %6433  ;;  %v5024_v44 = vsel %vm2526_vm11, %v5022_v41, %v4984_v8 }
0x2ce4   :  { %v4878_v32 = vmul.f32 %v6434_v45, %v6430_v26  ;;  %v4982_v37 = vpop.permute.xlu0 %4981  ;;  %v5026_v24 = vsel %vm65_vm0, %v5024_v44, %v4992_v38  ;;  %v5139_v26 = vld [vmem:[%s7305_s11] sm:$0x1] }
0x2ce5   :  { %v5028_v49 = vsel %vm2531_vm12, %v5026_v24, %v5000_v42  ;;  %v5023_v61 = vsel %vm2526_vm11, %v5021_v33, %v4982_v37  ;;  %vm6272_vm11 = vmpackc.low %vm2523_vm10, %vm2523_vm10  ;;  %v5581_v33 = vld [vmem:[%s7307_s13] ss:$0 sm:$0xff] }
0x2ce6   :  { %6089 = vmatprep.mubr.msk.f32.mxu0 %vm65_vm0, %v4878_v32  ;;  %v5030_v58 = vsel %vm2534_vm13, %v5028_v49, %v5008_v23 }
0x2ce7   :  { %v6436_v46 = vpop.eup %6435 }
0x2ce8   :  { %v4879_v15 = vmul.f32 %v6436_v46, %v6432_v43  ;;  %v4990_v40 = vpop.permute.xlu0 %4989 }
0x2ce9   :  { %v5025_v50 = vsel %vm65_vm0, %v5023_v61, %v4990_v40 }
0x2cea   :  { %6090 = vmatmul.mubr.msk.f32.vlgmr.msra.gmra.mrb[64].mxu0 %vm65_vm0, %v4879_v15 }
0x2ceb   :  { %6107 = vmatprep.mubr.msk.f32.mxu0 %vm6479_vm2, %v6480_v7 }
0x2cec   :  { %v4998_v47 = vpop.permute.xlu0 %4997 }
0x2ced   :  { %v5027_v57 = vsel %vm2531_vm12, %v5025_v50, %v4998_v47 }
0x2cf0   :  { %v5006_v10 = vpop.permute.xlu0 %5005 }
0x2cf1   :  { %v5029_v62 = vsel %vm2534_vm13, %v5027_v57, %v5006_v10 }
0x2dbd   :  { %v6091_v7 = vpop.f32.mrb[64].mxu0 }
0x2dbe   :  { %5015 = vrot.lane.b32.xlu1 %v6091_v7, %s6501_s4  ;;  %v4954_v55 = vpop.f32.mrb[65].mxu0  ;;  %v6452_v7 = vld [vmem:[%s7295_s1] sm:$0xff] }
0x2dbf   :  { %5013 = vrot.lane.b32.xlu0 %v4954_v55, %s6501_s4 }
0x2e30   :  { %v5016_v52 = vpop.permute.xlu1 %5015 }
0x2e31   :  { %v5032_v53 = vsel %vm2537_vm14, %v5030_v58, %v5016_v52  ;;  %v5014_v54 = vpop.permute.xlu0 %5013 }
0x2e32   :  { %v5041_v59 = vadd.f32 %v5571_v51, %v5032_v53  ;;  %v5031_v63 = vsel %vm2537_vm14, %v5029_v62, %v5014_v54 }
0x2e33   :  { %v5040_v2 = vadd.f32 %v5571_v51, %v5031_v63 }
0x2e34   :  { %v5045_v5 = vmin.f32 %v5041_v59, 0.0  ;;  %vm5043_vm3 = vcmp.gt.f32.partialorder %v5041_v59, 0.0 }
0x2e35   :  { %v5044_v11 = vmin.f32 %v5040_v2, 0.0  ;;  %vm5042_vm2 = vcmp.gt.f32.partialorder %v5040_v2, 0.0 }
0x2e36   :  { %v5048_v6 = vmul.f32 1.442695, %v5045_v5 }
0x2e37   :  { %v5046_v14 = vmul.f32 1.442695, %v5044_v11 }
0x2e38   :  { %6437 = vpow2.f32 %v5048_v6 }
0x2e39   :  { %6439 = vpow2.f32 %v5046_v14 }
0x2e42   :  { %v6438_v17 = vpop.eup %6437 }
0x2e43   :  { %v6440_v18 = vpop.eup %6439  ;;  %v5573_v19 = vadd.f32 -1.0, %v6438_v17 }
0x2e44   :  { %v5572_v28 = vadd.f32 -1.0, %v6440_v18 }
0x2e45   :  { %v5053_v9 = vsel %vm5043_vm3, %v5041_v59, %v5573_v19 }
0x2e46   :  { %v5052_v35 = vsel %vm5042_vm2, %v5040_v2, %v5572_v28 }
0x2e47   :  { %6100 = vmatprep.mubr.msk.f32.mxu1 %vm2565_vm15, %v5052_v35 }
0x2e48   :  { %6101 = vmatmul.mubr.msk.f32.vlgmr.msra.gmra.mrb[34].mxu1 %vm2565_vm15, %v5053_v9 }
0x2e49   :  { %6111 = vmatpush3.msra.mxu1 %v5219_v56 }
0x2f1b   :  { %v6102_v21 = vpop.f32.mrb[34].mxu1 }
0x2f1c   :  { %v5130_v22 = vpop.f32.mrb[35].mxu1 }
0x2f1d   :  { %v6271_v27 = vpack.c.bf16 %v6102_v21, %v5130_v22  ;;  %6112 = vmatprep.mubr.msk.f32.mxu1 %vm2523_vm10, %v5130_v22 }
0x2f1e   :  { %6113 = vmatmul.mubr.msk.f32.vlgmr.msra.gmra.mrb[36].mxu1 %vm2523_vm10, %v6102_v21 }
0x2f1f   :  { %6273 = vmatpush3.bf16.xpose.msk.msra.mxu0 %vm6272_vm11, %v6271_v27 }
0x2f20   :  { %6275 = vmatprep.subr.bf16.mxu0 %v6271_v27 }
0x2f26   :  { %6108 = vmatmul.mubr.msk.f32.vlgmr.msra.gmra.mrb[66].mxu0 %vm2523_vm10, %v5139_v26 }
0x2f27   :  { %6277 = vmatpush3.bf16.msra.mxu0 %v6271_v27 }
0x2ff1   :  { %v6114_v31 = vpop.f32.mrb[36].mxu1 }
0x2ff2   :  { %5302 = vperm.xlu1 %6304, %v6114_v31   ;;  %v5286_v43 = vpop.f32.mrb[37].mxu1 }
0x2ff3   :  { %5297 = vperm.xlu0 %6303, %v5286_v43  }
0x2ff9   :  { %v5215_v12 = vpop.f32.mrb[66].mxu0 }
0x2ffa   :  { %v6109_v60 = vpop.f32.mrb[67].mxu0  ;;  %v5308_v25 = vrot.slane %v5215_v12, %v6637_v20 }
0x3071   :  { %v5303_v45 = vpop.permute.xlu1 %5302 }
0x3072   :  { %v5310_v32 = vadd.f32 %v5308_v25, %v5303_v45  ;;  %v5298_v46 = vpop.permute.xlu0 %5297 }
0x3073   :  { %v5309_v15 = vadd.f32 %v5308_v25, %v5298_v46 }
0x3074   :  { %vm5312_vm12 = vcmp.gt.f32.partialorder %v5310_v32, 0.0  ;;  %v5314_v29 = vmul.f32 0.2, %v5310_v32 }
0x3075   :  { %vm5311_vm13 = vcmp.gt.f32.partialorder %v5309_v15, 0.0  ;;  %v5313_v13 = vmul.f32 0.2, %v5309_v15 }
0x3076   :  { %v5316_v0 = vsel %vm5312_vm12, %v5310_v32, %v5314_v29 }
0x3077   :  { %v5318_v1 = vadd.f32 %v6451_v16, %v5316_v0  ;;  %v5315_v3 = vsel %vm5311_vm13, %v5309_v15, %v5313_v13 }
0x3078   :  { %v5317_v20 = vadd.f32 %v6452_v7, %v5315_v3 }
0x3079   :  { %v5322_v55 = vsel %vm65_vm0, %v5318_v1, -inf }
0x307a   :  { %5323 = vmax.xlane.f32.xlu1 %v5322_v55  ;;  %v5319_v56 = vsel %vm65_vm0, %v5317_v20, -inf }
0x307b   :  { %5320 = vmax.xlane.f32.xlu0 %v5319_v56 }
0x3107   :  { %v5324_v30 = vpop.xlane.xlu1 %5323 }
0x3108   :  { %v5326_v34 = vsub.f32 %v5318_v1, %v5324_v30  ;;  %v5321_v36 = vpop.xlane.xlu0 %5320 }
0x3109   :  { %v5325_v4 = vsub.f32 %v5317_v20, %v5321_v36 }
0x310a   :  { %v5329_v8 = vmul.f32 1.442695, %v5326_v34 }
0x310b   :  { %v5327_v37 = vmul.f32 1.442695, %v5325_v4 }
0x310d   :  { %6441 = vpow2.f32 %v5327_v37 }
0x310e   :  { %6443 = vpow2.f32 %v5329_v8 }
0x3117   :  { %v6442_v38 = vpop.eup %6441 }
0x3118   :  { %v5331_v39 = vsel %vm65_vm0, %v6442_v38, 0.0  ;;  %v6444_v40 = vpop.eup %6443 }
0x3119   :  { %5332 = vadd.xlane.f32.xlu0 %v5331_v39  ;;  %v5334_v41 = vsel %vm65_vm0, %v6444_v40, 0.0 }
0x311d   :  { %5335 = vadd.xlane.f32.xlu0 %v5334_v41 }
0x31a6   :  { %v5333_v42 = vpop.xlane.xlu0 %5332 }
0x31a7   :  { %6445 = vrcp.f32 %v5333_v42 }
0x31aa   :  { %v5336_v44 = vpop.xlane.xlu0 %5335 }
0x31ab   :  { %6447 = vrcp.f32 %v5336_v44 }
0x31b1   :  { %v6446_v47 = vpop.eup %6445 }
0x31b2   :  { %v5339_v24 = vmul.f32 %v6446_v47, %v6442_v38 }
0x31b4   :  { %6119 = vmatprep.mubr.msk.f32.mxu0 %vm65_vm0, %v5339_v24 }
0x31b5   :  { %v6448_v48 = vpop.eup %6447 }
0x31b6   :  { %v5340_v23 = vmul.f32 %v6448_v48, %v6444_v40 }
0x31b8   :  { %6120 = vmatmul.mubr.msk.f32.vlgmr.msra.gmra.mrb[68].mxu0 %vm65_vm0, %v5340_v23 }
0x328b   :  { %v6121_v10 = vpop.f32.mrb[68].mxu0 }
0x328c   :  { %v5426_v49 = vadd.f32 %v6121_v10, %v5581_v33  ;;  %v5420_v61 = vpop.f32.mrb[69].mxu0 }
0x328d   :  { %v5421_v50 = vadd.f32 %v5581_v33, %v5420_v61 }
0x328e   :  { %5430 = vst.msk [vmem:[%s7308_s14 + $0x8] sm:$0xff] %vm2523_vm10, %v5426_v49 }
0x328f   :  { %5429 = vst.msk [vmem:[%s7308_s14] sm:$0xff] %vm2523_vm10, %v5421_v50 }
0x3290   :  { %5435 = vsyncpa [#allocation3], 1 }

</bundles_post_ra>
